<compile_context>
chip_gen: v5e
topology: v5e:2x2
jax: 0.10.0
libtpu: 0.0.40
codegen_flags: <defaults>
</compile_context>

<pallas_src>
import numpy as np
import jax
import jax.numpy as jnp
from jax.experimental import pallas as pl
from jax.experimental.pallas import tpu as pltpu

# ----------------------------- constants ------------------------------------
SPATIAL_COMPRESSION = 16
TEMPORAL_COMPRESSION = 8
LATENT_CHANNELS = 16
_SPATIAL_ALIGN = 16
_TEMPORAL_ALIGN = 8
_UINT8_MAX_F = 255.0
_SC = SPATIAL_COMPRESSION
_TC = TEMPORAL_COMPRESSION
PATCH_FEATS = 3 * _TC * _SC * _SC  # 6144

_VMEM_LIMIT = 40 * 1024 * 1024     # ~23 MiB live; <= v7x's 64 MiB physical


def _round_up(n, m):
    return ((n + m - 1) // m) * m


def _pick_tm(m):
    """M tile: multiple of 32 (int8 output tiling); split into >=2 tiles when
    M allows, so the 'parallel' M axis maps onto v7x's two TensorCores."""
    if m >= 2 * 512:
        return 512
    if m > 32:
        return _round_up((m + 1) // 2, 32)
    return 32


def _pick_tn(n, preferred=512):
    """Largest multiple-of-128 divisor of n that is <= preferred."""
    if n <= preferred:
        return n
    for cand in range(preferred, 127, -128):
        if n % cand == 0:
            return cand
    raise ValueError(f"no lane-dense (multiple-of-128) tile divides N={n}")


# ===================== fused encode+decode Pallas kernel =====================
def _make_fused_kernel(normalize, to_uint8):
    def kernel(a_ref, ew_ref, eb_ref, dw_ref, db_ref, o_ref, lat_sc):
        # Encode once per M tile (j == 0); the 16-wide latent lives only in a
        # VMEM scratch and is reused for every decode chunk j.
        @pl.when(pl.program_id(1) == 0)
        def _():
            x = a_ref[...]
            if normalize:                       # raw [0..255] bf16 -> [-1, 1]
                x = x * (2.0 / _UINT8_MAX_F) - 1.0
            lat = jnp.dot(x, ew_ref[...], preferred_element_type=jnp.float32)
            lat_sc[...] = (lat + eb_ref[...].astype(jnp.float32)
                           ).astype(jnp.bfloat16)

        # Decode chunk j: [tm, 16] @ [16, tn] -> [tm, tn] (lane-dense store).
        y = jnp.dot(lat_sc[...], dw_ref[...], preferred_element_type=jnp.float32)
        y = y + db_ref[...].astype(jnp.float32)
        if to_uint8:
            y = jnp.clip(y, -1.0, 1.0)
            y = (y + 1.0) * (_UINT8_MAX_F * 0.5) + 0.5
            o_ref[...] = y.astype(jnp.int32).astype(jnp.uint8)
        else:
            o_ref[...] = y.astype(o_ref.dtype)
    return kernel


def fused_autoencode_slab(a, enc_w, enc_b, dec_w, dec_b, *,
                          normalize=False, to_uint8=False):
    """a: [M, K] bf16 patches -> reconstruction slab [M, N].

    Latent (width 16) is kept in a VMEM scratch; never written to HBM.
    normalize: apply raw-[0..255] -> [-1,1] scaling inside the kernel.
    to_uint8 : emit uint8 reconstruction directly (clip/scale fused)."""
    M, K = a.shape
    Kw, L = enc_w.shape
    L2, N = dec_w.shape
    assert K == Kw and L == L2 == LATENT_CHANNELS

    tm = _pick_tm(M)
    Mp = _round_up(M, tm)
    if Mp != M:                                   # pad M once, crop once
        a = jnp.pad(a, ((0, Mp - M), (0, 0)))
    tn = _pick_tn(N, 512)
    grid = (Mp // tm, N // tn)                    # (M parallel, N sequential)
    out_dtype = jnp.uint8 if to_uint8 else jnp.bfloat16

    out = pl.pallas_call(
        _make_fused_kernel(normalize, to_uint8),
        out_shape=jax.ShapeDtypeStruct((Mp, N), out_dtype),
        grid_spec=pltpu.PrefetchScalarGridSpec(
            num_scalar_prefetch=0,
            grid=grid,
            in_specs=[
                # Patches: block index constant over j -> DMA'd once per i.
                pl.BlockSpec((tm, K), lambda i, j: (i, 0)),
                # enc_w loaded whole, once (no lane-sparse k-tiles).
                pl.BlockSpec((K, L), lambda i, j: (0, 0)),
                pl.BlockSpec((1, L), lambda i, j: (0, 0)),
                # Decoder weights/bias stream with the N axis.
                pl.BlockSpec((L, tn), lambda i, j: (0, j)),
                pl.BlockSpec((1, tn), lambda i, j: (0, j)),
            ],
            out_specs=pl.BlockSpec((tm, tn), lambda i, j: (i, j)),
            scratch_shapes=[pltpu.VMEM((tm, L), jnp.bfloat16)],
        ),
        compiler_params=pltpu.CompilerParams(
            dimension_semantics=("parallel", "arbitrary"),
            vmem_limit_bytes=_VMEM_LIMIT),
    )(a, enc_w, enc_b.reshape(1, L), dec_w, dec_b.reshape(1, N))
    return out[:M] if Mp != M else out


# ====================== standalone encoder Pallas kernel =====================
def _make_encode_kernel(normalize):
    def kernel(a_ref, ew_ref, eb_ref, o_ref):
        x = a_ref[...]
        if normalize:
            x = x * (2.0 / _UINT8_MAX_F) - 1.0
        lat = jnp.dot(x, ew_ref[...], preferred_element_type=jnp.float32)
        o_ref[...] = (lat + eb_ref[...].astype(jnp.float32)).astype(o_ref.dtype)
    return kernel


def pallas_encode_slab(a, enc_w, enc_b, *, normalize=False):
    """a: [M, K] bf16 patches -> latent [M, 16] bf16.

    Full K per step (single dot, no accumulator scratch); the 16-wide latent
    store is masked/lane-sparse but ~384x smaller than the input pass."""
    M, K = a.shape
    K2, L = enc_w.shape
    assert K == K2 and L == LATENT_CHANNELS
    tm = _pick_tm(M)
    Mp = _round_up(M, tm)
    if Mp != M:
        a = jnp.pad(a, ((0, Mp - M), (0, 0)))

    out = pl.pallas_call(
        _make_encode_kernel(normalize),
        out_shape=jax.ShapeDtypeStruct((Mp, L), jnp.bfloat16),
        grid_spec=pltpu.PrefetchScalarGridSpec(
            num_scalar_prefetch=0,
            grid=(Mp // tm,),
            in_specs=[
                pl.BlockSpec((tm, K), lambda i: (i, 0)),
                pl.BlockSpec((K, L), lambda i: (0, 0)),
                pl.BlockSpec((1, L), lambda i: (0, 0)),
            ],
            out_specs=pl.BlockSpec((tm, L), lambda i: (i, 0)),
        ),
        compiler_params=pltpu.CompilerParams(
            dimension_semantics=("parallel",),
            vmem_limit_bytes=_VMEM_LIMIT),
    )(a, enc_w, enc_b.reshape(1, L))
    return out[:M] if Mp != M else out


# ====================== standalone decoder Pallas kernel =====================
def _decode_kernel(lat_ref, dw_ref, db_ref, o_ref):
    # Single K step (K=16): no f32 accumulator scratch needed.
    y = jnp.dot(lat_ref[...], dw_ref[...], preferred_element_type=jnp.float32)
    o_ref[...] = (y + db_ref[...].astype(jnp.float32)).astype(o_ref.dtype)


def pallas_decode_slab(lat, dec_w, dec_b):
    """lat: [M, 16] bf16 -> reconstruction slab [M, N] bf16."""
    M, L = lat.shape
    L2, N = dec_w.shape
    assert L == L2 == LATENT_CHANNELS
    tm = _pick_tm(M)
    Mp = _round_up(M, tm)
    if Mp != M:
        lat = jnp.pad(lat, ((0, Mp - M), (0, 0)))
    tn = _pick_tn(N, 512)
    grid = (Mp // tm, N // tn)

    out = pl.pallas_call(
        _decode_kernel,
        out_shape=jax.ShapeDtypeStruct((Mp, N), jnp.bfloat16),
        grid_spec=pltpu.PrefetchScalarGridSpec(
            num_scalar_prefetch=0,
            grid=grid,
            in_specs=[
                pl.BlockSpec((tm, L), lambda i, j: (i, 0)),
                pl.BlockSpec((L, tn), lambda i, j: (0, j)),
                pl.BlockSpec((1, tn), lambda i, j: (0, j)),
            ],
            out_specs=pl.BlockSpec((tm, tn), lambda i, j: (i, j)),
        ),
        compiler_params=pltpu.CompilerParams(
            dimension_semantics=("parallel", "parallel"),
            vmem_limit_bytes=_VMEM_LIMIT),
    )(lat, dec_w, dec_b.reshape(1, N))
    return out[:M] if Mp != M else out


# --------------------------- synthetic tokenizer -----------------------------
def init_params(key, dtype=jnp.bfloat16):
    k1, k2, k3, k4 = jax.random.split(key, 4)
    enc_w = jax.random.normal(k1, (PATCH_FEATS, LATENT_CHANNELS), jnp.float32)
    enc_w = enc_w / np.sqrt(PATCH_FEATS)
    enc_b = jax.random.normal(k2, (LATENT_CHANNELS,), jnp.float32) * 0.01
    dec_w = jax.random.normal(k3, (LATENT_CHANNELS, PATCH_FEATS), jnp.float32)
    dec_w = dec_w / np.sqrt(LATENT_CHANNELS)
    dec_b = jax.random.normal(k4, (PATCH_FEATS,), jnp.float32) * 0.01
    return {
        "enc_w": enc_w.astype(dtype), "enc_b": enc_b.astype(dtype),
        "dec_w": dec_w.astype(dtype), "dec_b": dec_b.astype(dtype),
    }


# --------- patchify helpers (XLA-side; feature order = (dt, dh, dw, c)) ------
# TODO(synk): the patchify transpose is still one XLA HBM pass per direction;
#             expressing the patch gather in the kernel via a (t,h,w) index_map
#             needs non-rectangular blocks and is left out.  Decode columns of
#             the first temporal patch that the causal crop discards are also
#             still computed (optional ~29% saving on 17-frame windows).
def _causal_pad_front(x_bthwc):
    pad = _TC - 1
    return jnp.concatenate([jnp.repeat(x_bthwc[:, :1], pad, axis=1), x_bthwc],
                           axis=1)


def _patchify_thwc(x_bthwc):
    B, T8, H, W, C = x_bthwc.shape
    t, h, w = T8 // _TC, H // _SC, W // _SC
    x = x_bthwc.reshape(B, t, _TC, h, _SC, w, _SC, C)
    x = x.transpose(0, 1, 3, 5, 2, 4, 6, 7)
    return x.reshape(B * t * h * w, PATCH_FEATS), (B, t, h, w)


def _unpatchify_thwc(y, dims):
    B, t, h, w = dims
    y = y.reshape(B, t, h, w, _TC, _SC, _SC, 3)
    y = y.transpose(0, 1, 4, 2, 5, 3, 6, 7)
    return y.reshape(B, t * _TC, h * _SC, w * _SC, 3)


# ------------------------------ public API -----------------------------------
@jax.jit
def encode(x, params):
    """x: [B,3,T,H,W] in [-1,1], T = 1+8n  ->  latent [B,16,t,h,w]."""
    B, C, T, H, W = x.shape
    assert C == 3 and (T - 1) % _TC == 0 and H % _SC == 0 and W % _SC == 0
    x = jnp.transpose(x.astype(jnp.bfloat16), (0, 2, 3, 4, 1))   # BTHWC
    x = _causal_pad_front(x)
    a, (Bq, t, h, w) = _patchify_thwc(x)
    lat = pallas_encode_slab(a, params["enc_w"], params["enc_b"])  # [M, 16]
    lat = lat.reshape(Bq, t, h, w, LATENT_CHANNELS)
    return jnp.transpose(lat, (0, 4, 1, 2, 3))


@jax.jit
def decode(latent, params):
    """latent: [B,16,t,h,w] -> [B,3,1+(t-1)*8,16h,16w] bf16 in [-1,1]."""
    B, L, t, h, w = latent.shape
    lat = jnp.transpose(latent.astype(jnp.bfloat16), (0, 2, 3, 4, 1))
    lat = lat.reshape(B * t * h * w, L)
    y = pallas_decode_slab(lat, params["dec_w"], params["dec_b"])
    y = _unpatchify_thwc(y, (B, t, h, w))[:, _TC - 1:]           # causal crop
    return jnp.transpose(y, (0, 4, 1, 2, 3))


@jax.jit
def autoencode(x, params):
    """x: [B,3,T,H,W] in [-1,1] -> reconstruction [B,3,T,H,W] in [-1,1]."""
    x = jnp.transpose(x.astype(jnp.bfloat16), (0, 2, 3, 4, 1))   # BTHWC
    x = _causal_pad_front(x)
    a, dims = _patchify_thwc(x)
    y = fused_autoencode_slab(a, params["enc_w"], params["enc_b"],
                              params["dec_w"], params["dec_b"])
    y = _unpatchify_thwc(y, dims)[:, _TC - 1:]
    return jnp.transpose(y, (0, 4, 1, 2, 3))


@jax.jit
def _forward_window(window, enc_w, enc_b, dec_w, dec_b):
    """window: [B',Tw,Hp,Wp,3] raw [0..255] (uint8/float) -> uint8 same shape.

    Normalization and uint8 conversion are fused inside the Pallas kernel."""
    x = _causal_pad_front(window.astype(jnp.bfloat16))
    a, dims = _patchify_thwc(x)
    y = fused_autoencode_slab(a, enc_w, enc_b, dec_w, dec_b,
                              normalize=True, to_uint8=True)
    return _unpatchify_thwc(y, dims)[:, _TC - 1:]


# ------------------------------ numpy glue -----------------------------------
def pad_video_batch(batch):
    """Pads [B,T,H,W,3] so H,W are multiples of 16 and (T-1) is a multiple of 8."""
    time, height, width = batch.shape[1:-1]
    a = _SPATIAL_ALIGN
    h_pad = (a - height % a) if height % a != 0 else 0
    w_pad = (a - width % a) if width % a != 0 else 0
    a = _TEMPORAL_ALIGN
    t_pad = (a - (time - 1) % a) if (time - 1) % a != 0 else 0
    crop_region = [t_pad, t_pad + time,
                   h_pad >> 1, (h_pad >> 1) + height,
                   w_pad >> 1, (w_pad >> 1) + width]
    batch = np.pad(batch,
                   ((0, 0),
                    (t_pad, 0),
                    (h_pad >> 1, h_pad - (h_pad >> 1)),
                    (w_pad >> 1, w_pad - (w_pad >> 1)),
                    (0, 0)),
                   mode="constant")
    return batch, crop_region


def unpad_video_batch(batch, crop_region):
    t0, t1, h0, h1, w0, w1 = crop_region
    return batch[:, t0:t1, h0:h1, w0:w1, :]


def numpy2tensor(video, dtype=jnp.bfloat16):
    """[B,T,H,W,3] in [0..255] -> jnp [B,3,T,H,W] in [-1..1]."""
    x = jnp.asarray(video, dtype=jnp.float32) / _UINT8_MAX_F * 2.0 - 1.0
    return jnp.transpose(x, (0, 4, 1, 2, 3)).astype(dtype)


def tensor2numpy(t):
    """jnp [B,3,T,H,W] in [-1..1] -> np.uint8 [B,T,H,W,3] in [0..255]."""
    x = np.asarray(t, dtype=np.float32)
    x = (np.clip(x, -1.0, 1.0) + 1.0) / 2.0
    x = (x * _UINT8_MAX_F + 0.5).astype(np.uint8)
    return np.transpose(x, (0, 2, 3, 4, 1))


def causal_video_tokenizer_forward(video, params, temporal_window=17):
    """Reproduces CausalVideoTokenizer.forward: sliding-window autoencode.

    All full windows are stacked along the batch axis into a single kernel
    dispatch (ragged tail handled separately); uint8 is shipped to the device.

    video: np.ndarray [B,T,H,W,3] in [0..255]  ->  np.uint8 [B,T,H,W,3]."""
    assert video.ndim == 5, "input video should be of 5D."
    B, num_frames, H, W, C = video.shape
    tw = temporal_window
    n_full = num_frames // tw
    rem = num_frames - n_full * tw

    def _to_device(arr):
        if np.issubdtype(arr.dtype, np.integer):
            return jnp.asarray(arr.astype(np.uint8))      # 4x less H2D than f32
        return jnp.asarray(arr.astype(np.float32))

    pending = []
    if n_full > 0:
        blk = np.ascontiguousarray(
            video[:, :n_full * tw]
            .reshape(B, n_full, tw, H, W, C)
            .transpose(1, 0, 2, 3, 4, 5)
            .reshape(n_full * B, tw, H, W, C))
        padded, crop = pad_video_batch(blk)
        dev = _forward_window(_to_device(padded),
                              params["enc_w"], params["enc_b"],
                              params["dec_w"], params["dec_b"])
        pending.append(("full", dev, crop))
    if rem > 0:
        padded, crop = pad_video_batch(video[:, n_full * tw:])
        dev = _forward_window(_to_device(padded),
                              params["enc_w"], params["enc_b"],
                              params["dec_w"], params["dec_b"])
        pending.append(("tail", dev, crop))

    parts = []
    for kind, dev, crop in pending:                      # block after dispatch
        out = unpad_video_batch(np.asarray(jax.block_until_ready(dev)), crop)
        if kind == "full":
            out = (out.reshape(n_full, B, tw, H, W, C)
                      .transpose(1, 0, 2, 3, 4, 5)
                      .reshape(B, n_full * tw, H, W, C))
        parts.append(out)
    return np.concatenate(parts, axis=1)


# --------------------------------- main --------------------------------------
if __name__ == "__main__":
    key = jax.random.PRNGKey(0)
    k_vid, k_par = jax.random.split(key)

    # Small deterministic input: B=1, T=20 frames, 32x32 spatial, RGB, uint8.
    B, T, H, W = 1, 20, 32, 32
    video = np.asarray(
        jax.random.randint(k_vid, (B, T, H, W, 3), 0, 256, dtype=jnp.int32),
        dtype=np.uint8)

    params = init_params(k_par)

    # Full sliding-window forward (fused encode+decode kernel, uint8 epilogue).
    out = causal_video_tokenizer_forward(video, params, temporal_window=17)
    assert out.shape == (B, T, H, W, 3), out.shape
    assert out.dtype == np.uint8, out.dtype

    # Standalone encode/decode/autoencode path on the first window.
    window, crop = pad_video_batch(video[:, :17])
    x = numpy2tensor(window)                       # [1,3,17,32,32] bf16 [-1,1]
    lat = jax.block_until_ready(encode(x, params))
    assert lat.shape == (B, LATENT_CHANNELS, 3, H // _SC, W // _SC), lat.shape
    rec = jax.block_until_ready(decode(lat, params))
    assert rec.shape == x.shape, rec.shape

    # Fused autoencode must match encode->decode (same weights, same math).
    rec_fused = jax.block_until_ready(autoencode(x, params))
    d0 = np.max(np.abs(np.asarray(rec, np.float32) -
                       np.asarray(rec_fused, np.float32)))
    assert d0 <= 0.05, f"fused vs. encode/decode mismatch: {d0}"

    # Forward (in-kernel normalization + uint8 epilogue) agrees with the
    # host-normalized standalone path up to a few uint8 levels (bf16 rounding).
    rec_u8 = unpad_video_batch(tensor2numpy(rec), crop)
    d1 = np.max(np.abs(rec_u8.astype(np.int16) - out[:, :17].astype(np.int16)))
    assert d1 <= 8, f"forward vs. standalone path mismatch: {d1}"

    print("KERNEL_OK")
</pallas_src>

<mosaic_0001>
module attributes {stable_mosaic.version = 11 : i64} {
  func.func @kernel(%arg0: i32, %arg1: i32, %arg2: memref<32x6144xbf16, #tpu.memory_space<vmem>>, %arg3: memref<6144x16xbf16, #tpu.memory_space<vmem>>, %arg4: memref<1x16xbf16, #tpu.memory_space<vmem>>, %arg5: memref<16x512xbf16, #tpu.memory_space<vmem>>, %arg6: memref<1x512xbf16, #tpu.memory_space<vmem>>, %arg7: memref<32x512xi8, #tpu.memory_space<vmem>>, %arg8: memref<32x16xbf16, #tpu.memory_space<vmem>>) attributes {dimension_semantics = [#tpu.dimension_semantics<parallel>, #tpu.dimension_semantics<arbitrary>], iteration_bounds = array<i64: 1, 12>, scalar_prefetch = 0 : i64, scratch_operands = 1 : i64, tpu.core_type = #tpu.core_type<tc>, window_params = [{transform_indices = @transform_0, window_bounds = array<i64: 32, 6144>}, {pipeline_mode = #tpu.pipeline_mode<synchronous>, transform_indices = @transform_1, window_bounds = array<i64: 6144, 16>}, {pipeline_mode = #tpu.pipeline_mode<synchronous>, transform_indices = @transform_2, window_bounds = array<i64: 1, 16>}, {transform_indices = @transform_3, window_bounds = array<i64: 16, 512>}, {transform_indices = @transform_4, window_bounds = array<i64: 1, 512>}, {transform_indices = @transform_5, window_bounds = array<i64: 32, 512>}]} {
    %c0_i32 = arith.constant 0 : i32
    %0 = arith.cmpi eq, %arg1, %c0_i32 : i32
    %1 = arith.extui %0 : i1 to i32
    %c0_i32_0 = arith.constant 0 : i32
    %2 = arith.cmpi ne, %1, %c0_i32_0 : i32
    scf.if %2 {
      %c0_13 = arith.constant 0 : index
      %c0_14 = arith.constant 0 : index
      %23 = vector.load %arg2[%c0_13, %c0_14] : memref<32x6144xbf16, #tpu.memory_space<vmem>>, vector<32x6144xbf16>
      %cst_15 = arith.constant 7.873530e-03 : bf16
      %24 = vector.broadcast %cst_15 : bf16 to vector<32x6144xbf16>
      %25 = arith.mulf %23, %24 : vector<32x6144xbf16>
      %cst_16 = arith.constant 1.000000e+00 : bf16
      %26 = vector.broadcast %cst_16 : bf16 to vector<32x6144xbf16>
      %27 = arith.subf %25, %26 : vector<32x6144xbf16>
      %c0_17 = arith.constant 0 : index
      %c0_18 = arith.constant 0 : index
      %28 = vector.load %arg3[%c0_17, %c0_18] : memref<6144x16xbf16, #tpu.memory_space<vmem>>, vector<6144x16xbf16>
      %cst_19 = arith.constant dense<0.000000e+00> : vector<32x16xf32>
      %29 = tpu.matmul %27, %28, %cst_19 {dimension_numbers = #tpu.dot_dimension_numbers<[1], [0], [0], [1], [0, 0, 1, 1], [], []>} : vector<32x6144xbf16>, vector<6144x16xbf16>, vector<32x16xf32> -> vector<32x16xf32>
      %c0_20 = arith.constant 0 : index
      %c0_21 = arith.constant 0 : index
      %30 = vector.load %arg4[%c0_20, %c0_21] : memref<1x16xbf16, #tpu.memory_space<vmem>>, vector<1x16xbf16>
      %31 = arith.extf %30 : vector<1x16xbf16> to vector<1x16xf32>
      %32 = vector.broadcast %31 : vector<1x16xf32> to vector<32x16xf32>
      %33 = arith.addf %29, %32 : vector<32x16xf32>
      %34 = arith.truncf %33 : vector<32x16xf32> to vector<32x16xbf16>
      %c0_22 = arith.constant 0 : index
      %c0_23 = arith.constant 0 : index
      %35 = vector.load %arg8[%c0_22, %c0_23] : memref<32x16xbf16, #tpu.memory_space<vmem>>, vector<32x16xbf16>
      tpu.vector_store %arg8[%c0_22, %c0_23], %34 {strides = array<i32>} : memref<32x16xbf16, #tpu.memory_space<vmem>>, vector<32x16xbf16>,
    } else {
    }
    %c0 = arith.constant 0 : index
    %c0_1 = arith.constant 0 : index
    %3 = vector.load %arg8[%c0, %c0_1] : memref<32x16xbf16, #tpu.memory_space<vmem>>, vector<32x16xbf16>
    %c0_2 = arith.constant 0 : index
    %c0_3 = arith.constant 0 : index
    %4 = vector.load %arg5[%c0_2, %c0_3] : memref<16x512xbf16, #tpu.memory_space<vmem>>, vector<16x512xbf16>
    %cst = arith.constant dense<0.000000e+00> : vector<32x512xf32>
    %5 = tpu.matmul %3, %4, %cst {dimension_numbers = #tpu.dot_dimension_numbers<[1], [0], [0], [1], [0, 0, 1, 1], [], []>} : vector<32x16xbf16>, vector<16x512xbf16>, vector<32x512xf32> -> vector<32x512xf32>
    %c0_4 = arith.constant 0 : index
    %c0_5 = arith.constant 0 : index
    %6 = vector.load %arg6[%c0_4, %c0_5] : memref<1x512xbf16, #tpu.memory_space<vmem>>, vector<1x512xbf16>
    %7 = arith.extf %6 : vector<1x512xbf16> to vector<1x512xf32>
    %8 = vector.broadcast %7 : vector<1x512xf32> to vector<32x512xf32>
    %9 = arith.addf %5, %8 : vector<32x512xf32>
    %cst_6 = arith.constant -1.000000e+00 : f32
    %cst_7 = arith.constant 1.000000e+00 : f32
    %10 = vector.broadcast %cst_6 : f32 to vector<32x512xf32>
    %11 = arith.maximumf %10, %9 : vector<32x512xf32>
    %12 = vector.broadcast %cst_7 : f32 to vector<32x512xf32>
    %13 = arith.minimumf %12, %11 : vector<32x512xf32>
    %cst_8 = arith.constant 1.000000e+00 : f32
    %14 = vector.broadcast %cst_8 : f32 to vector<32x512xf32>
    %15 = arith.addf %13, %14 : vector<32x512xf32>
    %cst_9 = arith.constant 1.275000e+02 : f32
    %16 = vector.broadcast %cst_9 : f32 to vector<32x512xf32>
    %17 = arith.mulf %15, %16 : vector<32x512xf32>
    %cst_10 = arith.constant 5.000000e-01 : f32
    %18 = vector.broadcast %cst_10 : f32 to vector<32x512xf32>
    %19 = arith.addf %17, %18 : vector<32x512xf32>
    %20 = arith.fptosi %19 : vector<32x512xf32> to vector<32x512xi32>
    %21 = arith.trunci %20 : vector<32x512xi32> to vector<32x512xi8>
    %c0_11 = arith.constant 0 : index
    %c0_12 = arith.constant 0 : index
    %22 = vector.load %arg7[%c0_11, %c0_12] : memref<32x512xi8, #tpu.memory_space<vmem>>, vector<32x512xi8>
    tpu.vector_store %arg7[%c0_11, %c0_12], %21 {strides = array<i32>} : memref<32x512xi8, #tpu.memory_space<vmem>>, vector<32x512xi8>,
    return
  }
  func.func @transform_0(%arg0: i32, %arg1: i32) -> (i32, i32) {
    %c0_i32 = arith.constant 0 : i32
    %c0_i32_0 = arith.constant 0 : i32
    return %arg0, %c0_i32 : i32, i32
  }
  func.func @transform_1(%arg0: i32, %arg1: i32) -> (i32, i32) {
    %c0_i32 = arith.constant 0 : i32
    %c0_i32_0 = arith.constant 0 : i32
    %c0_i32_1 = arith.constant 0 : i32
    return %c0_i32, %c0_i32_0 : i32, i32
  }
  func.func @transform_2(%arg0: i32, %arg1: i32) -> (i32, i32) {
    %c0_i32 = arith.constant 0 : i32
    %c0_i32_0 = arith.constant 0 : i32
    %c0_i32_1 = arith.constant 0 : i32
    return %c0_i32, %c0_i32_0 : i32, i32
  }
  func.func @transform_3(%arg0: i32, %arg1: i32) -> (i32, i32) {
    %c0_i32 = arith.constant 0 : i32
    %c0_i32_0 = arith.constant 0 : i32
    return %c0_i32, %arg1 : i32, i32
  }
  func.func @transform_4(%arg0: i32, %arg1: i32) -> (i32, i32) {
    %c0_i32 = arith.constant 0 : i32
    %c0_i32_0 = arith.constant 0 : i32
    return %c0_i32, %arg1 : i32, i32
  }
  func.func @transform_5(%arg0: i32, %arg1: i32) -> (i32, i32) {
    %c0_i32 = arith.constant 0 : i32
    return %arg0, %arg1 : i32, i32
  }
}

</mosaic_0001>

<bundles_post_ra>
// kernel: _forward_window.1
= control target key start
LH: loop header
LB: loop body
LE: loop exit
PB: predicated region body
PF: predicated region fallthrough
CT: control target
= control target key end

     0   :  { %s8137_s18 = smov 0   ;;  %s8139_s19 = smov 0   ;;  %s9980_s0 = inlined_call_operand.vmem [shape: bf16[32,6144], index: 0, kind: input, shape index: {}]   ;;  %s9981_s1 = inlined_call_operand.vmem [shape: bf16[6144,16], index: 1, kind: input, shape index: {}]   ;;  %s9982_s2 = inlined_call_operand.vmem [shape: bf16[1,16], index: 2, kind: input, shape index: {}]   ;;  %s9983_s3 = inlined_call_operand.vmem [shape: bf16[16,6144], index: 3, kind: input, shape index: {}]   ;;  %s9984_s4 = inlined_call_operand.vmem [shape: bf16[1,6144], index: 4, kind: input, shape index: {}]   ;;  %s9985_s5 = inlined_call_operand.vmem [shape: u8[32,6144], index: 5, kind: output, shape index: {}]  }
   0x1   :  { %s8141_s20 = smov 0   ;;  %s8143_s21 = smov 0  }
   0x2   :  { %s8145_s22 = smov 0  }
   0x3 LB: > { %s24_s23 = sadd.s32 1, %s8101_s21  ;;  %s5761_s24 = sadd.s32 4294967295, %s8105_s22   ;;  %s8105_s22 = sphi %s8145_s22, %s15_s22   ;;  %s8101_s21 = sphi %s8143_s21, %s9990_s21   ;;  %s8097_s20 = sphi %s8141_s20, %s9989_s20   ;;  %s8093_s19 = sphi %s8139_s19, %s9988_s19   ;;  %s8089_s18 = sphi %s8137_s18, %s9987_s18  }
   0x4   : > { %p25_p0 = scmp.ge.s32.totalorder %s24_s23, 12  ;;  %p109_p1 = scmp.ne.s32.totalorder %s8093_s19, %s8089_s18 }
   0x5   : > { %p110_p2 = scmp.eq.s32.totalorder %s8105_s22, 0  ;;  %p167_p4 = scmp.eq.s32.totalorder %s5761_s24, 11 }
   0x6   : > { %s9992_s23 = smov (%p25_p0, %s24_s23), 0  ;;  %s102_s26 = sadd.s32 1, %s8093_s19 }
   0x7   : > { %p111_p3 = por %p110_p2, %p109_p1  ;;  %s99_s25 = ssub.s32 %s8101_s21, %s9992_s23 }
   0x8   : > { %p100_p5 = scmp.eq.s32.totalorder %s99_s25, 0  ;;  %p8172_p6 = por %p167_p4, %p109_p1 }
   0x9   : > { %p5765_p7 = scmp.ge.s32.totalorder %s8105_s22, 12 }
   0xa   : > { %s8177_s28 = scalar_select %p100_p5, %s8093_s19, %s102_s26  }
   0xb   : > { %205 = sbr.rel (%p5765_p7) target bundleno = 24 (0x18), region = 28 }
  0x10   : > { %208 = sbr.rel (!%p111_p3) target bundleno = 24 (0x18), region = 32  ;;  %s210_s29 = sand.u32 (%p111_p3), 1, %s8093_s19  }
  0x11   : > { %s7555_s30 = sshll.u32 (%p111_p3), %s8101_s21, 4  ;;  %s5766_s6 = sshll.u32 (%p111_p3), %s210_s29, 5 }
  0x12   : > { %s215_s9 = scalar_lea.vmem (%p111_p3), %s9983_s3, %s7555_s30  ;;  %s212_s10 = scalar_lea.vmem (%p111_p3), [#allocation3], %s5766_s6 }
  0x13   : > { %v228_v0 = vld [vmem:[%s215_s9] sm:$0xff] (%p111_p3)  ;;  %v230_v1 = vld [vmem:[%s215_s9 + $0x8] sm:$0xff] (%p111_p3) }
  0x14   : > { %v232_v2 = vld [vmem:[%s215_s9 + $0xc0] sm:$0xff] (%p111_p3)  ;;  %229 = vst [vmem:[%s212_s10] sm:$0xff] (%p111_p3), %v228_v0  ;;  %v234_v3 = vld [vmem:[%s215_s9 + $0xc8] sm:$0xff] (%p111_p3) }
  0x15   : > { %231 = vst [vmem:[%s212_s10 + $0x8] sm:$0xff] %v230_v1 }
  0x16   : > { %233 = vst [vmem:[%s212_s10 + $0x10] sm:$0xff] %v232_v2 }
  0x17   : > { %235 = vst [vmem:[%s212_s10 + $0x18] sm:$0xff] %v234_v3 }
  0x18 PF: > { %p5769_p8 = scmp.ge.s32.totalorder %s8105_s22, 1  ;;  %p248_p9 = scmp.lt.s32.totalorder %s8105_s22, 13 }
  0x1a   : > { %p249_p10 = pnand %p5769_p8, %p248_p9 }
  0x1b   : > { %s255_s11 = sand.u32 (!%p249_p10), 1, %s8089_s18   ;;  %s5772_s12 = sshll.u32 (!%p249_p10), %s8097_s20, 2 }
  0x1c   : > { %252 = sbr.rel (%p249_p10) target bundleno = 790 (0x316), region = 59  ;;  %s5770_s13 = sshll.u32 (!%p249_p10), %s255_s11, 5 }
  0x1d   : > { %p300_p11 = scmp.lt.s32.totalorder (!%p249_p10), %s5772_s12, 47  ;;  %s8195_s17 = scalar_lea.vmem (!%p249_p10), [#allocation3], %s5770_s13 }
  0x1e   : > { %s8197_s24 = scalar_lea.vmem (!%p249_p10), [#allocation4], %s5770_s13  ;;  %p5773_p12 = scmp.ne.s32.totalorder (!%p249_p10), %s8097_s20, 0 }
  0x21   : > { %s9994_s12 = smov (!%p300_p11, %s5772_s12), 47  ;;  %310 = sbr.rel (%p5773_p12) target bundleno = 591 (0x24f), region = 67 }
  0x22   : > { %s302_s16 = scalar_lea.vmem %s9984_s4, %s9994_s12 }
  0x26   : > { %v7563_v4 = vld [vmem:[%s9981_s1 + $0x38] sm:$0xff]  ;;  %v7562_v8 = vld [vmem:[%s9981_s1 + $0x30] sm:$0xff]  ;;  %v7561_v12 = vld [vmem:[%s9981_s1 + $0x28] sm:$0xff]  ;;  %vm5358_vm0 = vcmask 125952  }
  0x27   : > { %v7571_v5 = vld [vmem:[%s9981_s1 + $0x78] sm:$0xff]  ;;  %4442 = vmatpush.bf16.msra.mxu0 %v7563_v4  ;;  %v7570_v9 = vld [vmem:[%s9981_s1 + $0x70] sm:$0xff]  ;;  %v7569_v13 = vld [vmem:[%s9981_s1 + $0x68] sm:$0xff] }
  0x28   : > { %v7579_v6 = vld [vmem:[%s9981_s1 + $0xb8] sm:$0xff]  ;;  %4461 = vmatpush.bf16.msra.mxu1 %v7571_v5  ;;  %v7578_v10 = vld [vmem:[%s9981_s1 + $0xb0] sm:$0xff]  ;;  %v7577_v14 = vld [vmem:[%s9981_s1 + $0xa8] sm:$0xff] }
  0x29   : > { %v7587_v7 = vld [vmem:[%s9981_s1 + $0xf8] sm:$0xff]  ;;  %4480 = vmatpush.bf16.msra.mxu2 %v7579_v6  ;;  %v7586_v11 = vld [vmem:[%s9981_s1 + $0xf0] sm:$0xff]  ;;  %v7585_v15 = vld [vmem:[%s9981_s1 + $0xe8] sm:$0xff] }
  0x2a   : > { %4499 = vmatpush.bf16.msra.mxu3 %v7587_v7  ;;  %v7560_v16 = vld [vmem:[%s9981_s1 + $0x20] sm:$0xff]  ;;  %v312_v24 = vld [vmem:[%s9980_s0 + $0x8] sm:$0xff]  ;;  %v7559_v34 = vld [vmem:[%s9981_s1 + $0x18] sm:$0xff] }
  0x2b   : > { %4443 = vmatpush.bf16.msra.mxu0 %v7562_v8  ;;  %v7568_v17 = vld [vmem:[%s9981_s1 + $0x60] sm:$0xff]  ;;  %v336_v25 = vld [vmem:[%s9980_s0 + $0xc8] sm:$0xff]  ;;  %v409_v28 = vunpack.c.l.bf16 %v312_v24  ;;  %v410_v29 = vunpack.c.h.bf16 %v312_v24  ;;  %v7567_v35 = vld [vmem:[%s9981_s1 + $0x58] sm:$0xff] }
  0x2c   : > { %4462 = vmatpush.bf16.msra.mxu1 %v7570_v9  ;;  %v7576_v18 = vld [vmem:[%s9981_s1 + $0xa0] sm:$0xff]  ;;  %v457_v32 = vunpack.c.l.bf16 %v336_v25  ;;  %v458_v33 = vunpack.c.h.bf16 %v336_v25  ;;  %v7575_v40 = vld [vmem:[%s9981_s1 + $0x98] sm:$0xff]  ;;  %v7558_v46 = vld [vmem:[%s9981_s1 + $0x10] sm:$0xff] }
  0x2d   : > { %4481 = vmatpush.bf16.msra.mxu2 %v7578_v10  ;;  %v7584_v19 = vld [vmem:[%s9981_s1 + $0xe0] sm:$0xff]  ;;  %v601_v38 = vmul.f32 0.007873535, %v409_v28  ;;  %v602_v39 = vmul.f32 0.007873535, %v410_v29  ;;  %v7583_v41 = vld [vmem:[%s9981_s1 + $0xd8] sm:$0xff]  ;;  %v7566_v47 = vld [vmem:[%s9981_s1 + $0x50] sm:$0xff] }
  0x2e   : > { %4500 = vmatpush.bf16.msra.mxu3 %v7586_v11  ;;  %v311_v20 = vld [vmem:[%s9980_s0] sm:$0xff]  ;;  %v649_v43 = vmul.f32 0.007873535, %v457_v32  ;;  %v650_v44 = vmul.f32 0.007873535, %v458_v33  ;;  %v7574_v50 = vld [vmem:[%s9981_s1 + $0x90] sm:$0xff]  ;;  %v7557_v57 = vld [vmem:[%s9981_s1 + $0x8] sm:$0xff] }
  0x2f   : > { %4444 = vmatpush.bf16.msra.mxu0 %v7561_v12  ;;  %v335_v21 = vld [vmem:[%s9980_s0 + $0xc0] sm:$0xff]  ;;  %v407_v22 = vunpack.c.l.bf16 %v311_v20  ;;  %v408_v23 = vunpack.c.h.bf16 %v311_v20  ;;  %v792_v48 = vpack.c.bf16 %v602_v39, %v601_v38  ;;  %v7582_v51 = vld [vmem:[%s9981_s1 + $0xd0] sm:$0xff]  ;;  %v7565_v59 = vld [vmem:[%s9981_s1 + $0x48] sm:$0xff] }
  0x30   : > { %4463 = vmatpush.bf16.msra.mxu1 %v7569_v13  ;;  %v455_v26 = vunpack.c.l.bf16 %v335_v21  ;;  %v456_v27 = vunpack.c.h.bf16 %v335_v21  ;;  %v816_v49 = vpack.c.bf16 %v650_v44, %v649_v43  ;;  %v359_v56 = vld [vmem:[%s9980_s0 + $0x180] sm:$0xff]  ;;  %v360_v0 = vld [vmem:[%s9980_s0 + $0x188] sm:$0xff]  ;;  %v7611_v28 = vld [vmem:[%s9981_s1 + $0x1b8] sm:$0xff] }
  0x31   : > { %4482 = vmatpush.bf16.msra.mxu2 %v7577_v14  ;;  %v599_v30 = vmul.f32 0.007873535, %v407_v22  ;;  %v600_v31 = vmul.f32 0.007873535, %v408_v23  ;;  %v383_v58 = vld [vmem:[%s9980_s0 + $0x240] sm:$0xff]  ;;  %v889_v60 = vunpack.c.l.bf16 %v792_v48  ;;  %v890_v62 = vunpack.c.h.bf16 %v792_v48  ;;  %v384_v1 = vld [vmem:[%s9980_s0 + $0x248] sm:$0xff]  ;;  %v7595_v29 = vld [vmem:[%s9981_s1 + $0x138] sm:$0xff] }
  0x32   : > { %4501 = vmatpush.bf16.msra.mxu3 %v7585_v15  ;;  %v647_v36 = vmul.f32 0.007873535, %v455_v26  ;;  %v648_v37 = vmul.f32 0.007873535, %v456_v27  ;;  %v937_v61 = vunpack.c.l.bf16 %v816_v49  ;;  %v938_v63 = vunpack.c.h.bf16 %v816_v49  ;;  %v7573_v2 = vld [vmem:[%s9981_s1 + $0x88] sm:$0xff]  ;;  %v7572_v22 = vld [vmem:[%s9981_s1 + $0x80] sm:$0xff]  ;;  %v7603_v38 = vld [vmem:[%s9981_s1 + $0x178] sm:$0xff] }
  0x33   : > { %4445 = vmatpush.bf16.msra.mxu0 %v7560_v16  ;;  %v791_v42 = vpack.c.bf16 %v600_v31, %v599_v30  ;;  %v7581_v3 = vld [vmem:[%s9981_s1 + $0xc8] sm:$0xff]  ;;  %v503_v6 = vunpack.c.l.bf16 %v359_v56  ;;  %v504_v7 = vunpack.c.h.bf16 %v359_v56  ;;  %v551_v10 = vunpack.c.l.bf16 %v383_v58  ;;  %v7556_v16 = vld [vmem:[%s9981_s1] sm:$0xff]  ;;  %v7619_v39 = vld [vmem:[%s9981_s1 + $0x1f8] sm:$0xff] }
  0x34   : > { %4464 = vmatpush.bf16.msra.mxu1 %v7568_v17  ;;  %v815_v45 = vpack.c.bf16 %v648_v37, %v647_v36  ;;  %v552_v11 = vunpack.c.h.bf16 %v383_v58  ;;  %v505_v12 = vunpack.c.l.bf16 %v360_v0  ;;  %v506_v13 = vunpack.c.h.bf16 %v360_v0  ;;  %v7564_v17 = vld [vmem:[%s9981_s1 + $0x40] sm:$0xff]  ;;  %v7609_v48 = vld [vmem:[%s9981_s1 + $0x1a8] sm:$0xff] }
  0x35   : > { %4483 = vmatpush.bf16.msra.mxu2 %v7576_v18  ;;  %v887_v52 = vunpack.c.l.bf16 %v791_v42  ;;  %v888_v53 = vunpack.c.h.bf16 %v791_v42  ;;  %v553_v14 = vunpack.c.l.bf16 %v384_v1  ;;  %v554_v15 = vunpack.c.h.bf16 %v384_v1  ;;  %v7580_v23 = vld [vmem:[%s9981_s1 + $0xc0] sm:$0xff]  ;;  %v7594_v42 = vld [vmem:[%s9981_s1 + $0x130] sm:$0xff] }
  0x36   : > { %4502 = vmatpush.bf16.msra.mxu3 %v7584_v19  ;;  %v935_v54 = vunpack.c.l.bf16 %v815_v45  ;;  %v936_v55 = vunpack.c.h.bf16 %v815_v45  ;;  %v5776_v18 = vadd.f32 -1.0, %v889_v60  ;;  %v5824_v19 = vadd.f32 -1.0, %v937_v61  ;;  %v7601_v60 = vld [vmem:[%s9981_s1 + $0x168] sm:$0xff] }
  0x37   : > { %4446 = vmatpush.bf16.msra.mxu0 %v7559_v34  ;;  %v5774_v4 = vadd.f32 -1.0, %v887_v52  ;;  %v5775_v5 = vadd.f32 -1.0, %v888_v53  ;;  %v5777_v20 = vadd.f32 -1.0, %v890_v62  ;;  %v5825_v21 = vadd.f32 -1.0, %v938_v63  ;;  %v7617_v61 = vld [vmem:[%s9981_s1 + $0x1e8] sm:$0xff] }
  0x38   : > { %4465 = vmatpush.bf16.msra.mxu1 %v7567_v35  ;;  %v5822_v8 = vadd.f32 -1.0, %v935_v54  ;;  %v5823_v9 = vadd.f32 -1.0, %v936_v55  ;;  %v695_v24 = vmul.f32 0.007873535, %v503_v6  ;;  %v696_v25 = vmul.f32 0.007873535, %v504_v7  ;;  %v313_v54 = vld [vmem:[%s9980_s0 + $0x10] sm:$0xff] }
  0x39   : > { %4484 = vmatpush.bf16.msra.mxu2 %v7575_v40  ;;  %v743_v30 = vmul.f32 0.007873535, %v551_v10  ;;  %v744_v31 = vmul.f32 0.007873535, %v552_v11  ;;  %v697_v32 = vmul.f32 0.007873535, %v505_v12  ;;  %v698_v33 = vmul.f32 0.007873535, %v506_v13  ;;  %v337_v55 = vld [vmem:[%s9980_s0 + $0xd0] sm:$0xff] }
  0x3a   : > { %4503 = vmatpush.bf16.msra.mxu3 %v7583_v41  ;;  %v1271_v26 = vpack.c.bf16 %v5822_v8, %v5774_v4  ;;  %v1272_v27 = vpack.c.bf16 %v5823_v9, %v5775_v5  ;;  %v745_v34 = vmul.f32 0.007873535, %v553_v14  ;;  %v746_v35 = vmul.f32 0.007873535, %v554_v15  ;;  %v7610_v41 = vld [vmem:[%s9981_s1 + $0x1b0] sm:$0xff]  ;;  %v7608_v4 = vld [vmem:[%s9981_s1 + $0x1a0] sm:$0xff] }
  0x3b   : > { %4447 = vmatpush.bf16.msra.mxu0 %v7558_v46  ;;  %v1273_v36 = vpack.c.bf16 %v5824_v19, %v5776_v18  ;;  %v1274_v37 = vpack.c.bf16 %v5825_v21, %v5777_v20  ;;  %v839_v40 = vpack.c.bf16 %v696_v25, %v695_v24  ;;  %v863_v43 = vpack.c.bf16 %v744_v31, %v743_v30  ;;  %v7602_v46 = vld [vmem:[%s9981_s1 + $0x170] sm:$0xff]  ;;  %v7592_v5 = vld [vmem:[%s9981_s1 + $0x120] sm:$0xff] }
  0x3c   : > { %4466 = vmatpush.bf16.msra.mxu1 %v7566_v47  ;;  %v840_v44 = vpack.c.bf16 %v698_v33, %v697_v32  ;;  %v864_v45 = vpack.c.bf16 %v746_v35, %v745_v34  ;;  %v7618_v47 = vld [vmem:[%s9981_s1 + $0x1f0] sm:$0xff]  ;;  %v411_v63 = vunpack.c.l.bf16 %v313_v54  ;;  %v412_v0 = vunpack.c.h.bf16 %v313_v54  ;;  %v7600_v18 = vld [vmem:[%s9981_s1 + $0x160] sm:$0xff]  ;;  %v7599_v34 = vld [vmem:[%s9981_s1 + $0x158] sm:$0xff] }
  0x3d   : > { %4485 = vmatpush.bf16.msra.mxu2 %v7574_v50  ;;  %v983_v49 = vunpack.c.l.bf16 %v839_v40  ;;  %v7593_v50 = vld [vmem:[%s9981_s1 + $0x128] sm:$0xff]  ;;  %v984_v52 = vunpack.c.h.bf16 %v839_v40  ;;  %v1032_v53 = vunpack.c.h.bf16 %v863_v43  ;;  %v459_v1 = vunpack.c.l.bf16 %v337_v55  ;;  %v7616_v19 = vld [vmem:[%s9981_s1 + $0x1e0] sm:$0xff]  ;;  %v7615_v35 = vld [vmem:[%s9981_s1 + $0x1d8] sm:$0xff] }
  0x3e   : > { %4504 = vmatpush.bf16.msra.mxu3 %v7582_v51  ;;  %v1031_v51 = vunpack.c.l.bf16 %v863_v43  ;;  %v985_v56 = vunpack.c.l.bf16 %v840_v44  ;;  %v986_v58 = vunpack.c.h.bf16 %v840_v44  ;;  %v460_v9 = vunpack.c.h.bf16 %v337_v55  ;;  %v7614_v43 = vld [vmem:[%s9981_s1 + $0x1d0] sm:$0xff] }
  0x3f   : > { %4448 = vmatpush.bf16.msra.mxu0 %v7557_v57  ;;  %v1033_v57 = vunpack.c.l.bf16 %v864_v45  ;;  %v5870_v62 = vadd.f32 -1.0, %v983_v49  ;;  %v5871_v7 = vadd.f32 -1.0, %v984_v52  ;;  %v5919_v8 = vadd.f32 -1.0, %v1032_v53  ;;  %v361_v44 = vld [vmem:[%s9980_s0 + $0x190] sm:$0xff]  ;;  %v362_v52 = vld [vmem:[%s9980_s0 + $0x198] sm:$0xff] }
  0x40   : > { %4467 = vmatpush.bf16.msra.mxu1 %v7565_v59  ;;  %v1034_v59 = vunpack.c.h.bf16 %v864_v45  ;;  %v5918_v6 = vadd.f32 -1.0, %v1031_v51  ;;  %v5872_v10 = vadd.f32 -1.0, %v985_v56  ;;  %v5873_v12 = vadd.f32 -1.0, %v986_v58  ;;  %v7605_v45 = vld [vmem:[%s9981_s1 + $0x188] sm:$0xff]  ;;  %v386_v53 = vld [vmem:[%s9980_s0 + $0x258] sm:$0xff] }
  0x41   : > { %4486 = vmatpush.bf16.msra.mxu2 %v7573_v2  ;;  %v314_v2 = vld [vmem:[%s9980_s0 + $0x18] sm:$0xff]  ;;  %v5920_v11 = vadd.f32 -1.0, %v1033_v57  ;;  %v1320_v21 = vpack.c.bf16 %v5919_v8, %v5871_v7  ;;  %v603_v24 = vmul.f32 0.007873535, %v411_v63  ;;  %v604_v25 = vmul.f32 0.007873535, %v412_v0  ;;  %v7597_v58 = vld [vmem:[%s9981_s1 + $0x148] sm:$0xff]  ;;  %v7604_v0 = vld [vmem:[%s9981_s1 + $0x180] sm:$0xff] }
  0x42   : > { %4505 = vmatpush.bf16.msra.mxu3 %v7581_v3  ;;  %v338_v3 = vld [vmem:[%s9980_s0 + $0xd8] sm:$0xff]  ;;  %v5921_v13 = vadd.f32 -1.0, %v1034_v59  ;;  %v413_v14 = vunpack.c.l.bf16 %v314_v2  ;;  %v414_v15 = vunpack.c.h.bf16 %v314_v2  ;;  %v1319_v20 = vpack.c.bf16 %v5918_v6, %v5870_v62  ;;  %v7613_v59 = vld [vmem:[%s9981_s1 + $0x1c8] sm:$0xff] }
  0x43   : > { %4449 = vmatpush.bf16.msra.mxu0 %v7556_v16  ;;  %v461_v16 = vunpack.c.l.bf16 %v338_v3  ;;  %v507_v57 = vunpack.c.l.bf16 %v361_v44  ;;  %v509_v2 = vunpack.c.l.bf16 %v362_v52 }
  0x44   : > { %4468 = vmatpush.bf16.msra.mxu1 %v7564_v17  ;;  %v462_v17 = vunpack.c.h.bf16 %v338_v3  ;;  %v605_v30 = vmul.f32 0.007873535, %v413_v14  ;;  %v606_v31 = vmul.f32 0.007873535, %v414_v15  ;;  %v510_v3 = vunpack.c.h.bf16 %v362_v52  ;;  %v339_v52 = vld [vmem:[%s9980_s0 + $0xe0] sm:$0xff] }
  0x45   : > { %4487 = vmatpush.bf16.msra.mxu2 %v7572_v22  ;;  %v7607_v22 = vld [vmem:[%s9981_s1 + $0x198] sm:$0xff]  ;;  %v653_v32 = vmul.f32 0.007873535, %v461_v16  ;;  %v699_v15 = vmul.f32 0.007873535, %v507_v57  ;;  %v7596_v16 = vld [vmem:[%s9981_s1 + $0x140] sm:$0xff] }
  0x46   : > { %4506 = vmatpush.bf16.msra.mxu3 %v7580_v23  ;;  %4450 = vmatmul.bf16.vlgmr.msra.gmra.mxu0 %v1271_v26  ;;  %v7591_v23 = vld [vmem:[%s9981_s1 + $0x118] sm:$0xff]  ;;  %v1321_v26 = vpack.c.bf16 %v5920_v11, %v5872_v10  ;;  %v654_v33 = vmul.f32 0.007873535, %v462_v17  ;;  %v794_v40 = vpack.c.bf16 %v606_v31, %v605_v30  ;;  %v7612_v17 = vld [vmem:[%s9981_s1 + $0x1c0] sm:$0xff] }
  0x47   : > { %4518 = vmatpush.bf16.msrb.mxu0 %v7595_v29  ;;  %4469 = vmatmul.bf16.vlgmr.msra.gmra.mxu1 %v1272_v27  ;;  %v1322_v27 = vpack.c.bf16 %v5921_v13, %v5873_v12  ;;  %v652_v29 = vmul.f32 0.007873535, %v460_v9  ;;  %v7643_v10 = vld [vmem:[%s9981_s1 + $0x2b8] sm:$0xff] }
  0x48   : > { %4488 = vmatmul.bf16.vlgmr.msra.gmra.mxu2 %v1273_v36  ;;  %4537 = vmatpush.bf16.msrb.mxu1 %v7603_v38  ;;  %v7606_v36 = vld [vmem:[%s9981_s1 + $0x190] sm:$0xff]  ;;  %v793_v38 = vpack.c.bf16 %v604_v25, %v603_v24  ;;  %v893_v54 = vunpack.c.l.bf16 %v794_v40  ;;  %v894_v56 = vunpack.c.h.bf16 %v794_v40  ;;  %v7627_v11 = vld [vmem:[%s9981_s1 + $0x238] sm:$0xff]  ;;  %v701_v24 = vmul.f32 0.007873535, %v509_v2  ;;  %v7641_v40 = vld [vmem:[%s9981_s1 + $0x2a8] sm:$0xff] }
  0x49   : > { %4556 = vmatpush.bf16.msrb.mxu2 %v7611_v28  ;;  %4507 = vmatmul.bf16.vlgmr.msra.gmra.mxu3 %v1274_v37  ;;  %v651_v28 = vmul.f32 0.007873535, %v459_v1  ;;  %v7590_v37 = vld [vmem:[%s9981_s1 + $0x110] sm:$0xff]  ;;  %v7588_v1 = vld [vmem:[%s9981_s1 + $0x100] sm:$0xff]  ;;  %v702_v25 = vmul.f32 0.007873535, %v510_v3  ;;  %v7639_v2 = vld [vmem:[%s9981_s1 + $0x298] sm:$0xff] }
  0x4a   : > { %4575 = vmatpush.bf16.msrb.mxu3 %v7619_v39  ;;  %v5780_v12 = vadd.f32 -1.0, %v893_v54  ;;  %v5781_v14 = vadd.f32 -1.0, %v894_v56 }
  0x4b   : > { %4519 = vmatpush.bf16.msrb.mxu0 %v7594_v42  ;;  %v817_v39 = vpack.c.bf16 %v652_v29, %v651_v28  ;;  %v7598_v42 = vld [vmem:[%s9981_s1 + $0x150] sm:$0xff] }
  0x4c   : > { %4538 = vmatpush.bf16.msrb.mxu1 %v7602_v46  ;;  %v7589_v46 = vld [vmem:[%s9981_s1 + $0x108] sm:$0xff]  ;;  %v7642_v29 = vld [vmem:[%s9981_s1 + $0x2b0] sm:$0xff] }
  0x4d   : > { %4557 = vmatpush.bf16.msrb.mxu2 %v7610_v41  ;;  %v818_v41 = vpack.c.bf16 %v654_v33, %v653_v32  ;;  %v939_v49 = vunpack.c.l.bf16 %v817_v39  ;;  %v940_v51 = vunpack.c.h.bf16 %v817_v39  ;;  %v7626_v33 = vld [vmem:[%s9981_s1 + $0x230] sm:$0xff] }
  0x4e   : > { %4576 = vmatpush.bf16.msrb.mxu3 %v7618_v47  ;;  %v385_v47 = vld [vmem:[%s9980_s0 + $0x250] sm:$0xff] }
  0x4f   : > { %4520 = vmatpush.bf16.msrb.mxu0 %v7593_v50  ;;  %v892_v50 = vunpack.c.h.bf16 %v793_v38  ;;  %v941_v55 = vunpack.c.l.bf16 %v818_v41  ;;  %v555_v62 = vunpack.c.l.bf16 %v385_v47  ;;  %v556_v63 = vunpack.c.h.bf16 %v385_v47 }
  0x50   : > { %4539 = vmatpush.bf16.msrb.mxu1 %v7601_v60  ;;  %v942_v60 = vunpack.c.h.bf16 %v818_v41  ;;  %v5826_v7 = vadd.f32 -1.0, %v939_v49  ;;  %v5827_v9 = vadd.f32 -1.0, %v940_v51  ;;  %v7625_v41 = vld [vmem:[%s9981_s1 + $0x228] sm:$0xff]  ;;  %v315_v51 = vld [vmem:[%s9980_s0 + $0x20] sm:$0xff] }
  0x51   : > { %4558 = vmatpush.bf16.msrb.mxu2 %v7609_v48  ;;  %v891_v48 = vunpack.c.l.bf16 %v793_v38  ;;  %v5779_v8 = vadd.f32 -1.0, %v892_v50  ;;  %v5828_v13 = vadd.f32 -1.0, %v941_v55  ;;  %v842_v38 = vpack.c.bf16 %v702_v25, %v701_v24  ;;  %v7640_v50 = vld [vmem:[%s9981_s1 + $0x2a0] sm:$0xff] }
  0x52   : > { %4577 = vmatpush.bf16.msrb.mxu3 %v7617_v61  ;;  %v508_v61 = vunpack.c.h.bf16 %v361_v44  ;;  %v7633_v44 = vld [vmem:[%s9981_s1 + $0x268] sm:$0xff]  ;;  %v415_v3 = vunpack.c.l.bf16 %v315_v51 }
  0x53   : > { %4521 = vmatpush.bf16.msrb.mxu0 %v7592_v5  ;;  %v558_v5 = vunpack.c.h.bf16 %v386_v53  ;;  %v5778_v6 = vadd.f32 -1.0, %v891_v48  ;;  %v1276_v30 = vpack.c.bf16 %v5827_v9, %v5779_v8  ;;  %v1277_v31 = vpack.c.bf16 %v5828_v13, %v5780_v12  ;;  %v7623_v13 = vld [vmem:[%s9981_s1 + $0x218] sm:$0xff] }
  0x54   : > { %4540 = vmatpush.bf16.msrb.mxu1 %v7600_v18  ;;  %v5829_v18 = vadd.f32 -1.0, %v942_v60  ;;  %v989_v48 = vunpack.c.l.bf16 %v842_v38  ;;  %v990_v56 = vunpack.c.h.bf16 %v842_v38  ;;  %v7632_v60 = vld [vmem:[%s9981_s1 + $0x260] sm:$0xff]  ;;  %v7629_v38 = vld [vmem:[%s9981_s1 + $0x248] sm:$0xff] }
  0x55   : > { %4559 = vmatpush.bf16.msrb.mxu2 %v7608_v4  ;;  %v557_v4 = vunpack.c.l.bf16 %v386_v53  ;;  %v1275_v28 = vpack.c.bf16 %v5826_v7, %v5778_v6  ;;  %v7624_v53 = vld [vmem:[%s9981_s1 + $0x220] sm:$0xff]  ;;  %v464_v6 = vunpack.c.h.bf16 %v339_v52 }
  0x56   : > { %4578 = vmatpush.bf16.msrb.mxu3 %v7616_v19  ;;  %4455 = vmatmul.bf16.gmra.mxu0 %v1319_v20  ;;  %v700_v19 = vmul.f32 0.007873535, %v508_v61  ;;  %v747_v20 = vmul.f32 0.007873535, %v555_v62  ;;  %v1278_v32 = vpack.c.bf16 %v5829_v18, %v5781_v14  ;;  %v7648_v61 = vld [vmem:[%s9981_s1 + $0x2e0] sm:$0xff]  ;;  %v7647_v18 = vld [vmem:[%s9981_s1 + $0x2d8] sm:$0xff] }
  0x57   : > { %4522 = vmatpush.bf16.msrb.mxu0 %v7591_v23  ;;  %4474 = vmatmul.bf16.gmra.mxu1 %v1320_v21  ;;  %v748_v21 = vmul.f32 0.007873535, %v556_v63  ;;  %v7651_v23 = vld [vmem:[%s9981_s1 + $0x2f8] sm:$0xff] }
  0x58   : > { %4493 = vmatmul.bf16.gmra.mxu2 %v1321_v26  ;;  %4541 = vmatpush.bf16.msrb.mxu1 %v7599_v34  ;;  %v749_v26 = vmul.f32 0.007873535, %v557_v4  ;;  %v841_v34 = vpack.c.bf16 %v700_v19, %v699_v15  ;;  %v416_v4 = vunpack.c.h.bf16 %v315_v51  ;;  %v7638_v19 = vld [vmem:[%s9981_s1 + $0x290] sm:$0xff] }
  0x59   : > { %4560 = vmatpush.bf16.msrb.mxu2 %v7607_v22  ;;  %4512 = vmatmul.bf16.gmra.mxu3 %v1322_v27  ;;  %v7635_v22 = vld [vmem:[%s9981_s1 + $0x278] sm:$0xff]  ;;  %v750_v27 = vmul.f32 0.007873535, %v558_v5  ;;  %v463_v5 = vunpack.c.l.bf16 %v339_v52 }
  0x5a   : > { %4579 = vmatpush.bf16.msrb.mxu3 %v7615_v35  ;;  %v7634_v35 = vld [vmem:[%s9981_s1 + $0x270] sm:$0xff] }
  0x5b   : > { %4523 = vmatpush.bf16.msrb.mxu0 %v7590_v37  ;;  %v865_v37 = vpack.c.bf16 %v748_v21, %v747_v20  ;;  %v866_v39 = vpack.c.bf16 %v750_v27, %v749_v26  ;;  %v607_v20 = vmul.f32 0.007873535, %v415_v3  ;;  %v608_v21 = vmul.f32 0.007873535, %v416_v4 }
  0x5c   : > { %4542 = vmatpush.bf16.msrb.mxu1 %v7598_v42  ;;  %v987_v42 = vunpack.c.l.bf16 %v841_v34 }
  0x5d   : > { %4561 = vmatpush.bf16.msrb.mxu2 %v7606_v36  ;;  %v7650_v36 = vld [vmem:[%s9981_s1 + $0x2f0] sm:$0xff]  ;;  %v1036_v47 = vunpack.c.h.bf16 %v865_v37  ;;  %v1037_v49 = vunpack.c.l.bf16 %v866_v39  ;;  %v1038_v57 = vunpack.c.h.bf16 %v866_v39  ;;  %v7645_v39 = vld [vmem:[%s9981_s1 + $0x2c8] sm:$0xff] }
  0x5e   : > { %4580 = vmatpush.bf16.msrb.mxu3 %v7614_v43  ;;  %v988_v43 = vunpack.c.h.bf16 %v841_v34  ;;  %v5874_v54 = vadd.f32 -1.0, %v987_v42  ;;  %v7636_v42 = vld [vmem:[%s9981_s1 + $0x280] sm:$0xff] }
  0x5f   : > { %4524 = vmatpush.bf16.msrb.mxu0 %v7589_v46  ;;  %v1035_v46 = vunpack.c.l.bf16 %v865_v37  ;;  %v5923_v63 = vadd.f32 -1.0, %v1036_v47  ;;  %v5925_v12 = vadd.f32 -1.0, %v1038_v57  ;;  %v7621_v37 = vld [vmem:[%s9981_s1 + $0x208] sm:$0xff] }
  0x60   : > { %4543 = vmatpush.bf16.msrb.mxu1 %v7597_v58  ;;  %v5875_v55 = vadd.f32 -1.0, %v988_v43  ;;  %v316_v58 = vld [vmem:[%s9980_s0 + $0x28] sm:$0xff] }
  0x61   : > { %4562 = vmatpush.bf16.msrb.mxu2 %v7605_v45  ;;  %v7649_v45 = vld [vmem:[%s9981_s1 + $0x2e8] sm:$0xff]  ;;  %v5922_v62 = vadd.f32 -1.0, %v1035_v46  ;;  %v417_v7 = vunpack.c.l.bf16 %v316_v58  ;;  %v418_v8 = vunpack.c.h.bf16 %v316_v58 }
  0x62   : > { %4581 = vmatpush.bf16.msrb.mxu3 %v7613_v59  ;;  %v340_v59 = vld [vmem:[%s9980_s0 + $0xe8] sm:$0xff]  ;;  %v1324_v15 = vpack.c.bf16 %v5923_v63, %v5875_v55 }
  0x63   : > { %4525 = vmatpush.bf16.msrb.mxu0 %v7588_v1  ;;  %v5924_v1 = vadd.f32 -1.0, %v1037_v49  ;;  %v465_v9 = vunpack.c.l.bf16 %v340_v59  ;;  %v1323_v14 = vpack.c.bf16 %v5922_v62, %v5874_v54  ;;  %v609_v24 = vmul.f32 0.007873535, %v417_v7  ;;  %v364_v47 = vld [vmem:[%s9980_s0 + $0x1a8] sm:$0xff]  ;;  %v7620_v54 = vld [vmem:[%s9981_s1 + $0x200] sm:$0xff] }
  0x64   : > { %4544 = vmatpush.bf16.msrb.mxu1 %v7596_v16  ;;  %v610_v25 = vmul.f32 0.007873535, %v418_v8  ;;  %v514_v62 = vunpack.c.h.bf16 %v364_v47 }
  0x65   : > { %4563 = vmatpush.bf16.msrb.mxu2 %v7604_v0  ;;  %v5876_v0 = vadd.f32 -1.0, %v989_v48  ;;  %v657_v26 = vmul.f32 0.007873535, %v465_v9  ;;  %v388_v48 = vld [vmem:[%s9980_s0 + $0x268] sm:$0xff] }
  0x66   : > { %4582 = vmatpush.bf16.msrb.mxu3 %v7612_v17  ;;  %4526 = vmatmul.bf16.vlgmr.msrb.gmra.mxu0 %v1275_v28  ;;  %v7631_v17 = vld [vmem:[%s9981_s1 + $0x258] sm:$0xff]  ;;  %v561_v63 = vunpack.c.l.bf16 %v388_v48 }
  0x67   : > { %4594 = vmatpush.bf16.msra.mxu0 %v7627_v11  ;;  %4545 = vmatmul.bf16.vlgmr.msrb.gmra.mxu1 %v1276_v30  ;;  %v5877_v11 = vadd.f32 -1.0, %v990_v56  ;;  %v1325_v16 = vpack.c.bf16 %v5924_v1, %v5876_v0  ;;  %v7630_v30 = vld [vmem:[%s9981_s1 + $0x250] sm:$0xff]  ;;  %v562_v0 = vunpack.c.h.bf16 %v388_v48 }
  0x68   : > { %4613 = vmatpush.bf16.msra.mxu1 %v7635_v22  ;;  %4564 = vmatmul.bf16.vlgmr.msrb.gmra.mxu2 %v1277_v31  ;;  %v655_v22 = vmul.f32 0.007873535, %v463_v5  ;;  %v7646_v31 = vld [vmem:[%s9981_s1 + $0x2d0] sm:$0xff]  ;;  %v7659_v5 = vld [vmem:[%s9981_s1 + $0x338] sm:$0xff] }
  0x69   : > { %4632 = vmatpush.bf16.msra.mxu2 %v7643_v10  ;;  %4583 = vmatmul.bf16.vlgmr.msrb.gmra.mxu3 %v1278_v32  ;;  %v466_v10 = vunpack.c.h.bf16 %v340_v59  ;;  %v1326_v28 = vpack.c.bf16 %v5925_v12, %v5877_v11  ;;  %v7637_v32 = vld [vmem:[%s9981_s1 + $0x288] sm:$0xff]  ;;  %v7628_v59 = vld [vmem:[%s9981_s1 + $0x240] sm:$0xff]  ;;  %v7683_v11 = vld [vmem:[%s9981_s1 + $0x3f8] sm:$0xff] }
  0x6a   : > { %4651 = vmatpush.bf16.msra.mxu3 %v7651_v23  ;;  %v656_v23 = vmul.f32 0.007873535, %v464_v6  ;;  %v7667_v6 = vld [vmem:[%s9981_s1 + $0x378] sm:$0xff]  ;;  %v7674_v12 = vld [vmem:[%s9981_s1 + $0x3b0] sm:$0xff] }
  0x6b   : > { %4595 = vmatpush.bf16.msra.mxu0 %v7626_v33  ;;  %v658_v27 = vmul.f32 0.007873535, %v466_v10  ;;  %v795_v33 = vpack.c.bf16 %v608_v21, %v607_v20  ;;  %v754_v20 = vmul.f32 0.007873535, %v562_v0 }
  0x6c   : > { %4614 = vmatpush.bf16.msra.mxu1 %v7634_v35  ;;  %v819_v34 = vpack.c.bf16 %v656_v23, %v655_v22  ;;  %v796_v35 = vpack.c.bf16 %v610_v25, %v609_v24  ;;  %v7666_v22 = vld [vmem:[%s9981_s1 + $0x370] sm:$0xff] }
  0x6d   : > { %4633 = vmatpush.bf16.msra.mxu2 %v7642_v29  ;;  %v7622_v29 = vld [vmem:[%s9981_s1 + $0x210] sm:$0xff]  ;;  %v895_v43 = vunpack.c.l.bf16 %v795_v33 }
  0x6e   : > { %4652 = vmatpush.bf16.msra.mxu3 %v7650_v36  ;;  %v820_v36 = vpack.c.bf16 %v658_v27, %v657_v26  ;;  %v944_v46 = vunpack.c.h.bf16 %v819_v34  ;;  %v897_v49 = vunpack.c.l.bf16 %v796_v35  ;;  %v898_v51 = vunpack.c.h.bf16 %v796_v35  ;;  %v7658_v26 = vld [vmem:[%s9981_s1 + $0x330] sm:$0xff] }
  0x6f   : > { %4596 = vmatpush.bf16.msra.mxu0 %v7625_v41  ;;  %v387_v41 = vld [vmem:[%s9980_s0 + $0x260] sm:$0xff]  ;;  %v5782_v1 = vadd.f32 -1.0, %v895_v43 }
  0x70   : > { %4615 = vmatpush.bf16.msra.mxu1 %v7633_v44  ;;  %v943_v44 = vunpack.c.l.bf16 %v819_v34  ;;  %v946_v52 = vunpack.c.h.bf16 %v820_v36  ;;  %v559_v57 = vunpack.c.l.bf16 %v387_v41  ;;  %v560_v58 = vunpack.c.h.bf16 %v387_v41  ;;  %v7657_v34 = vld [vmem:[%s9981_s1 + $0x328] sm:$0xff]  ;;  %v7664_v43 = vld [vmem:[%s9981_s1 + $0x360] sm:$0xff] }
  0x71   : > { %4634 = vmatpush.bf16.msra.mxu2 %v7641_v40  ;;  %v363_v40 = vld [vmem:[%s9980_s0 + $0x1a0] sm:$0xff]  ;;  %v5831_v4 = vadd.f32 -1.0, %v944_v46  ;;  %v5784_v7 = vadd.f32 -1.0, %v897_v49  ;;  %v5785_v9 = vadd.f32 -1.0, %v898_v51  ;;  %v318_v51 = vld [vmem:[%s9980_s0 + $0x38] sm:$0xff] }
  0x72   : > { %4653 = vmatpush.bf16.msra.mxu3 %v7649_v45  ;;  %v896_v45 = vunpack.c.h.bf16 %v795_v33  ;;  %v511_v55 = vunpack.c.l.bf16 %v363_v40  ;;  %v512_v56 = vunpack.c.h.bf16 %v363_v40  ;;  %v5833_v10 = vadd.f32 -1.0, %v946_v52  ;;  %v7665_v33 = vld [vmem:[%s9981_s1 + $0x368] sm:$0xff]  ;;  %v7656_v46 = vld [vmem:[%s9981_s1 + $0x320] sm:$0xff]  ;;  %v342_v52 = vld [vmem:[%s9980_s0 + $0xf8] sm:$0xff] }
  0x73   : > { %4597 = vmatpush.bf16.msra.mxu0 %v7624_v53  ;;  %v7675_v53 = vld [vmem:[%s9981_s1 + $0x3b8] sm:$0xff]  ;;  %v421_v0 = vunpack.c.l.bf16 %v318_v51 }
  0x74   : > { %4616 = vmatpush.bf16.msra.mxu1 %v7632_v60  ;;  %v7644_v60 = vld [vmem:[%s9981_s1 + $0x2c0] sm:$0xff]  ;;  %v5783_v3 = vadd.f32 -1.0, %v896_v45  ;;  %v1282_v25 = vpack.c.bf16 %v5833_v10, %v5785_v9  ;;  %v341_v45 = vld [vmem:[%s9980_s0 + $0xf0] sm:$0xff]  ;;  %v7679_v10 = vld [vmem:[%s9981_s1 + $0x3d8] sm:$0xff] }
  0x75   : > { %4635 = vmatpush.bf16.msra.mxu2 %v7640_v50  ;;  %v945_v50 = vunpack.c.l.bf16 %v820_v36 }
  0x76   : > { %4654 = vmatpush.bf16.msra.mxu3 %v7648_v61  ;;  %4531 = vmatmul.bf16.gmra.mxu0 %v1323_v14  ;;  %v513_v61 = vunpack.c.l.bf16 %v364_v47  ;;  %v704_v14 = vmul.f32 0.007873535, %v512_v56  ;;  %v1280_v23 = vpack.c.bf16 %v5831_v4, %v5783_v3  ;;  %v470_v3 = vunpack.c.h.bf16 %v342_v52 }
  0x77   : > { %4598 = vmatpush.bf16.msra.mxu0 %v7623_v13  ;;  %4550 = vmatmul.bf16.gmra.mxu1 %v1324_v15  ;;  %v5832_v8 = vadd.f32 -1.0, %v945_v50  ;;  %v703_v13 = vmul.f32 0.007873535, %v511_v55  ;;  %v751_v15 = vmul.f32 0.007873535, %v559_v57 }
  0x78   : > { %4617 = vmatpush.bf16.msra.mxu1 %v7631_v17  ;;  %4569 = vmatmul.bf16.gmra.mxu2 %v1325_v16  ;;  %v752_v16 = vmul.f32 0.007873535, %v560_v58  ;;  %v705_v17 = vmul.f32 0.007873535, %v513_v61  ;;  %v7671_v58 = vld [vmem:[%s9981_s1 + $0x398] sm:$0xff] }
  0x79   : > { %4636 = vmatpush.bf16.msra.mxu2 %v7639_v2  ;;  %4588 = vmatmul.bf16.gmra.mxu3 %v1326_v28  ;;  %v5830_v2 = vadd.f32 -1.0, %v943_v44  ;;  %v1281_v24 = vpack.c.bf16 %v5832_v8, %v5784_v7  ;;  %v843_v27 = vpack.c.bf16 %v704_v14, %v703_v13  ;;  %v317_v44 = vld [vmem:[%s9980_s0 + $0x30] sm:$0xff] }
  0x7a   : > { %4655 = vmatpush.bf16.msra.mxu3 %v7647_v18  ;;  %v706_v18 = vmul.f32 0.007873535, %v514_v62  ;;  %v867_v28 = vpack.c.bf16 %v752_v16, %v751_v15  ;;  %v420_v61 = vunpack.c.h.bf16 %v317_v44  ;;  %v467_v62 = vunpack.c.l.bf16 %v341_v45 }
  0x7b   : > { %4599 = vmatpush.bf16.msra.mxu0 %v7622_v29  ;;  %v1279_v21 = vpack.c.bf16 %v5830_v2, %v5782_v1  ;;  %v7682_v29 = vld [vmem:[%s9981_s1 + $0x3f0] sm:$0xff]  ;;  %v991_v35 = vunpack.c.l.bf16 %v843_v27  ;;  %v422_v1 = vunpack.c.h.bf16 %v318_v51  ;;  %v469_v2 = vunpack.c.l.bf16 %v342_v52 }
  0x7c   : > { %4618 = vmatpush.bf16.msra.mxu1 %v7630_v30  ;;  %v7673_v30 = vld [vmem:[%s9981_s1 + $0x3a8] sm:$0xff]  ;;  %v1039_v36 = vunpack.c.l.bf16 %v867_v28  ;;  %v1040_v40 = vunpack.c.h.bf16 %v867_v28  ;;  %v612_v14 = vmul.f32 0.007873535, %v420_v61  ;;  %v659_v15 = vmul.f32 0.007873535, %v467_v62 }
  0x7d   : > { %4637 = vmatpush.bf16.msra.mxu2 %v7638_v19  ;;  %v753_v19 = vmul.f32 0.007873535, %v561_v63  ;;  %v5878_v47 = vadd.f32 -1.0, %v991_v35  ;;  %v468_v63 = vunpack.c.h.bf16 %v341_v45  ;;  %v389_v35 = vld [vmem:[%s9980_s0 + $0x270] sm:$0xff] }
  0x7e   : > { %4656 = vmatpush.bf16.msra.mxu3 %v7646_v31  ;;  %v844_v31 = vpack.c.bf16 %v706_v18, %v705_v17  ;;  %v5926_v48 = vadd.f32 -1.0, %v1039_v36  ;;  %v5927_v55 = vadd.f32 -1.0, %v1040_v40  ;;  %v613_v17 = vmul.f32 0.007873535, %v421_v0  ;;  %v7707_v40 = vld [vmem:[%s9981_s1 + $0x4b8] sm:$0xff]  ;;  %v7706_v0 = vld [vmem:[%s9981_s1 + $0x4b0] sm:$0xff] }
  0x7f   : > { %4600 = vmatpush.bf16.msra.mxu0 %v7621_v37  ;;  %v7681_v37 = vld [vmem:[%s9981_s1 + $0x3e8] sm:$0xff]  ;;  %v660_v16 = vmul.f32 0.007873535, %v468_v63  ;;  %v614_v18 = vmul.f32 0.007873535, %v422_v1  ;;  %v563_v51 = vunpack.c.l.bf16 %v389_v35  ;;  %v564_v52 = vunpack.c.h.bf16 %v389_v35  ;;  %v7715_v63 = vld [vmem:[%s9981_s1 + $0x4f8] sm:$0xff] }
  0x80   : > { %4619 = vmatpush.bf16.msra.mxu1 %v7629_v38  ;;  %v7672_v38 = vld [vmem:[%s9981_s1 + $0x3a0] sm:$0xff]  ;;  %v993_v41 = vunpack.c.l.bf16 %v844_v31  ;;  %v994_v49 = vunpack.c.h.bf16 %v844_v31  ;;  %v1327_v7 = vpack.c.bf16 %v5926_v48, %v5878_v47  ;;  %v7677_v31 = vld [vmem:[%s9981_s1 + $0x3c8] sm:$0xff]  ;;  %v7699_v47 = vld [vmem:[%s9981_s1 + $0x478] sm:$0xff] }
  0x81   : > { %4638 = vmatpush.bf16.msra.mxu2 %v7637_v32  ;;  %v868_v32 = vpack.c.bf16 %v754_v20, %v753_v19  ;;  %v661_v19 = vmul.f32 0.007873535, %v469_v2  ;;  %v662_v20 = vmul.f32 0.007873535, %v470_v3  ;;  %v798_v28 = vpack.c.bf16 %v614_v18, %v613_v17  ;;  %v7652_v48 = vld [vmem:[%s9981_s1 + $0x300] sm:$0xff] }
  0x82   : > { %4657 = vmatpush.bf16.msra.mxu3 %v7645_v39  ;;  %v992_v39 = vunpack.c.h.bf16 %v843_v27  ;;  %v5880_v56 = vadd.f32 -1.0, %v993_v41  ;;  %v5881_v4 = vadd.f32 -1.0, %v994_v49  ;;  %v821_v27 = vpack.c.bf16 %v660_v16, %v659_v15  ;;  %v366_v41 = vld [vmem:[%s9980_s0 + $0x1b8] sm:$0xff]  ;;  %v7714_v16 = vld [vmem:[%s9981_s1 + $0x4f0] sm:$0xff] }
  0x83   : > { %4601 = vmatpush.bf16.msra.mxu0 %v7620_v54  ;;  %v1042_v50 = vunpack.c.h.bf16 %v868_v32  ;;  %v902_v45 = vunpack.c.h.bf16 %v798_v28 }
  0x84   : > { %4620 = vmatpush.bf16.msra.mxu1 %v7628_v59  ;;  %v5879_v54 = vadd.f32 -1.0, %v992_v39  ;;  %v7663_v59 = vld [vmem:[%s9981_s1 + $0x358] sm:$0xff]  ;;  %v948_v39 = vunpack.c.h.bf16 %v821_v27 }
  0x85   : > { %4639 = vmatpush.bf16.msra.mxu2 %v7636_v42  ;;  %v1041_v42 = vunpack.c.l.bf16 %v868_v32  ;;  %v7668_v32 = vld [vmem:[%s9981_s1 + $0x380] sm:$0xff]  ;;  %v5789_v3 = vadd.f32 -1.0, %v902_v45  ;;  %v320_v45 = vld [vmem:[%s9980_s0 + $0x48] sm:$0xff] }
  0x86   : > { %4658 = vmatpush.bf16.msra.mxu3 %v7644_v60  ;;  %4602 = vmatmul.bf16.vlgmr.msra.gmra.mxu0 %v1279_v21  ;;  %v419_v60 = vunpack.c.l.bf16 %v317_v44  ;;  %v1328_v8 = vpack.c.bf16 %v5927_v55, %v5879_v54  ;;  %v7691_v54 = vld [vmem:[%s9981_s1 + $0x438] sm:$0xff]  ;;  %v517_v55 = vunpack.c.l.bf16 %v366_v41  ;;  %v5835_v62 = vadd.f32 -1.0, %v948_v39  ;;  %v343_v39 = vld [vmem:[%s9980_s0 + $0x100] sm:$0xff] }
  0x87   : > { %4670 = vmatpush.bf16.msrb.mxu0 %v7659_v5  ;;  %4621 = vmatmul.bf16.vlgmr.msra.gmra.mxu1 %v1280_v23  ;;  %v5928_v57 = vadd.f32 -1.0, %v1041_v42  ;;  %v5929_v5 = vadd.f32 -1.0, %v1042_v50  ;;  %v7678_v23 = vld [vmem:[%s9981_s1 + $0x3d0] sm:$0xff]  ;;  %v390_v42 = vld [vmem:[%s9980_s0 + $0x278] sm:$0xff] }
  0x88   : > { %4689 = vmatpush.bf16.msrb.mxu1 %v7667_v6  ;;  %4640 = vmatmul.bf16.vlgmr.msra.gmra.mxu2 %v1281_v24  ;;  %v7655_v6 = vld [vmem:[%s9981_s1 + $0x318] sm:$0xff]  ;;  %v611_v13 = vmul.f32 0.007873535, %v419_v60  ;;  %v7669_v24 = vld [vmem:[%s9981_s1 + $0x388] sm:$0xff] }
  0x89   : > { %4708 = vmatpush.bf16.msrb.mxu2 %v7675_v53  ;;  %4659 = vmatmul.bf16.vlgmr.msra.gmra.mxu3 %v1282_v25  ;;  %v7680_v53 = vld [vmem:[%s9981_s1 + $0x3e0] sm:$0xff]  ;;  %v1329_v9 = vpack.c.bf16 %v5928_v57, %v5880_v56  ;;  %v1330_v21 = vpack.c.bf16 %v5929_v5, %v5881_v4  ;;  %v7661_v25 = vld [vmem:[%s9981_s1 + $0x348] sm:$0xff]  ;;  %v518_v56 = vunpack.c.h.bf16 %v366_v41  ;;  %v565_v57 = vunpack.c.l.bf16 %v390_v42  ;;  %v7698_v5 = vld [vmem:[%s9981_s1 + $0x470] sm:$0xff] }
  0x8a   : > { %4727 = vmatpush.bf16.msrb.mxu3 %v7683_v11  ;;  %v7670_v11 = vld [vmem:[%s9981_s1 + $0x390] sm:$0xff] }
  0x8b   : > { %4671 = vmatpush.bf16.msrb.mxu0 %v7658_v26  ;;  %v797_v26 = vpack.c.bf16 %v612_v14, %v611_v13  ;;  %v757_v13 = vmul.f32 0.007873535, %v565_v57  ;;  %v472_v57 = vunpack.c.h.bf16 %v343_v39 }
  0x8c   : > { %4690 = vmatpush.bf16.msrb.mxu1 %v7666_v22  ;;  %v7654_v22 = vld [vmem:[%s9981_s1 + $0x310] sm:$0xff] }
  0x8d   : > { %4709 = vmatpush.bf16.msrb.mxu2 %v7674_v12  ;;  %v7662_v12 = vld [vmem:[%s9981_s1 + $0x350] sm:$0xff]  ;;  %v899_v36 = vunpack.c.l.bf16 %v797_v26 }
  0x8e   : > { %4728 = vmatpush.bf16.msrb.mxu3 %v7682_v29  ;;  %v822_v29 = vpack.c.bf16 %v662_v20, %v661_v19  ;;  %v7705_v20 = vld [vmem:[%s9981_s1 + $0x4a8] sm:$0xff] }
  0x8f   : > { %4672 = vmatpush.bf16.msrb.mxu0 %v7657_v34  ;;  %v365_v34 = vld [vmem:[%s9980_s0 + $0x1b0] sm:$0xff] }
  0x90   : > { %4691 = vmatpush.bf16.msrb.mxu1 %v7665_v33  ;;  %v7660_v33 = vld [vmem:[%s9981_s1 + $0x340] sm:$0xff]  ;;  %v949_v44 = vunpack.c.l.bf16 %v822_v29  ;;  %v515_v49 = vunpack.c.l.bf16 %v365_v34  ;;  %v516_v50 = vunpack.c.h.bf16 %v365_v34 }
  0x91   : > { %4710 = vmatpush.bf16.msrb.mxu2 %v7673_v30  ;;  %v7653_v30 = vld [vmem:[%s9981_s1 + $0x308] sm:$0xff] }
  0x92   : > { %4729 = vmatpush.bf16.msrb.mxu3 %v7681_v37  ;;  %v947_v37 = vunpack.c.l.bf16 %v821_v27  ;;  %v5836_v2 = vadd.f32 -1.0, %v949_v44  ;;  %v7713_v27 = vld [vmem:[%s9981_s1 + $0x4e8] sm:$0xff]  ;;  %v7703_v44 = vld [vmem:[%s9981_s1 + $0x498] sm:$0xff] }
  0x93   : > { %4673 = vmatpush.bf16.msrb.mxu0 %v7656_v46  ;;  %v950_v46 = vunpack.c.h.bf16 %v822_v29 }
  0x94   : > { %4692 = vmatpush.bf16.msrb.mxu1 %v7664_v43  ;;  %v901_v43 = vunpack.c.l.bf16 %v798_v28  ;;  %v5834_v60 = vadd.f32 -1.0, %v947_v37  ;;  %v7704_v28 = vld [vmem:[%s9981_s1 + $0x4a0] sm:$0xff] }
  0x95   : > { %4711 = vmatpush.bf16.msrb.mxu2 %v7672_v38  ;;  %v900_v38 = vunpack.c.h.bf16 %v797_v26  ;;  %v5837_v4 = vadd.f32 -1.0, %v950_v46  ;;  %v7712_v37 = vld [vmem:[%s9981_s1 + $0x4e0] sm:$0xff]  ;;  %v344_v46 = vld [vmem:[%s9980_s0 + $0x108] sm:$0xff] }
  0x96   : > { %4730 = vmatpush.bf16.msrb.mxu3 %v7680_v53  ;;  %4607 = vmatmul.bf16.gmra.mxu0 %v1327_v7  ;;  %v7676_v53 = vld [vmem:[%s9981_s1 + $0x3c0] sm:$0xff]  ;;  %v5788_v1 = vadd.f32 -1.0, %v901_v43  ;;  %v708_v7 = vmul.f32 0.007873535, %v516_v50 }
  0x97   : > { %4674 = vmatpush.bf16.msrb.mxu0 %v7655_v6  ;;  %4626 = vmatmul.bf16.gmra.mxu1 %v1328_v8  ;;  %v5787_v61 = vadd.f32 -1.0, %v900_v38  ;;  %v707_v6 = vmul.f32 0.007873535, %v515_v49  ;;  %v755_v8 = vmul.f32 0.007873535, %v563_v51  ;;  %v1286_v19 = vpack.c.bf16 %v5837_v4, %v5789_v3  ;;  %v319_v38 = vld [vmem:[%s9980_s0 + $0x40] sm:$0xff]  ;;  %v7687_v51 = vld [vmem:[%s9981_s1 + $0x418] sm:$0xff]  ;;  %v7686_v4 = vld [vmem:[%s9981_s1 + $0x410] sm:$0xff] }
  0x98   : > { %4693 = vmatpush.bf16.msrb.mxu1 %v7663_v59  ;;  %4645 = vmatmul.bf16.gmra.mxu2 %v1329_v9  ;;  %v5786_v59 = vadd.f32 -1.0, %v899_v36  ;;  %v756_v9 = vmul.f32 0.007873535, %v564_v52  ;;  %v1285_v18 = vpack.c.bf16 %v5836_v2, %v5788_v1  ;;  %v7695_v52 = vld [vmem:[%s9981_s1 + $0x458] sm:$0xff] }
  0x99   : > { %4712 = vmatpush.bf16.msrb.mxu2 %v7671_v58  ;;  %4664 = vmatmul.bf16.gmra.mxu3 %v1330_v21  ;;  %v566_v58 = vunpack.c.h.bf16 %v390_v42  ;;  %v1284_v17 = vpack.c.bf16 %v5835_v62, %v5787_v61  ;;  %v845_v21 = vpack.c.bf16 %v708_v7, %v707_v6  ;;  %v474_v61 = vunpack.c.h.bf16 %v344_v46  ;;  %v7710_v6 = vld [vmem:[%s9981_s1 + $0x4d0] sm:$0xff]  ;;  %v2135_v7 = vld [vmem:[%s9982_s2] sm:$0x1] }
  0x9a   : > { %4731 = vmatpush.bf16.msrb.mxu3 %v7679_v10  ;;  %v7690_v10 = vld [vmem:[%s9981_s1 + $0x430] sm:$0xff]  ;;  %v1283_v15 = vpack.c.bf16 %v5834_v60, %v5786_v59  ;;  %v426_v59 = vunpack.c.h.bf16 %v320_v45  ;;  %v473_v60 = vunpack.c.l.bf16 %v344_v46 }
  0x9b   : > { %4675 = vmatpush.bf16.msrb.mxu0 %v7654_v22  ;;  %v758_v14 = vmul.f32 0.007873535, %v566_v58  ;;  %v869_v22 = vpack.c.bf16 %v756_v9, %v755_v8  ;;  %v995_v29 = vunpack.c.l.bf16 %v845_v21  ;;  %v425_v58 = vunpack.c.l.bf16 %v320_v45 }
  0x9c   : > { %4694 = vmatpush.bf16.msrb.mxu1 %v7662_v12  ;;  %v710_v12 = vmul.f32 0.007873535, %v518_v56  ;;  %v471_v56 = vunpack.c.l.bf16 %v343_v39  ;;  %v392_v39 = vld [vmem:[%s9980_s0 + $0x288] sm:$0xff] }
  0x9d   : > { %4713 = vmatpush.bf16.msrb.mxu2 %v7670_v11  ;;  %v709_v11 = vmul.f32 0.007873535, %v517_v55  ;;  %v870_v26 = vpack.c.bf16 %v758_v14, %v757_v13  ;;  %v1044_v34 = vunpack.c.h.bf16 %v869_v22  ;;  %v424_v55 = vunpack.c.h.bf16 %v319_v38 }
  0x9e   : > { %4732 = vmatpush.bf16.msrb.mxu3 %v7678_v23  ;;  %v7689_v23 = vld [vmem:[%s9981_s1 + $0x428] sm:$0xff]  ;;  %v618_v13 = vmul.f32 0.007873535, %v426_v59  ;;  %v665_v14 = vmul.f32 0.007873535, %v473_v60  ;;  %v7738_v59 = vld [vmem:[%s9981_s1 + $0x5b0] sm:$0xff] }
  0x9f   : > { %4676 = vmatpush.bf16.msrb.mxu0 %v7653_v30  ;;  %v1043_v30 = vunpack.c.l.bf16 %v869_v22  ;;  %v1045_v36 = vunpack.c.l.bf16 %v870_v26  ;;  %v1046_v43 = vunpack.c.h.bf16 %v870_v26  ;;  %v616_v9 = vmul.f32 0.007873535, %v424_v55  ;;  %v7700_v26 = vld [vmem:[%s9981_s1 + $0x480] sm:$0xff] }
  0xa0   : > { %4695 = vmatpush.bf16.msrb.mxu1 %v7661_v25  ;;  %v846_v25 = vpack.c.bf16 %v710_v12, %v709_v11  ;;  %v664_v11 = vmul.f32 0.007873535, %v472_v57  ;;  %v617_v12 = vmul.f32 0.007873535, %v425_v58 }
  0xa1   : > { %4714 = vmatpush.bf16.msrb.mxu2 %v7669_v24  ;;  %v7697_v24 = vld [vmem:[%s9981_s1 + $0x468] sm:$0xff]  ;;  %v5930_v41 = vadd.f32 -1.0, %v1043_v30  ;;  %v5932_v50 = vadd.f32 -1.0, %v1045_v36  ;;  %v7692_v30 = vld [vmem:[%s9981_s1 + $0x440] sm:$0xff] }
  0xa2   : > { %4733 = vmatpush.bf16.msrb.mxu3 %v7677_v31  ;;  %v7688_v31 = vld [vmem:[%s9981_s1 + $0x420] sm:$0xff]  ;;  %v997_v35 = vunpack.c.l.bf16 %v846_v25  ;;  %v998_v42 = vunpack.c.h.bf16 %v846_v25 }
  0xa3   : > { %4677 = vmatpush.bf16.msrb.mxu0 %v7652_v48  ;;  %v5931_v48 = vadd.f32 -1.0, %v1044_v34 }
  0xa4   : > { %4696 = vmatpush.bf16.msrb.mxu1 %v7660_v33  ;;  %v996_v33 = vunpack.c.h.bf16 %v845_v21  ;;  %v5884_v49 = vadd.f32 -1.0, %v997_v35  ;;  %v5885_v62 = vadd.f32 -1.0, %v998_v42  ;;  %v7709_v21 = vld [vmem:[%s9981_s1 + $0x4c8] sm:$0xff]  ;;  %v7723_v42 = vld [vmem:[%s9981_s1 + $0x538] sm:$0xff] }
  0xa5   : > { %4715 = vmatpush.bf16.msrb.mxu2 %v7668_v32  ;;  %v7696_v32 = vld [vmem:[%s9981_s1 + $0x460] sm:$0xff] }
  0xa6   : > { %4734 = vmatpush.bf16.msrb.mxu3 %v7676_v53  ;;  %4678 = vmatmul.bf16.vlgmr.msrb.gmra.mxu0 %v1283_v15  ;;  %v7711_v53 = vld [vmem:[%s9981_s1 + $0x4d8] sm:$0xff]  ;;  %v1333_v3 = vpack.c.bf16 %v5932_v50, %v5884_v49  ;;  %v666_v15 = vmul.f32 0.007873535, %v474_v61 }
  0xa7   : > { %4746 = vmatpush.bf16.msra.mxu0 %v7691_v54  ;;  %4697 = vmatmul.bf16.vlgmr.msrb.gmra.mxu1 %v1284_v17  ;;  %v423_v54 = vunpack.c.l.bf16 %v319_v38  ;;  %v7701_v17 = vld [vmem:[%s9981_s1 + $0x488] sm:$0xff] }
  0xa8   : > { %4765 = vmatpush.bf16.msra.mxu1 %v7699_v47  ;;  %4716 = vmatmul.bf16.vlgmr.msrb.gmra.mxu2 %v1285_v18  ;;  %v5883_v47 = vadd.f32 -1.0, %v996_v33  ;;  %v7685_v18 = vld [vmem:[%s9981_s1 + $0x408] sm:$0xff]  ;;  %v824_v25 = vpack.c.bf16 %v666_v15, %v665_v14 }
  0xa9   : > { %4784 = vmatpush.bf16.msra.mxu2 %v7707_v40  ;;  %4735 = vmatmul.bf16.vlgmr.msrb.gmra.mxu3 %v1286_v19  ;;  %v5882_v40 = vadd.f32 -1.0, %v995_v29  ;;  %v615_v8 = vmul.f32 0.007873535, %v423_v54  ;;  %v7693_v19 = vld [vmem:[%s9981_s1 + $0x448] sm:$0xff]  ;;  %v570_v54 = vunpack.c.h.bf16 %v392_v39 }
  0xaa   : > { %4803 = vmatpush.bf16.msra.mxu3 %v7715_v63  ;;  %v5933_v63 = vadd.f32 -1.0, %v1046_v43  ;;  %v1332_v2 = vpack.c.bf16 %v5931_v48, %v5883_v47  ;;  %v368_v38 = vld [vmem:[%s9980_s0 + $0x1c8] sm:$0xff]  ;;  %v7731_v43 = vld [vmem:[%s9981_s1 + $0x578] sm:$0xff]  ;;  %v954_v47 = vunpack.c.h.bf16 %v824_v25 }
  0xab   : > { %4747 = vmatpush.bf16.msra.mxu0 %v7690_v10  ;;  %v1331_v1 = vpack.c.bf16 %v5930_v41, %v5882_v40  ;;  %v663_v10 = vmul.f32 0.007873535, %v471_v56  ;;  %v799_v22 = vpack.c.bf16 %v616_v9, %v615_v8  ;;  %v953_v41 = vunpack.c.l.bf16 %v824_v25  ;;  %v7747_v48 = vld [vmem:[%s9981_s1 + $0x5f8] sm:$0xff] }
  0xac   : > { %4766 = vmatpush.bf16.msra.mxu1 %v7698_v5  ;;  %v7694_v5 = vld [vmem:[%s9981_s1 + $0x450] sm:$0xff] }
  0xad   : > { %4785 = vmatpush.bf16.msra.mxu2 %v7706_v0  ;;  %v7702_v0 = vld [vmem:[%s9981_s1 + $0x490] sm:$0xff]  ;;  %v903_v33 = vunpack.c.l.bf16 %v799_v22  ;;  %v904_v35 = vunpack.c.h.bf16 %v799_v22  ;;  %v5840_v61 = vadd.f32 -1.0, %v953_v41  ;;  %v7729_v22 = vld [vmem:[%s9981_s1 + $0x568] sm:$0xff] }
  0xae   : > { %4804 = vmatpush.bf16.msra.mxu3 %v7714_v16  ;;  %v1334_v16 = vpack.c.bf16 %v5933_v63, %v5885_v62  ;;  %v7722_v62 = vld [vmem:[%s9981_s1 + $0x530] sm:$0xff] }
  0xaf   : > { %4748 = vmatpush.bf16.msra.mxu0 %v7689_v23  ;;  %v823_v23 = vpack.c.bf16 %v664_v11, %v663_v10  ;;  %v5790_v55 = vadd.f32 -1.0, %v903_v33  ;;  %v5791_v57 = vadd.f32 -1.0, %v904_v35  ;;  %v7730_v63 = vld [vmem:[%s9981_s1 + $0x570] sm:$0xff]  ;;  %v762_v10 = vmul.f32 0.007873535, %v570_v54  ;;  %v7728_v35 = vld [vmem:[%s9981_s1 + $0x560] sm:$0xff] }
  0xb0   : > { %4767 = vmatpush.bf16.msra.mxu1 %v7697_v24  ;;  %v800_v24 = vpack.c.bf16 %v618_v13, %v617_v12  ;;  %v7737_v12 = vld [vmem:[%s9981_s1 + $0x5a8] sm:$0xff] }
  0xb1   : > { %4786 = vmatpush.bf16.msra.mxu2 %v7705_v20  ;;  %v2136_v20 = vunpack.c.l.bf16 %v2135_v7  ;;  %v951_v34 = vunpack.c.l.bf16 %v823_v23  ;;  %v952_v36 = vunpack.c.h.bf16 %v823_v23  ;;  %v7745_v23 = vld [vmem:[%s9981_s1 + $0x5e8] sm:$0xff] }
  0xb2   : > { %4805 = vmatpush.bf16.msra.mxu3 %v7713_v27  ;;  %v7684_v27 = vld [vmem:[%s9981_s1 + $0x400] sm:$0xff]  ;;  %v905_v40 = vunpack.c.l.bf16 %v800_v24  ;;  %v906_v46 = vunpack.c.h.bf16 %v800_v24 }
  0xb3   : > { %4749 = vmatpush.bf16.msra.mxu0 %v7688_v31  ;;  %v8788_v29 = vperm.slane %v2136_v20, 0  ;;  %v7708_v31 = vld [vmem:[%s9981_s1 + $0x4c0] sm:$0xff]  ;;  %v5838_v56 = vadd.f32 -1.0, %v951_v34  ;;  %v5839_v58 = vadd.f32 -1.0, %v952_v36  ;;  %v7721_v20 = vld [vmem:[%s9981_s1 + $0x528] sm:$0xff]  ;;  %v345_v34 = vld [vmem:[%s9980_s0 + $0x110] sm:$0xff] }
  0xb4   : > { %4768 = vmatpush.bf16.msra.mxu1 %v7696_v32  ;;  %v391_v32 = vld [vmem:[%s9980_s0 + $0x280] sm:$0xff]  ;;  %v5792_v60 = vadd.f32 -1.0, %v905_v40  ;;  %v322_v40 = vld [vmem:[%s9980_s0 + $0x58] sm:$0xff]  ;;  %v476_v54 = vunpack.c.h.bf16 %v345_v34 }
  0xb5   : > { %4787 = vmatpush.bf16.msra.mxu2 %v7704_v28  ;;  %v367_v28 = vld [vmem:[%s9980_s0 + $0x1c0] sm:$0xff]  ;;  %v567_v49 = vunpack.c.l.bf16 %v391_v32  ;;  %v568_v50 = vunpack.c.h.bf16 %v391_v32  ;;  %v1287_v11 = vpack.c.bf16 %v5838_v56, %v5790_v55  ;;  %v1288_v15 = vpack.c.bf16 %v5839_v58, %v5791_v57  ;;  %v7719_v58 = vld [vmem:[%s9981_s1 + $0x518] sm:$0xff] }
  0xb6   : > { %4806 = vmatpush.bf16.msra.mxu3 %v7712_v37  ;;  %4683 = vmatmul.bf16.gmra.mxu0 %v1331_v1  ;;  %v7739_v37 = vld [vmem:[%s9981_s1 + $0x5b8] sm:$0xff]  ;;  %v520_v45 = vunpack.c.h.bf16 %v367_v28  ;;  %v7744_v36 = vld [vmem:[%s9981_s1 + $0x5e0] sm:$0xff] }
  0xb7   : > { %4750 = vmatpush.bf16.msra.mxu0 %v7687_v51  ;;  %4702 = vmatmul.bf16.gmra.mxu1 %v1332_v2  ;;  %v521_v51 = vunpack.c.l.bf16 %v368_v38  ;;  %v5793_v2 = vadd.f32 -1.0, %v906_v46 }
  0xb8   : > { %4769 = vmatpush.bf16.msra.mxu1 %v7695_v52  ;;  %4721 = vmatmul.bf16.gmra.mxu2 %v1333_v3  ;;  %v522_v52 = vunpack.c.h.bf16 %v368_v38  ;;  %v712_v1 = vmul.f32 0.007873535, %v520_v45  ;;  %v5841_v3 = vadd.f32 -1.0, %v954_v47  ;;  %v7735_v45 = vld [vmem:[%s9981_s1 + $0x598] sm:$0xff] }
  0xb9   : > { %4788 = vmatpush.bf16.msra.mxu2 %v7703_v44  ;;  %4740 = vmatmul.bf16.gmra.mxu3 %v1334_v16  ;;  %v519_v44 = vunpack.c.l.bf16 %v367_v28  ;;  %v713_v7 = vmul.f32 0.007873535, %v521_v51  ;;  %v1289_v16 = vpack.c.bf16 %v5840_v61, %v5792_v60  ;;  %v7727_v61 = vld [vmem:[%s9981_s1 + $0x558] sm:$0xff] }
  0xba   : > { %4807 = vmatpush.bf16.msra.mxu3 %v7711_v53  ;;  %v569_v53 = vunpack.c.l.bf16 %v392_v39  ;;  %v714_v8 = vmul.f32 0.007873535, %v522_v52 }
  0xbb   : > { %4751 = vmatpush.bf16.msra.mxu0 %v7686_v4  ;;  %v7746_v4 = vld [vmem:[%s9981_s1 + $0x5f0] sm:$0xff] }
  0xbc   : > { %4770 = vmatpush.bf16.msra.mxu1 %v7694_v5  ;;  %v759_v5 = vmul.f32 0.007873535, %v567_v49  ;;  %v761_v9 = vmul.f32 0.007873535, %v569_v53  ;;  %v8842_v24 = vpack.c.bf16 %v714_v8, %v713_v7  ;;  %v475_v53 = vunpack.c.l.bf16 %v345_v34  ;;  %v7717_v34 = vld [vmem:[%s9981_s1 + $0x508] sm:$0xff] }
  0xbd   : > { %4789 = vmatpush.bf16.msra.mxu2 %v7702_v0  ;;  %v711_v0 = vmul.f32 0.007873535, %v519_v44 }
  0xbe   : > { %4808 = vmatpush.bf16.msra.mxu3 %v7710_v6  ;;  %v760_v6 = vmul.f32 0.007873535, %v568_v50  ;;  %v8844_v25 = vpack.c.bf16 %v762_v10, %v761_v9  ;;  %v1001_v38 = vunpack.c.l.bf16 %v8842_v24  ;;  %v667_v9 = vmul.f32 0.007873535, %v475_v53 }
  0xbf   : > { %4752 = vmatpush.bf16.msra.mxu0 %v7685_v18  ;;  %v668_v10 = vmul.f32 0.007873535, %v476_v54 }
  0xc0   : > { %4771 = vmatpush.bf16.msra.mxu1 %v7693_v19  ;;  %v1290_v19 = vpack.c.bf16 %v5841_v3, %v5793_v2  ;;  %v1049_v39 = vunpack.c.l.bf16 %v8844_v25  ;;  %v1050_v44 = vunpack.c.h.bf16 %v8844_v25  ;;  %v5888_v7 = vadd.f32 -1.0, %v1001_v38 }
  0xc1   : > { %4790 = vmatpush.bf16.msra.mxu2 %v7701_v17  ;;  %v847_v17 = vpack.c.bf16 %v712_v1, %v711_v0 }
  0xc2   : > { %4809 = vmatpush.bf16.msra.mxu3 %v7709_v21  ;;  %v871_v21 = vpack.c.bf16 %v760_v6, %v759_v5  ;;  %v5936_v8 = vadd.f32 -1.0, %v1049_v39 }
  0xc3   : > { %4753 = vmatpush.bf16.msra.mxu0 %v7684_v27  ;;  %v4451_v13 = vpop.f32.mrf.mxu0  ;;  %v7736_v27 = vld [vmem:[%s9981_s1 + $0x5a0] sm:$0xff]  ;;  %v999_v28 = vunpack.c.l.bf16 %v847_v17  ;;  %v1000_v33 = vunpack.c.h.bf16 %v847_v17 }
  0xc4   : > { %4772 = vmatpush.bf16.msra.mxu1 %v7692_v30  ;;  %v4470_v14 = vpop.f32.mrf.mxu1  ;;  %v4452_v18 = vadd.f32 %v4451_v13, %v8788_v29  ;;  %v321_v30 = vld [vmem:[%s9980_s0 + $0x50] sm:$0xff]  ;;  %v1047_v32 = vunpack.c.l.bf16 %v871_v21 }
  0xc5   : > { %4791 = vmatpush.bf16.msra.mxu2 %v7700_v26  ;;  %v427_v46 = vunpack.c.l.bf16 %v321_v30  ;;  %v428_v47 = vunpack.c.h.bf16 %v321_v30  ;;  %v8877_v52 = vadd.f32 -1.0, %v999_v28  ;;  %v5887_v57 = vadd.f32 -1.0, %v1000_v33  ;;  %v7718_v13 = vld [vmem:[%s9981_s1 + $0x510] sm:$0xff] }
  0xc6   : > { %4810 = vmatpush.bf16.msra.mxu3 %v7708_v31  ;;  %v4471_v26 = vadd.f32 %v4470_v14, %v4452_v18  ;;  %4754 = vmatmul.bf16.vlgmr.msra.gmra.mxu0 %v1287_v11  ;;  %v7720_v31 = vld [vmem:[%s9981_s1 + $0x520] sm:$0xff]  ;;  %v5934_v56 = vadd.f32 -1.0, %v1047_v32  ;;  %v7726_v14 = vld [vmem:[%s9981_s1 + $0x550] sm:$0xff]  ;;  %v1337_v30 = vpack.c.bf16 %v5936_v8, %v5888_v7 }
  0xc7   : > { %4822 = vmatpush.bf16.msrb.mxu0 %v7723_v42  ;;  %4773 = vmatmul.bf16.vlgmr.msra.gmra.mxu1 %v1288_v15  ;;  %v619_v5 = vmul.f32 0.007873535, %v427_v46  ;;  %v620_v6 = vmul.f32 0.007873535, %v428_v47  ;;  %v7742_v15 = vld [vmem:[%s9981_s1 + $0x5d0] sm:$0xff]  ;;  %v7716_v46 = vld [vmem:[%s9981_s1 + $0x500] sm:$0xff] }
  0xc8   : > { %4841 = vmatpush.bf16.msrb.mxu1 %v7731_v43  ;;  %4792 = vmatmul.bf16.vlgmr.msra.gmra.mxu2 %v1289_v16  ;;  %v1002_v43 = vunpack.c.h.bf16 %v8842_v24 }
  0xc9   : > { %4860 = vmatpush.bf16.msrb.mxu2 %v7739_v37  ;;  %4811 = vmatmul.bf16.vlgmr.msra.gmra.mxu3 %v1290_v19  ;;  %v1048_v37 = vunpack.c.h.bf16 %v871_v21  ;;  %v801_v24 = vpack.c.bf16 %v620_v6, %v619_v5  ;;  %v7770_v5 = vld [vmem:[%s9981_s1 + $0x6b0] sm:$0xff] }
  0xca   : > { %4879 = vmatpush.bf16.msrb.mxu3 %v7747_v48  ;;  %v346_v48 = vld [vmem:[%s9980_s0 + $0x118] sm:$0xff]  ;;  %v5889_v11 = vadd.f32 -1.0, %v1002_v43 }
  0xcb   : > { %4823 = vmatpush.bf16.msrb.mxu0 %v7722_v62  ;;  %v4489_v41 = vpop.f32.mrf.mxu2  ;;  %v4453_v50 = vpop.f32.mrf.mxu0  ;;  %v7743_v62 = vld [vmem:[%s9981_s1 + $0x5d8] sm:$0xff]  ;;  %v477_v0 = vunpack.c.l.bf16 %v346_v48  ;;  %v478_v1 = vunpack.c.h.bf16 %v346_v48  ;;  %v5935_v3 = vadd.f32 -1.0, %v1048_v37  ;;  %v7741_v37 = vld [vmem:[%s9981_s1 + $0x5c8] sm:$0xff]  ;;  %v908_v47 = vunpack.c.h.bf16 %v801_v24 }
  0xcc   : > { %4842 = vmatpush.bf16.msrb.mxu1 %v7730_v63  ;;  %v4508_v42 = vpop.f32.mrf.mxu3  ;;  %v4490_v49 = vadd.f32 %v4489_v41, %v4471_v26  ;;  %v4472_v51 = vpop.f32.mrf.mxu1  ;;  %v4454_v55 = vadd.f32 %v4453_v50, %v8788_v29  ;;  %v430_v63 = vunpack.c.h.bf16 %v322_v40  ;;  %v7732_v41 = vld [vmem:[%s9981_s1 + $0x580] sm:$0xff] }
  0xcd   : > { %4861 = vmatpush.bf16.msrb.mxu2 %v7738_v59  ;;  %v429_v59 = vunpack.c.l.bf16 %v322_v40  ;;  %v669_v18 = vmul.f32 0.007873535, %v477_v0  ;;  %v670_v19 = vmul.f32 0.007873535, %v478_v1  ;;  %v1336_v28 = vpack.c.bf16 %v5935_v3, %v5887_v57  ;;  %v7724_v50 = vld [vmem:[%s9981_s1 + $0x540] sm:$0xff] }
  0xce   : > { %4880 = vmatpush.bf16.msrb.mxu3 %v7746_v4  ;;  %v8883_v60 = vadd.f32 %v4508_v42, %v4490_v49  ;;  %v4473_v2 = vadd.f32 %v4472_v51, %v4454_v55  ;;  %v7734_v4 = vld [vmem:[%s9981_s1 + $0x590] sm:$0xff]  ;;  %v622_v17 = vmul.f32 0.007873535, %v430_v63  ;;  %v907_v42 = vunpack.c.l.bf16 %v801_v24  ;;  %v7740_v51 = vld [vmem:[%s9981_s1 + $0x5c0] sm:$0xff]  ;;  %v370_v63 = vld [vmem:[%s9980_s0 + $0x1d8] sm:$0xff] }
  0xcf   : > { %4824 = vmatpush.bf16.msrb.mxu0 %v7721_v20  ;;  %v621_v16 = vmul.f32 0.007873535, %v429_v59  ;;  %v8921_v39 = vpack.c.bf16 %v670_v19, %v669_v18  ;;  %v393_v49 = vld [vmem:[%s9980_s0 + $0x290] sm:$0xff]  ;;  %v7763_v59 = vld [vmem:[%s9981_s1 + $0x678] sm:$0xff] }
  0xd0   : > { %4843 = vmatpush.bf16.msrb.mxu1 %v7729_v22  ;;  %v1335_v22 = vpack.c.bf16 %v5934_v56, %v8877_v52  ;;  %v8946_v56 = vadd.f32 -1.0, %v907_v42  ;;  %v571_v6 = vunpack.c.l.bf16 %v393_v49  ;;  %v572_v7 = vunpack.c.h.bf16 %v393_v49  ;;  %v7762_v18 = vld [vmem:[%s9981_s1 + $0x670] sm:$0xff]  ;;  %v7753_v49 = vld [vmem:[%s9981_s1 + $0x628] sm:$0xff] }
  0xd1   : > { %4862 = vmatpush.bf16.msrb.mxu2 %v7737_v12  ;;  %v5937_v12 = vadd.f32 -1.0, %v1050_v44  ;;  %v8919_v38 = vpack.c.bf16 %v622_v17, %v621_v16  ;;  %v7771_v44 = vld [vmem:[%s9981_s1 + $0x6b8] sm:$0xff]  ;;  %v957_v53 = vunpack.c.l.bf16 %v8921_v39  ;;  %v525_v16 = vunpack.c.l.bf16 %v370_v63 }
  0xd2   : > { %4881 = vmatpush.bf16.msrb.mxu3 %v7745_v23  ;;  %v7733_v23 = vld [vmem:[%s9981_s1 + $0x588] sm:$0xff]  ;;  %v763_v24 = vmul.f32 0.007873535, %v571_v6 }
  0xd3   : > { %4825 = vmatpush.bf16.msrb.mxu0 %v7720_v31  ;;  %v4491_v20 = vpop.f32.mrf.mxu2  ;;  %v4456_v26 = vpop.f32.mrf.mxu0  ;;  %v825_v31 = vpack.c.bf16 %v668_v10, %v667_v9  ;;  %v1338_v33 = vpack.c.bf16 %v5937_v12, %v5889_v11  ;;  %v909_v52 = vunpack.c.l.bf16 %v8919_v38  ;;  %v910_v57 = vunpack.c.h.bf16 %v8919_v38  ;;  %v394_v12 = vld [vmem:[%s9980_s0 + $0x298] sm:$0xff] }
  0xd4   : > { %4844 = vmatpush.bf16.msrb.mxu1 %v7728_v35  ;;  %v4510_v21 = vpop.f32.mrf.mxu3  ;;  %v4492_v25 = vadd.f32 %v4491_v20, %v4473_v2  ;;  %v4457_v32 = vadd.f32 %v4456_v26, %v8788_v29  ;;  %v5795_v9 = vadd.f32 -1.0, %v908_v47  ;;  %v958_v11 = vunpack.c.h.bf16 %v8921_v39 }
  0xd5   : > { %4863 = vmatpush.bf16.msrb.mxu2 %v7736_v27  ;;  %v4475_v27 = vpop.f32.mrf.mxu1  ;;  %v955_v43 = vunpack.c.l.bf16 %v825_v31  ;;  %v956_v48 = vunpack.c.h.bf16 %v825_v31  ;;  %v573_v26 = vunpack.c.l.bf16 %v394_v12  ;;  %v717_v39 = vmul.f32 0.007873535, %v525_v16 }
  0xd6   : > { %4882 = vmatpush.bf16.msrb.mxu3 %v7744_v36  ;;  %v8911_v35 = vadd.f32 %v4510_v21, %v4492_v25  ;;  %v7725_v36 = vld [vmem:[%s9981_s1 + $0x548] sm:$0xff]  ;;  %v4476_v40 = vadd.f32 %v4475_v27, %v4457_v32  ;;  %4759 = vmatmul.bf16.gmra.mxu0 %v1335_v22  ;;  %v526_v21 = vunpack.c.h.bf16 %v370_v63  ;;  %v7778_v22 = vld [vmem:[%s9981_s1 + $0x6f0] sm:$0xff]  ;;  %v764_v25 = vmul.f32 0.007873535, %v572_v7  ;;  %v7759_v7 = vld [vmem:[%s9981_s1 + $0x658] sm:$0xff] }
  0xd7   : > { %4826 = vmatpush.bf16.msrb.mxu0 %v7719_v58  ;;  %4778 = vmatmul.bf16.gmra.mxu1 %v1336_v28  ;;  %v7755_v58 = vld [vmem:[%s9981_s1 + $0x638] sm:$0xff]  ;;  %v5842_v3 = vadd.f32 -1.0, %v955_v43  ;;  %v5843_v10 = vadd.f32 -1.0, %v956_v48  ;;  %v574_v27 = vunpack.c.h.bf16 %v394_v12  ;;  %v5797_v28 = vadd.f32 -1.0, %v910_v57 }
  0xd8   : > { %4845 = vmatpush.bf16.msrb.mxu1 %v7727_v61  ;;  %4797 = vmatmul.bf16.gmra.mxu2 %v1337_v30  ;;  %v5845_v30 = vadd.f32 -1.0, %v958_v11  ;;  %v873_v43 = vpack.c.bf16 %v764_v25, %v763_v24  ;;  %v7766_v25 = vld [vmem:[%s9981_s1 + $0x690] sm:$0xff] }
  0xd9   : > { %4864 = vmatpush.bf16.msrb.mxu2 %v7735_v45  ;;  %v369_v45 = vld [vmem:[%s9980_s0 + $0x1d0] sm:$0xff]  ;;  %4816 = vmatmul.bf16.gmra.mxu3 %v1338_v33  ;;  %v1291_v31 = vpack.c.bf16 %v5842_v3, %v8946_v56  ;;  %v1292_v32 = vpack.c.bf16 %v5843_v10, %v5795_v9  ;;  %v323_v56 = vld [vmem:[%s9980_s0 + $0x60] sm:$0xff]  ;;  %v324_v10 = vld [vmem:[%s9980_s0 + $0x68] sm:$0xff] }
  0xda   : > { %4883 = vmatpush.bf16.msrb.mxu3 %v7743_v62  ;;  %v523_v61 = vunpack.c.l.bf16 %v369_v45  ;;  %v524_v62 = vunpack.c.h.bf16 %v369_v45  ;;  %v766_v45 = vmul.f32 0.007873535, %v574_v27  ;;  %v1294_v48 = vpack.c.bf16 %v5845_v30, %v5797_v28 }
  0xdb   : > { %4827 = vmatpush.bf16.msrb.mxu0 %v7718_v13  ;;  %v4494_v54 = vpop.f32.mrf.mxu2  ;;  %v4458_v1 = vpop.f32.mrf.mxu0  ;;  %v1051_v57 = vunpack.c.l.bf16 %v873_v43  ;;  %v1052_v63 = vunpack.c.h.bf16 %v873_v43  ;;  %v432_v3 = vunpack.c.h.bf16 %v323_v56  ;;  %v433_v28 = vunpack.c.l.bf16 %v324_v10 }
  0xdc   : > { %4846 = vmatpush.bf16.msrb.mxu1 %v7726_v14  ;;  %v4513_v55 = vpop.f32.mrf.mxu3  ;;  %v4495_v0 = vadd.f32 %v4494_v54, %v4476_v40  ;;  %v4459_v8 = vadd.f32 %v4458_v1, %v8788_v29  ;;  %v5796_v14 = vadd.f32 -1.0, %v909_v52  ;;  %v7754_v29 = vld [vmem:[%s9981_s1 + $0x630] sm:$0xff]  ;;  %v715_v19 = vmul.f32 0.007873535, %v523_v61  ;;  %v7768_v52 = vld [vmem:[%s9981_s1 + $0x6a0] sm:$0xff]  ;;  %v7767_v1 = vld [vmem:[%s9981_s1 + $0x698] sm:$0xff] }
  0xdd   : > { %4865 = vmatpush.bf16.msrb.mxu2 %v7734_v4  ;;  %v4477_v2 = vpop.f32.mrf.mxu1  ;;  %v7779_v4 = vld [vmem:[%s9981_s1 + $0x6f8] sm:$0xff]  ;;  %v716_v20 = vmul.f32 0.007873535, %v524_v62  ;;  %v718_v40 = vmul.f32 0.007873535, %v526_v21  ;;  %v347_v61 = vld [vmem:[%s9980_s0 + $0x120] sm:$0xff]  ;;  %v624_v27 = vmul.f32 0.007873535, %v432_v3 }
  0xde   : > { %4884 = vmatpush.bf16.msrb.mxu3 %v7742_v15  ;;  %v8969_v13 = vadd.f32 %v4513_v55, %v4495_v0  ;;  %v5844_v15 = vadd.f32 -1.0, %v957_v53  ;;  %v4478_v17 = vadd.f32 %v4477_v2, %v4459_v8  ;;  %v7752_v62 = vld [vmem:[%s9981_s1 + $0x620] sm:$0xff]  ;;  %v431_v2 = vunpack.c.l.bf16 %v323_v56 }
  0xdf   : > { %4828 = vmatpush.bf16.msrb.mxu0 %v7717_v34  ;;  %v849_v38 = vpack.c.bf16 %v716_v20, %v715_v19  ;;  %v7776_v0 = vld [vmem:[%s9981_s1 + $0x6e0] sm:$0xff]  ;;  %v479_v8 = vunpack.c.l.bf16 %v347_v61  ;;  %v480_v9 = vunpack.c.h.bf16 %v347_v61  ;;  %v9030_v19 = vadd.f32 -1.0, %v1052_v63  ;;  %v7749_v63 = vld [vmem:[%s9981_s1 + $0x608] sm:$0xff] }
  0xe0   : > { %4847 = vmatpush.bf16.msrb.mxu1 %v7725_v36  ;;  %v1293_v36 = vpack.c.bf16 %v5844_v15, %v5796_v14  ;;  %v9027_v15 = vadd.f32 -1.0, %v1051_v57 }
  0xe1   : > { %4866 = vmatpush.bf16.msrb.mxu2 %v7733_v23  ;;  %v7769_v23 = vld [vmem:[%s9981_s1 + $0x6a8] sm:$0xff]  ;;  %v1003_v54 = vunpack.c.l.bf16 %v849_v38  ;;  %v1004_v55 = vunpack.c.h.bf16 %v849_v38 }
  0xe2   : > { %4885 = vmatpush.bf16.msrb.mxu3 %v7741_v37  ;;  %v7761_v37 = vld [vmem:[%s9981_s1 + $0x668] sm:$0xff] }
  0xe3   : > { %4829 = vmatpush.bf16.msrb.mxu0 %v7716_v46  ;;  %v4496_v33 = vpop.f32.mrf.mxu2  ;;  %v4527_v42 = vpop.f32.mrf.mxu0  ;;  %v9019_v6 = vadd.f32 -1.0, %v1004_v55 }
  0xe4   : > { %4848 = vmatpush.bf16.msrb.mxu1 %v7724_v50  ;;  %v4515_v34 = vpop.f32.mrf.mxu3  ;;  %v4528_v46 = vadd.f32 %v4527_v42, %v8883_v60  ;;  %v7760_v60 = vld [vmem:[%s9981_s1 + $0x660] sm:$0xff]  ;;  %v7750_v42 = vld [vmem:[%s9981_s1 + $0x610] sm:$0xff] }
  0xe5   : > { %4867 = vmatpush.bf16.msrb.mxu2 %v7732_v41  ;;  %v4497_v41 = vadd.f32 %v4496_v33, %v4478_v17  ;;  %v4546_v47 = vpop.f32.mrf.mxu1  ;;  %v672_v33 = vmul.f32 0.007873535, %v480_v9 }
  0xe6   : > { %4886 = vmatpush.bf16.msrb.mxu3 %v7740_v51  ;;  %v7777_v51 = vld [vmem:[%s9981_s1 + $0x6e8] sm:$0xff]  ;;  %v4547_v53 = vadd.f32 %v4546_v47, %v4528_v46  ;;  %4830 = vmatmul.bf16.vlgmr.msrb.gmra.mxu0 %v1291_v31  ;;  %v7758_v31 = vld [vmem:[%s9981_s1 + $0x650] sm:$0xff] }
  0xe7   : > { %4898 = vmatpush.bf16.msra.mxu0 %v7755_v58  ;;  %v8991_v50 = vadd.f32 %v4515_v34, %v4497_v41  ;;  %4849 = vmatmul.bf16.vlgmr.msrb.gmra.mxu1 %v1292_v32  ;;  %v850_v58 = vpack.c.bf16 %v718_v40, %v717_v39  ;;  %v671_v32 = vmul.f32 0.007873535, %v479_v8  ;;  %v434_v34 = vunpack.c.h.bf16 %v324_v10  ;;  %v7803_v8 = vld [vmem:[%s9981_s1 + $0x7b8] sm:$0xff] }
  0xe8   : > { %4917 = vmatpush.bf16.msra.mxu1 %v7763_v59  ;;  %4868 = vmatmul.bf16.vlgmr.msrb.gmra.mxu2 %v1293_v36  ;;  %v7795_v10 = vld [vmem:[%s9981_s1 + $0x778] sm:$0xff] }
  0xe9   : > { %4936 = vmatpush.bf16.msra.mxu2 %v7771_v44  ;;  %v765_v44 = vmul.f32 0.007873535, %v573_v26  ;;  %4887 = vmatmul.bf16.vlgmr.msrb.gmra.mxu3 %v1294_v48  ;;  %v1005_v16 = vunpack.c.l.bf16 %v850_v58  ;;  %v1006_v20 = vunpack.c.h.bf16 %v850_v58  ;;  %v623_v26 = vmul.f32 0.007873535, %v431_v2  ;;  %v7764_v2 = vld [vmem:[%s9981_s1 + $0x680] sm:$0xff] }
  0xea   : > { %4955 = vmatpush.bf16.msra.mxu3 %v7779_v4  ;;  %v1340_v48 = vpack.c.bf16 %v9030_v19, %v9019_v6  ;;  %v372_v19 = vld [vmem:[%s9980_s0 + $0x1e8] sm:$0xff] }
  0xeb   : > { %4899 = vmatpush.bf16.msra.mxu0 %v7754_v29  ;;  %v874_v59 = vpack.c.bf16 %v766_v45, %v765_v44  ;;  %v4565_v4 = vpop.f32.mrf.mxu2  ;;  %v4529_v14 = vpop.f32.mrf.mxu0  ;;  %v5892_v36 = vadd.f32 -1.0, %v1005_v16  ;;  %v5893_v40 = vadd.f32 -1.0, %v1006_v20  ;;  %v7774_v44 = vld [vmem:[%s9981_s1 + $0x6d0] sm:$0xff]  ;;  %v7765_v45 = vld [vmem:[%s9981_s1 + $0x688] sm:$0xff]  ;;  %v803_v46 = vpack.c.bf16 %v624_v27, %v623_v26 }
  0xec   : > { %4918 = vmatpush.bf16.msra.mxu1 %v7762_v18  ;;  %v4566_v11 = vadd.f32 %v4565_v4, %v4547_v53  ;;  %v4584_v12 = vpop.f32.mrf.mxu3  ;;  %v4530_v29 = vadd.f32 %v4529_v14, %v8911_v35  ;;  %v7775_v35 = vld [vmem:[%s9981_s1 + $0x6d8] sm:$0xff]  ;;  %v626_v53 = vmul.f32 0.007873535, %v434_v34  ;;  %v395_v14 = vld [vmem:[%s9980_s0 + $0x2a0] sm:$0xff]  ;;  %v396_v27 = vld [vmem:[%s9980_s0 + $0x2a8] sm:$0xff] }
  0xed   : > { %4937 = vmatpush.bf16.msra.mxu2 %v7770_v5  ;;  %v9017_v5 = vadd.f32 -1.0, %v1003_v54  ;;  %v1053_v17 = vunpack.c.l.bf16 %v874_v59  ;;  %v4548_v18 = vpop.f32.mrf.mxu1  ;;  %v1054_v21 = vunpack.c.h.bf16 %v874_v59  ;;  %v912_v3 = vunpack.c.h.bf16 %v803_v46 }
  0xee   : > { %4956 = vmatpush.bf16.msra.mxu3 %v7778_v22  ;;  %v7751_v22 = vld [vmem:[%s9981_s1 + $0x618] sm:$0xff]  ;;  %v9038_v24 = vadd.f32 %v4584_v12, %v4566_v11  ;;  %v4549_v30 = vadd.f32 %v4548_v18, %v4530_v29  ;;  %v371_v11 = vld [vmem:[%s9980_s0 + $0x1e0] sm:$0xff]  ;;  %v575_v34 = vunpack.c.l.bf16 %v395_v14 }
  0xef   : > { %4900 = vmatpush.bf16.msra.mxu0 %v7753_v49  ;;  %v5941_v41 = vadd.f32 -1.0, %v1054_v21  ;;  %v1339_v43 = vpack.c.bf16 %v9027_v15, %v9017_v5  ;;  %v7757_v49 = vld [vmem:[%s9981_s1 + $0x648] sm:$0xff]  ;;  %v7756_v5 = vld [vmem:[%s9981_s1 + $0x640] sm:$0xff]  ;;  %v9106_v29 = vadd.f32 -1.0, %v912_v3  ;;  %v7787_v18 = vld [vmem:[%s9981_s1 + $0x738] sm:$0xff]  ;;  %v528_v26 = vunpack.c.h.bf16 %v371_v11 }
  0xf0   : > { %4919 = vmatpush.bf16.msra.mxu1 %v7761_v37  ;;  %v5940_v37 = vadd.f32 -1.0, %v1053_v17  ;;  %v7748_v12 = vld [vmem:[%s9981_s1 + $0x600] sm:$0xff]  ;;  %v7809_v3 = vld [vmem:[%s9981_s1 + $0x7e8] sm:$0xff] }
  0xf1   : > { %4938 = vmatpush.bf16.msra.mxu2 %v7769_v23  ;;  %v348_v23 = vld [vmem:[%s9980_s0 + $0x128] sm:$0xff]  ;;  %v7772_v15 = vld [vmem:[%s9981_s1 + $0x6c0] sm:$0xff] }
  0xf2   : > { %4957 = vmatpush.bf16.msra.mxu3 %v7777_v51  ;;  %v481_v38 = vunpack.c.l.bf16 %v348_v23  ;;  %v482_v39 = vunpack.c.h.bf16 %v348_v23  ;;  %v9065_v51 = vpack.c.bf16 %v672_v33, %v671_v32  ;;  %v1341_v56 = vpack.c.bf16 %v5940_v37, %v5892_v36  ;;  %v7811_v23 = vld [vmem:[%s9981_s1 + $0x7f8] sm:$0xff]  ;;  %v7794_v33 = vld [vmem:[%s9981_s1 + $0x770] sm:$0xff] }
  0xf3   : > { %4901 = vmatpush.bf16.msra.mxu0 %v7752_v62  ;;  %v4567_v47 = vpop.f32.mrf.mxu2  ;;  %v4532_v55 = vpop.f32.mrf.mxu0  ;;  %v1342_v62 = vpack.c.bf16 %v5941_v41, %v5893_v40  ;;  %v576_v36 = vunpack.c.h.bf16 %v395_v14  ;;  %v529_v41 = vunpack.c.l.bf16 %v372_v19 }
  0xf4   : > { %4920 = vmatpush.bf16.msra.mxu1 %v7760_v60  ;;  %v4568_v60 = vadd.f32 %v4567_v47, %v4549_v30  ;;  %v4586_v54 = vpop.f32.mrf.mxu3  ;;  %v673_v57 = vmul.f32 0.007873535, %v481_v38  ;;  %v674_v58 = vmul.f32 0.007873535, %v482_v39  ;;  %v4533_v59 = vadd.f32 %v4532_v55, %v8969_v13 }
  0xf5   : > { %4939 = vmatpush.bf16.msra.mxu2 %v7768_v52  ;;  %v625_v52 = vmul.f32 0.007873535, %v433_v28  ;;  %v4551_v61 = vpop.f32.mrf.mxu1  ;;  %v911_v13 = vunpack.c.l.bf16 %v803_v46  ;;  %v959_v6 = vunpack.c.l.bf16 %v9065_v51  ;;  %v960_v17 = vunpack.c.h.bf16 %v9065_v51 }
  0xf6   : > { %4958 = vmatpush.bf16.msra.mxu3 %v7776_v0  ;;  %v9071_v0 = vadd.f32 %v4586_v54, %v4568_v60  ;;  %v4552_v4 = vadd.f32 %v4551_v61, %v4533_v59  ;;  %4835 = vmatmul.bf16.gmra.mxu0 %v1339_v43  ;;  %v828_v9 = vpack.c.bf16 %v674_v58, %v673_v57  ;;  %v7786_v43 = vld [vmem:[%s9981_s1 + $0x730] sm:$0xff]  ;;  %v578_v46 = vunpack.c.h.bf16 %v396_v27  ;;  %v7793_v54 = vld [vmem:[%s9981_s1 + $0x768] sm:$0xff] }
  0xf7   : > { %4902 = vmatpush.bf16.msra.mxu0 %v7751_v22  ;;  %4854 = vmatmul.bf16.gmra.mxu1 %v1340_v48  ;;  %v9103_v16 = vadd.f32 -1.0, %v911_v13  ;;  %v9114_v21 = vadd.f32 -1.0, %v959_v6  ;;  %v5847_v48 = vadd.f32 -1.0, %v960_v17  ;;  %v767_v55 = vmul.f32 0.007873535, %v575_v34  ;;  %v7785_v59 = vld [vmem:[%s9981_s1 + $0x728] sm:$0xff]  ;;  %v7784_v17 = vld [vmem:[%s9981_s1 + $0x720] sm:$0xff] }
  0xf8   : > { %4921 = vmatpush.bf16.msra.mxu1 %v7759_v7  ;;  %v9083_v7 = vpack.c.bf16 %v626_v53, %v625_v52  ;;  %4873 = vmatmul.bf16.gmra.mxu2 %v1341_v56  ;;  %v961_v32 = vunpack.c.l.bf16 %v828_v9  ;;  %v962_v40 = vunpack.c.h.bf16 %v828_v9  ;;  %v720_v52 = vmul.f32 0.007873535, %v528_v26  ;;  %v7799_v26 = vld [vmem:[%s9981_s1 + $0x798] sm:$0xff] }
  0xf9   : > { %4940 = vmatpush.bf16.msra.mxu2 %v7767_v1  ;;  %v7773_v1 = vld [vmem:[%s9981_s1 + $0x6c8] sm:$0xff]  ;;  %4892 = vmatmul.bf16.gmra.mxu3 %v1342_v62  ;;  %v768_v56 = vmul.f32 0.007873535, %v576_v36  ;;  %v721_v61 = vmul.f32 0.007873535, %v529_v41  ;;  %v1295_v13 = vpack.c.bf16 %v9114_v21, %v9103_v16 }
  0xfa   : > { %4959 = vmatpush.bf16.msra.mxu3 %v7775_v35  ;;  %v913_v22 = vunpack.c.l.bf16 %v9083_v7  ;;  %v7802_v35 = vld [vmem:[%s9981_s1 + $0x7b0] sm:$0xff]  ;;  %v914_v39 = vunpack.c.h.bf16 %v9083_v7  ;;  %v5848_v60 = vadd.f32 -1.0, %v961_v32  ;;  %v5849_v58 = vadd.f32 -1.0, %v962_v40  ;;  %v7791_v32 = vld [vmem:[%s9981_s1 + $0x758] sm:$0xff] }
  0xfb   : > { %4903 = vmatpush.bf16.msra.mxu0 %v7750_v42  ;;  %v4570_v20 = vpop.f32.mrf.mxu2  ;;  %v326_v40 = vld [vmem:[%s9980_s0 + $0x78] sm:$0xff] }
  0xfc   : > { %4922 = vmatpush.bf16.msra.mxu1 %v7758_v31  ;;  %v4571_v28 = vadd.f32 %v4570_v20, %v4552_v4  ;;  %v4589_v30 = vpop.f32.mrf.mxu3  ;;  %v4534_v31 = vpop.f32.mrf.mxu0  ;;  %v5800_v53 = vadd.f32 -1.0, %v913_v22  ;;  %v5801_v57 = vadd.f32 -1.0, %v914_v39  ;;  %v7808_v20 = vld [vmem:[%s9981_s1 + $0x7e0] sm:$0xff] }
  0xfd   : > { %4941 = vmatpush.bf16.msra.mxu2 %v7766_v25  ;;  %v527_v25 = vunpack.c.l.bf16 %v371_v11  ;;  %v4535_v37 = vadd.f32 %v4534_v31, %v8991_v50  ;;  %v4553_v38 = vpop.f32.mrf.mxu1  ;;  %v7810_v50 = vld [vmem:[%s9981_s1 + $0x7f0] sm:$0xff]  ;;  %v7783_v31 = vld [vmem:[%s9981_s1 + $0x718] sm:$0xff] }
  0xfe   : > { %4960 = vmatpush.bf16.msra.mxu3 %v7774_v44  ;;  %v9131_v42 = vadd.f32 %v4589_v30, %v4571_v28  ;;  %v530_v44 = vunpack.c.h.bf16 %v372_v19  ;;  %v1297_v9 = vpack.c.bf16 %v5848_v60, %v5800_v53  ;;  %v1298_v14 = vpack.c.bf16 %v5849_v58, %v5801_v57  ;;  %v7798_v53 = vld [vmem:[%s9981_s1 + $0x790] sm:$0xff]  ;;  %v350_v60 = vld [vmem:[%s9980_s0 + $0x138] sm:$0xff] }
  0xff   : > { %4904 = vmatpush.bf16.msra.mxu0 %v7749_v63  ;;  %v4554_v47 = vadd.f32 %v4553_v38, %v4535_v37  ;;  %v719_v51 = vmul.f32 0.007873535, %v527_v25  ;;  %v7807_v37 = vld [vmem:[%s9981_s1 + $0x7d8] sm:$0xff]  ;;  %v7790_v57 = vld [vmem:[%s9981_s1 + $0x750] sm:$0xff]  ;;  %v437_v58 = vunpack.c.l.bf16 %v326_v40 }
 0x100   : > { %4923 = vmatpush.bf16.msra.mxu1 %v7757_v49  ;;  %v7801_v49 = vld [vmem:[%s9981_s1 + $0x7a8] sm:$0xff]  ;;  %v722_v62 = vmul.f32 0.007873535, %v530_v44 }
 0x101   : > { %4942 = vmatpush.bf16.msra.mxu2 %v7765_v45  ;;  %v577_v45 = vunpack.c.l.bf16 %v396_v27  ;;  %v851_v4 = vpack.c.bf16 %v720_v52, %v719_v51  ;;  %v349_v27 = vld [vmem:[%s9980_s0 + $0x130] sm:$0xff] }
 0x102   : > { %4961 = vmatpush.bf16.msra.mxu3 %v7773_v1  ;;  %v770_v1 = vmul.f32 0.007873535, %v578_v46  ;;  %v483_v46 = vunpack.c.l.bf16 %v349_v27 }
 0x103   : > { %4905 = vmatpush.bf16.msra.mxu0 %v7748_v12  ;;  %v769_v63 = vmul.f32 0.007873535, %v577_v45  ;;  %v1007_v21 = vunpack.c.l.bf16 %v851_v4  ;;  %v1008_v22 = vunpack.c.h.bf16 %v851_v4  ;;  %v486_v4 = vunpack.c.h.bf16 %v350_v60 }
 0x104   : > { %4924 = vmatpush.bf16.msra.mxu1 %v7756_v5  ;;  %v4591_v6 = vpop.f32.mrf.mxu3  ;;  %v4603_v7 = vpop.f32.mrf.mxu0 }
 0x105   : > { %4943 = vmatpush.bf16.msra.mxu2 %v7764_v2  ;;  %v4572_v2 = vpop.f32.mrf.mxu2  ;;  %v4604_v11 = vadd.f32 %v4603_v7, %v9038_v24  ;;  %v4622_v12 = vpop.f32.mrf.mxu1  ;;  %v9168_v24 = vpack.c.bf16 %v770_v1, %v769_v63  ;;  %v9190_v34 = vadd.f32 -1.0, %v1007_v21  ;;  %v9192_v36 = vadd.f32 -1.0, %v1008_v22  ;;  %v7797_v7 = vld [vmem:[%s9981_s1 + $0x788] sm:$0xff] }
 0x106   : > { %4962 = vmatpush.bf16.msra.mxu3 %v7772_v15  ;;  %v4573_v5 = vadd.f32 %v4572_v2, %v4554_v47  ;;  %v7800_v15 = vld [vmem:[%s9981_s1 + $0x7a0] sm:$0xff]  ;;  %4906 = vmatmul.bf16.vlgmr.msra.gmra.mxu0 %v1295_v13  ;;  %v484_v47 = vunpack.c.h.bf16 %v349_v27  ;;  %v438_v1 = vunpack.c.h.bf16 %v326_v40  ;;  %v675_v2 = vmul.f32 0.007873535, %v483_v46  ;;  %v7843_v46 = vld [vmem:[%s9981_s1 + $0x8f8] sm:$0xff] }
 0x107   : > { %4974 = vmatpush.bf16.msrb.mxu0 %v7787_v18  ;;  %v9166_v18 = vpack.c.bf16 %v722_v62, %v721_v61  ;;  %v4623_v19 = vadd.f32 %v4622_v12, %v4604_v11  ;;  %v1057_v30 = vunpack.c.l.bf16 %v9168_v24  ;;  %v1058_v52 = vunpack.c.h.bf16 %v9168_v24  ;;  %v7806_v61 = vld [vmem:[%s9981_s1 + $0x7d0] sm:$0xff]  ;;  %v7789_v11 = vld [vmem:[%s9981_s1 + $0x748] sm:$0xff]  ;;  %v7796_v27 = vld [vmem:[%s9981_s1 + $0x780] sm:$0xff] }
 0x108   : > { %4993 = vmatpush.bf16.msrb.mxu1 %v7795_v10  ;;  %v875_v10 = vpack.c.bf16 %v768_v56, %v767_v55  ;;  %v9158_v16 = vadd.f32 %v4591_v6, %v4573_v5  ;;  %4944 = vmatmul.bf16.vlgmr.msra.gmra.mxu2 %v1297_v9  ;;  %v7782_v56 = vld [vmem:[%s9981_s1 + $0x710] sm:$0xff]  ;;  %v676_v13 = vmul.f32 0.007873535, %v484_v47 }
 0x109   : > { %5012 = vmatpush.bf16.msrb.mxu2 %v7803_v8  ;;  %v1296_v8 = vpack.c.bf16 %v5847_v48, %v9106_v29  ;;  %v7792_v29 = vld [vmem:[%s9981_s1 + $0x760] sm:$0xff]  ;;  %4963 = vmatmul.bf16.vlgmr.msra.gmra.mxu3 %v1298_v14  ;;  %v1009_v28 = vunpack.c.l.bf16 %v9166_v18  ;;  %v1010_v51 = vunpack.c.h.bf16 %v9166_v18  ;;  %v5945_v6 = vadd.f32 -1.0, %v1058_v52  ;;  %v7834_v52 = vld [vmem:[%s9981_s1 + $0x8b0] sm:$0xff] }
 0x10a   : > { %5031 = vmatpush.bf16.msrb.mxu3 %v7811_v23  ;;  %v1055_v23 = vunpack.c.l.bf16 %v875_v10  ;;  %v1056_v25 = vunpack.c.h.bf16 %v875_v10  ;;  %v7781_v10 = vld [vmem:[%s9981_s1 + $0x708] sm:$0xff]  ;;  %v630_v18 = vmul.f32 0.007873535, %v438_v1  ;;  %v829_v21 = vpack.c.bf16 %v676_v13, %v675_v2 }
 0x10b   : > { %4975 = vmatpush.bf16.msrb.mxu0 %v7786_v43  ;;  %4925 = vmatmul.bf16.vlgmr.msra.gmra.mxu1 %v1296_v8  ;;  %v5896_v55 = vadd.f32 -1.0, %v1009_v28  ;;  %v5897_v5 = vadd.f32 -1.0, %v1010_v51 }
 0x10c   : > { %4994 = vmatpush.bf16.msrb.mxu1 %v7794_v33  ;;  %v4660_v43 = vpop.f32.mrf.mxu3  ;;  %v4605_v44 = vpop.f32.mrf.mxu0  ;;  %v9200_v45 = vadd.f32 -1.0, %v1055_v23  ;;  %v678_v23 = vmul.f32 0.007873535, %v486_v4 }
 0x10d   : > { %5013 = vmatpush.bf16.msrb.mxu2 %v7802_v35  ;;  %v325_v35 = vld [vmem:[%s9980_s0 + $0x70] sm:$0xff]  ;;  %v4641_v33 = vpop.f32.mrf.mxu2  ;;  %v4606_v48 = vadd.f32 %v4605_v44, %v9071_v0  ;;  %v5944_v0 = vadd.f32 -1.0, %v1057_v30  ;;  %v7780_v30 = vld [vmem:[%s9981_s1 + $0x700] sm:$0xff] }
 0x10e   : > { %5032 = vmatpush.bf16.msrb.mxu3 %v7810_v50  ;;  %v435_v38 = vunpack.c.l.bf16 %v325_v35  ;;  %v436_v39 = vunpack.c.h.bf16 %v325_v35  ;;  %v4642_v41 = vadd.f32 %v4641_v33, %v4623_v19  ;;  %v4624_v50 = vpop.f32.mrf.mxu1  ;;  %v1343_v8 = vpack.c.bf16 %v9200_v45, %v9190_v34  ;;  %v397_v44 = vld [vmem:[%s9980_s0 + $0x2b0] sm:$0xff] }
 0x10f   : > { %4976 = vmatpush.bf16.msrb.mxu0 %v7785_v59  ;;  %v4625_v59 = vadd.f32 %v4624_v50, %v4606_v48  ;;  %v1345_v14 = vpack.c.bf16 %v5944_v0, %v5896_v55  ;;  %v964_v45 = vunpack.c.h.bf16 %v829_v21  ;;  %v374_v55 = vld [vmem:[%s9980_s0 + $0x1f8] sm:$0xff] }
 0x110   : > { %4995 = vmatpush.bf16.msrb.mxu1 %v7793_v54  ;;  %v9213_v54 = vadd.f32 %v4660_v43, %v4642_v41  ;;  %v627_v62 = vmul.f32 0.007873535, %v435_v38  ;;  %v628_v63 = vmul.f32 0.007873535, %v436_v39  ;;  %v963_v38 = vunpack.c.l.bf16 %v829_v21  ;;  %v7819_v41 = vld [vmem:[%s9981_s1 + $0x838] sm:$0xff] }
 0x111   : > { %5014 = vmatpush.bf16.msrb.mxu2 %v7801_v49  ;;  %v9203_v49 = vadd.f32 -1.0, %v1056_v25  ;;  %v7827_v43 = vld [vmem:[%s9981_s1 + $0x878] sm:$0xff]  ;;  %v5851_v13 = vadd.f32 -1.0, %v964_v45 }
 0x112   : > { %5033 = vmatpush.bf16.msrb.mxu3 %v7809_v3  ;;  %v485_v3 = vunpack.c.l.bf16 %v350_v60  ;;  %v580_v60 = vunpack.c.h.bf16 %v397_v44 }
 0x113   : > { %4977 = vmatpush.bf16.msrb.mxu0 %v7784_v17  ;;  %v1344_v9 = vpack.c.bf16 %v9203_v49, %v9192_v36  ;;  %v805_v17 = vpack.c.bf16 %v628_v63, %v627_v62  ;;  %v7835_v36 = vld [vmem:[%s9981_s1 + $0x8b8] sm:$0xff]  ;;  %v7818_v62 = vld [vmem:[%s9981_s1 + $0x830] sm:$0xff] }
 0x114   : > { %4996 = vmatpush.bf16.msrb.mxu1 %v7792_v29  ;;  %v629_v29 = vmul.f32 0.007873535, %v437_v58  ;;  %v4662_v19 = vpop.f32.mrf.mxu3  ;;  %v677_v22 = vmul.f32 0.007873535, %v485_v3  ;;  %v9283_v58 = vadd.f32 -1.0, %v963_v38  ;;  %v7826_v63 = vld [vmem:[%s9981_s1 + $0x870] sm:$0xff] }
 0x115   : > { %5015 = vmatpush.bf16.msrb.mxu2 %v7800_v15  ;;  %v4643_v12 = vpop.f32.mrf.mxu2  ;;  %v7805_v15 = vld [vmem:[%s9981_s1 + $0x7c8] sm:$0xff]  ;;  %v915_v33 = vunpack.c.l.bf16 %v805_v17  ;;  %v916_v34 = vunpack.c.h.bf16 %v805_v17 }
 0x116   : > { %5034 = vmatpush.bf16.msrb.mxu3 %v7808_v20  ;;  %v4644_v24 = vadd.f32 %v4643_v12, %v4625_v59  ;;  %v4608_v20 = vpop.f32.mrf.mxu0  ;;  %v4627_v25 = vpop.f32.mrf.mxu1  ;;  %4911 = vmatmul.bf16.gmra.mxu0 %v1343_v8  ;;  %v806_v39 = vpack.c.bf16 %v630_v18, %v629_v29  ;;  %v830_v40 = vpack.c.bf16 %v678_v23, %v677_v22  ;;  %v7817_v18 = vld [vmem:[%s9981_s1 + $0x828] sm:$0xff] }
 0x117   : > { %4978 = vmatpush.bf16.msrb.mxu0 %v7783_v31  ;;  %v4609_v35 = vadd.f32 %v4608_v20, %v9131_v42  ;;  %v7788_v31 = vld [vmem:[%s9981_s1 + $0x740] sm:$0xff]  ;;  %v9273_v49 = vadd.f32 -1.0, %v915_v33  ;;  %v9275_v51 = vadd.f32 -1.0, %v916_v34  ;;  %v7841_v23 = vld [vmem:[%s9981_s1 + $0x8e8] sm:$0xff] }
 0x118   : > { %4997 = vmatpush.bf16.msrb.mxu1 %v7791_v32  ;;  %v9244_v28 = vadd.f32 %v4662_v19, %v4644_v24  ;;  %v7804_v32 = vld [vmem:[%s9981_s1 + $0x7c0] sm:$0xff]  ;;  %4949 = vmatmul.bf16.gmra.mxu2 %v1345_v14  ;;  %v917_v59 = vunpack.c.l.bf16 %v806_v39  ;;  %v918_v3 = vunpack.c.h.bf16 %v806_v39  ;;  %v966_v4 = vunpack.c.h.bf16 %v830_v40  ;;  %v7825_v24 = vld [vmem:[%s9981_s1 + $0x868] sm:$0xff] }
 0x119   : > { %5016 = vmatpush.bf16.msrb.mxu2 %v7799_v26  ;;  %v1346_v26 = vpack.c.bf16 %v5945_v6, %v5897_v5  ;;  %v4628_v42 = vadd.f32 %v4627_v25, %v4609_v35  ;;  %v7842_v5 = vld [vmem:[%s9981_s1 + $0x8f0] sm:$0xff]  ;;  %v398_v6 = vld [vmem:[%s9980_s0 + $0x2b8] sm:$0xff]  ;;  %v772_v14 = vmul.f32 0.007873535, %v580_v60  ;;  %v1299_v35 = vpack.c.bf16 %v9283_v58, %v9273_v49  ;;  %v327_v60 = vld [vmem:[%s9980_s0 + $0x80] sm:$0xff] }
 0x11a   : > { %5035 = vmatpush.bf16.msrb.mxu3 %v7807_v37  ;;  %v373_v37 = vld [vmem:[%s9980_s0 + $0x1f0] sm:$0xff]  ;;  %v5804_v17 = vadd.f32 -1.0, %v917_v59  ;;  %v581_v19 = vunpack.c.l.bf16 %v398_v6  ;;  %v582_v20 = vunpack.c.h.bf16 %v398_v6  ;;  %v5805_v21 = vadd.f32 -1.0, %v918_v3  ;;  %v7823_v59 = vld [vmem:[%s9981_s1 + $0x858] sm:$0xff] }
 0x11b   : > { %4979 = vmatpush.bf16.msrb.mxu0 %v7782_v56  ;;  %4930 = vmatmul.bf16.gmra.mxu1 %v1344_v9  ;;  %v531_v47 = vunpack.c.l.bf16 %v373_v37  ;;  %v532_v48 = vunpack.c.h.bf16 %v373_v37  ;;  %v5853_v22 = vadd.f32 -1.0, %v966_v4  ;;  %v439_v3 = vunpack.c.l.bf16 %v327_v60 }
 0x11c   : > { %4998 = vmatpush.bf16.msrb.mxu1 %v7790_v57  ;;  %4968 = vmatmul.bf16.gmra.mxu3 %v1346_v26  ;;  %v4665_v56 = vpop.f32.mrf.mxu3  ;;  %v773_v38 = vmul.f32 0.007873535, %v581_v19  ;;  %v774_v39 = vmul.f32 0.007873535, %v582_v20  ;;  %v440_v4 = vunpack.c.h.bf16 %v327_v60  ;;  %v7822_v19 = vld [vmem:[%s9981_s1 + $0x850] sm:$0xff] }
 0x11d   : > { %5017 = vmatpush.bf16.msrb.mxu2 %v7798_v53  ;;  %v4646_v50 = vpop.f32.mrf.mxu2  ;;  %v579_v53 = vunpack.c.l.bf16 %v397_v44  ;;  %v723_v8 = vmul.f32 0.007873535, %v531_v47  ;;  %v724_v9 = vmul.f32 0.007873535, %v532_v48  ;;  %v7816_v44 = vld [vmem:[%s9981_s1 + $0x820] sm:$0xff] }
 0x11e   : > { %5036 = vmatpush.bf16.msrb.mxu3 %v7806_v61  ;;  %v4647_v0 = vadd.f32 %v4646_v50, %v4628_v42  ;;  %v4610_v57 = vpop.f32.mrf.mxu0  ;;  %v965_v61 = vunpack.c.l.bf16 %v830_v40  ;;  %v4629_v2 = vpop.f32.mrf.mxu1  ;;  %v7840_v47 = vld [vmem:[%s9981_s1 + $0x8e0] sm:$0xff] }
 0x11f   : > { %4980 = vmatpush.bf16.msrb.mxu0 %v7781_v10  ;;  %v4611_v1 = vadd.f32 %v4610_v57, %v9158_v16  ;;  %v533_v10 = vunpack.c.l.bf16 %v374_v55  ;;  %v7833_v16 = vld [vmem:[%s9981_s1 + $0x8a8] sm:$0xff]  ;;  %v771_v12 = vmul.f32 0.007873535, %v579_v53  ;;  %v853_v25 = vpack.c.bf16 %v724_v9, %v723_v8 }
 0x120   : > { %4999 = vmatpush.bf16.msrb.mxu1 %v7789_v11  ;;  %v5852_v29 = vadd.f32 -1.0, %v965_v61  ;;  %v878_v53 = vpack.c.bf16 %v774_v39, %v773_v38  ;;  %v7839_v61 = vld [vmem:[%s9981_s1 + $0x8d8] sm:$0xff]  ;;  %v7837_v38 = vld [vmem:[%s9981_s1 + $0x8c8] sm:$0xff] }
 0x121   : > { %5018 = vmatpush.bf16.msrb.mxu2 %v7797_v7  ;;  %v9298_v7 = vadd.f32 %v4665_v56, %v4647_v0  ;;  %v4630_v11 = vadd.f32 %v4629_v2, %v4611_v1  ;;  %v725_v42 = vmul.f32 0.007873535, %v533_v10  ;;  %v1011_v48 = vunpack.c.l.bf16 %v853_v25  ;;  %v351_v0 = vld [vmem:[%s9980_s0 + $0x140] sm:$0xff] }
 0x122   : > { %5037 = vmatpush.bf16.msrb.mxu3 %v7805_v15  ;;  %v534_v15 = vunpack.c.h.bf16 %v374_v55  ;;  %v1301_v37 = vpack.c.bf16 %v5852_v29, %v5804_v17  ;;  %v1012_v50 = vunpack.c.h.bf16 %v853_v25  ;;  %v7815_v55 = vld [vmem:[%s9981_s1 + $0x818] sm:$0xff]  ;;  %v1061_v10 = vunpack.c.l.bf16 %v878_v53  ;;  %v7814_v29 = vld [vmem:[%s9981_s1 + $0x810] sm:$0xff]  ;;  %v7829_v25 = vld [vmem:[%s9981_s1 + $0x888] sm:$0xff] }
 0x123   : > { %4981 = vmatpush.bf16.msrb.mxu0 %v7780_v30  ;;  %v7832_v30 = vld [vmem:[%s9981_s1 + $0x8a0] sm:$0xff]  ;;  %v9345_v56 = vadd.f32 -1.0, %v1011_v48  ;;  %v1062_v17 = vunpack.c.h.bf16 %v878_v53 }
 0x124   : > { %5000 = vmatpush.bf16.msrb.mxu1 %v7788_v31  ;;  %v9318_v31 = vpack.c.bf16 %v772_v14, %v771_v12  ;;  %v4667_v34 = vpop.f32.mrf.mxu3  ;;  %v9348_v58 = vadd.f32 -1.0, %v1012_v50 }
 0x125   : > { %5019 = vmatpush.bf16.msrb.mxu2 %v7796_v27  ;;  %v4648_v26 = vpop.f32.mrf.mxu2  ;;  %v1300_v27 = vpack.c.bf16 %v5851_v13, %v9275_v51  ;;  %v7830_v13 = vld [vmem:[%s9981_s1 + $0x890] sm:$0xff] }
 0x126   : > { %5038 = vmatpush.bf16.msrb.mxu3 %v7804_v32  ;;  %v726_v32 = vmul.f32 0.007873535, %v534_v15  ;;  %v4649_v33 = vadd.f32 %v4648_v26, %v4630_v11  ;;  %4982 = vmatmul.bf16.vlgmr.msrb.gmra.mxu0 %v1299_v35  ;;  %v1059_v49 = vunpack.c.l.bf16 %v9318_v31  ;;  %v1060_v57 = vunpack.c.h.bf16 %v9318_v31 }
 0x127   : > { %5050 = vmatpush.bf16.msra.mxu0 %v7819_v41  ;;  %v4698_v41 = vpop.f32.mrf.mxu1  ;;  %v487_v11 = vunpack.c.l.bf16 %v351_v0  ;;  %v631_v26 = vmul.f32 0.007873535, %v439_v3  ;;  %v5948_v31 = vadd.f32 -1.0, %v1061_v10 }
 0x128   : > { %5069 = vmatpush.bf16.msra.mxu1 %v7827_v43  ;;  %v1302_v43 = vpack.c.bf16 %v5853_v22, %v5805_v21  ;;  %v9324_v45 = vadd.f32 %v4667_v34, %v4649_v33  ;;  %v854_v51 = vpack.c.bf16 %v726_v32, %v725_v42  ;;  %5020 = vmatmul.bf16.vlgmr.msrb.gmra.mxu2 %v1301_v37  ;;  %v9359_v1 = vadd.f32 -1.0, %v1059_v49  ;;  %v7821_v37 = vld [vmem:[%s9981_s1 + $0x848] sm:$0xff] }
 0x129   : > { %5088 = vmatpush.bf16.msra.mxu2 %v7835_v36  ;;  %v4679_v36 = vpop.f32.mrf.mxu0  ;;  %v5947_v35 = vadd.f32 -1.0, %v1060_v57  ;;  %v679_v42 = vmul.f32 0.007873535, %v487_v11  ;;  %v5949_v34 = vadd.f32 -1.0, %v1062_v17  ;;  %v7850_v17 = vld [vmem:[%s9981_s1 + $0x930] sm:$0xff] }
 0x12a   : > { %5107 = vmatpush.bf16.msra.mxu3 %v7843_v46  ;;  %v4680_v40 = vadd.f32 %v4679_v36, %v9213_v54  ;;  %v7824_v46 = vld [vmem:[%s9981_s1 + $0x860] sm:$0xff]  ;;  %v1013_v2 = vunpack.c.l.bf16 %v854_v51  ;;  %v1014_v15 = vunpack.c.h.bf16 %v854_v51  ;;  %v7813_v36 = vld [vmem:[%s9981_s1 + $0x808] sm:$0xff] }
 0x12b   : > { %5051 = vmatpush.bf16.msra.mxu0 %v7818_v62  ;;  %5001 = vmatmul.bf16.vlgmr.msrb.gmra.mxu1 %v1300_v27  ;;  %v328_v62 = vld [vmem:[%s9980_s0 + $0x88] sm:$0xff]  ;;  %v632_v27 = vmul.f32 0.007873535, %v440_v4  ;;  %v1348_v51 = vpack.c.bf16 %v5947_v35, %v9348_v58  ;;  %v7836_v58 = vld [vmem:[%s9981_s1 + $0x8c0] sm:$0xff]  ;;  %v7859_v4 = vld [vmem:[%s9981_s1 + $0x978] sm:$0xff] }
 0x12c   : > { %5070 = vmatpush.bf16.msra.mxu1 %v7826_v63  ;;  %v4699_v54 = vadd.f32 %v4698_v41, %v4680_v40  ;;  %5039 = vmatmul.bf16.vlgmr.msrb.gmra.mxu3 %v1302_v43  ;;  %v4736_v8 = vpop.f32.mrf.mxu3  ;;  %v442_v20 = vunpack.c.h.bf16 %v328_v62  ;;  %v5901_v33 = vadd.f32 -1.0, %v1014_v15  ;;  %v7866_v15 = vld [vmem:[%s9981_s1 + $0x9b0] sm:$0xff] }
 0x12d   : > { %5089 = vmatpush.bf16.msra.mxu2 %v7834_v52  ;;  %v7831_v52 = vld [vmem:[%s9981_s1 + $0x898] sm:$0xff]  ;;  %v4717_v63 = vpop.f32.mrf.mxu2  ;;  %v807_v48 = vpack.c.bf16 %v632_v27, %v631_v26  ;;  %v7874_v35 = vld [vmem:[%s9981_s1 + $0x9f0] sm:$0xff] }
 0x12e   : > { %5108 = vmatpush.bf16.msra.mxu3 %v7842_v5  ;;  %v352_v5 = vld [vmem:[%s9980_s0 + $0x148] sm:$0xff]  ;;  %v4718_v6 = vadd.f32 %v4717_v63, %v4699_v54  ;;  %v634_v40 = vmul.f32 0.007873535, %v442_v20 }
 0x12f   : > { %5052 = vmatpush.bf16.msra.mxu0 %v7817_v18  ;;  %v4700_v14 = vpop.f32.mrf.mxu1  ;;  %v441_v18 = vunpack.c.l.bf16 %v328_v62  ;;  %v489_v21 = vunpack.c.l.bf16 %v352_v5  ;;  %v490_v22 = vunpack.c.h.bf16 %v352_v5  ;;  %v919_v63 = vunpack.c.l.bf16 %v807_v48  ;;  %v7875_v5 = vld [vmem:[%s9981_s1 + $0x9f8] sm:$0xff] }
 0x130   : > { %5071 = vmatpush.bf16.msra.mxu1 %v7825_v24  ;;  %v9371_v24 = vadd.f32 %v4736_v8, %v4718_v6  ;;  %v375_v6 = vld [vmem:[%s9980_s0 + $0x200] sm:$0xff] }
 0x131   : > { %5090 = vmatpush.bf16.msra.mxu2 %v7833_v16  ;;  %v4681_v9 = vpop.f32.mrf.mxu0  ;;  %v488_v16 = vunpack.c.h.bf16 %v351_v0  ;;  %v633_v39 = vmul.f32 0.007873535, %v441_v18  ;;  %v681_v41 = vmul.f32 0.007873535, %v489_v21  ;;  %v682_v43 = vmul.f32 0.007873535, %v490_v22 }
 0x132   : > { %5109 = vmatpush.bf16.msra.mxu3 %v7841_v23  ;;  %v4682_v12 = vadd.f32 %v4681_v9, %v9244_v28  ;;  %v7838_v28 = vld [vmem:[%s9981_s1 + $0x8d0] sm:$0xff]  ;;  %v1350_v0 = vpack.c.bf16 %v5949_v34, %v5901_v33  ;;  %v399_v9 = vld [vmem:[%s9980_s0 + $0x2c0] sm:$0xff]  ;;  %v536_v18 = vunpack.c.h.bf16 %v375_v6  ;;  %v400_v33 = vld [vmem:[%s9980_s0 + $0x2c8] sm:$0xff] }
 0x133   : > { %5053 = vmatpush.bf16.msra.mxu0 %v7816_v44  ;;  %v680_v32 = vmul.f32 0.007873535, %v488_v16  ;;  %v584_v26 = vunpack.c.h.bf16 %v399_v9 }
 0x134   : > { %5072 = vmatpush.bf16.msra.mxu1 %v7824_v46  ;;  %v4701_v23 = vadd.f32 %v4700_v14, %v4682_v12  ;;  %v1347_v46 = vpack.c.bf16 %v9359_v1, %v9345_v56  ;;  %v4738_v54 = vpop.f32.mrf.mxu3  ;;  %v7812_v56 = vld [vmem:[%s9981_s1 + $0x800] sm:$0xff]  ;;  %v920_v1 = vunpack.c.h.bf16 %v807_v48  ;;  %v9433_v12 = vadd.f32 -1.0, %v919_v63 }
 0x135   : > { %5091 = vmatpush.bf16.msra.mxu2 %v7832_v30  ;;  %v5900_v30 = vadd.f32 -1.0, %v1013_v2  ;;  %v4719_v44 = vpop.f32.mrf.mxu2  ;;  %v831_v53 = vpack.c.bf16 %v680_v32, %v679_v42  ;;  %v7867_v2 = vld [vmem:[%s9981_s1 + $0x9b8] sm:$0xff] }
 0x136   : > { %5110 = vmatpush.bf16.msra.mxu3 %v7840_v47  ;;  %v7828_v47 = vld [vmem:[%s9981_s1 + $0x880] sm:$0xff]  ;;  %v4720_v50 = vadd.f32 %v4719_v44, %v4701_v23  ;;  %4987 = vmatmul.bf16.gmra.mxu0 %v1347_v46  ;;  %v9435_v14 = vadd.f32 -1.0, %v920_v1  ;;  %v7858_v23 = vld [vmem:[%s9981_s1 + $0x970] sm:$0xff]  ;;  %v7857_v46 = vld [vmem:[%s9981_s1 + $0x968] sm:$0xff] }
 0x137   : > { %5054 = vmatpush.bf16.msra.mxu0 %v7815_v55  ;;  %v4703_v55 = vpop.f32.mrf.mxu1  ;;  %v967_v3 = vunpack.c.l.bf16 %v831_v53  ;;  %v968_v8 = vunpack.c.h.bf16 %v831_v53 }
 0x138   : > { %5073 = vmatpush.bf16.msra.mxu1 %v7823_v59  ;;  %v9401_v57 = vadd.f32 %v4738_v54, %v4720_v50  ;;  %v7820_v59 = vld [vmem:[%s9981_s1 + $0x840] sm:$0xff]  ;;  %v776_v50 = vmul.f32 0.007873535, %v584_v26  ;;  %v585_v54 = vunpack.c.l.bf16 %v400_v33 }
 0x139   : > { %5092 = vmatpush.bf16.msra.mxu2 %v7831_v52  ;;  %v4684_v49 = vpop.f32.mrf.mxu0  ;;  %v1349_v52 = vpack.c.bf16 %v5948_v31, %v5900_v30  ;;  %v5854_v22 = vadd.f32 -1.0, %v967_v3  ;;  %v5855_v31 = vadd.f32 -1.0, %v968_v8 }
 0x13a   : > { %5111 = vmatpush.bf16.msra.mxu3 %v7839_v61  ;;  %v4685_v60 = vadd.f32 %v4684_v49, %v9298_v7  ;;  %v9409_v7 = vpack.c.bf16 %v634_v40, %v633_v39  ;;  %v9411_v61 = vpack.c.bf16 %v682_v43, %v681_v41  ;;  %v7849_v40 = vld [vmem:[%s9981_s1 + $0x928] sm:$0xff]  ;;  %v728_v43 = vmul.f32 0.007873535, %v536_v18  ;;  %v353_v18 = vld [vmem:[%s9980_s0 + $0x150] sm:$0xff] }
 0x13b   : > { %5055 = vmatpush.bf16.msra.mxu0 %v7814_v29  ;;  %5006 = vmatmul.bf16.gmra.mxu1 %v1348_v51  ;;  %v535_v29 = vunpack.c.l.bf16 %v375_v6  ;;  %v586_v49 = vunpack.c.h.bf16 %v400_v33  ;;  %v1303_v53 = vpack.c.bf16 %v5854_v22, %v9433_v12  ;;  %v7848_v6 = vld [vmem:[%s9981_s1 + $0x920] sm:$0xff]  ;;  %v7863_v12 = vld [vmem:[%s9981_s1 + $0x998] sm:$0xff] }
 0x13c   : > { %5074 = vmatpush.bf16.msra.mxu1 %v7822_v19  ;;  %v4704_v62 = vadd.f32 %v4703_v55, %v4685_v60  ;;  %5025 = vmatmul.bf16.gmra.mxu2 %v1349_v52  ;;  %v921_v10 = vunpack.c.l.bf16 %v9409_v7  ;;  %v969_v11 = vunpack.c.l.bf16 %v9411_v61  ;;  %v376_v19 = vld [vmem:[%s9980_s0 + $0x208] sm:$0xff]  ;;  %v4741_v20 = vpop.f32.mrf.mxu3  ;;  %v922_v42 = vunpack.c.h.bf16 %v9409_v7 }
 0x13d   : > { %5093 = vmatpush.bf16.msra.mxu2 %v7830_v13  ;;  %v7851_v13 = vld [vmem:[%s9981_s1 + $0x938] sm:$0xff]  ;;  %5044 = vmatmul.bf16.gmra.mxu3 %v1350_v0  ;;  %v4722_v16 = vpop.f32.mrf.mxu2  ;;  %v970_v32 = vunpack.c.h.bf16 %v9411_v61  ;;  %v727_v41 = vmul.f32 0.007873535, %v535_v29  ;;  %v538_v44 = vunpack.c.h.bf16 %v376_v19  ;;  %v1304_v60 = vpack.c.bf16 %v5855_v31, %v9435_v14  ;;  %v329_v14 = vld [vmem:[%s9980_s0 + $0x90] sm:$0xff] }
 0x13e   : > { %5112 = vmatpush.bf16.msra.mxu3 %v7838_v28  ;;  %v4723_v28 = vadd.f32 %v4722_v16, %v4704_v62  ;;  %v5809_v51 = vadd.f32 -1.0, %v922_v42  ;;  %v443_v22 = vunpack.c.l.bf16 %v329_v14  ;;  %v492_v31 = vunpack.c.h.bf16 %v353_v18  ;;  %v330_v42 = vld [vmem:[%s9980_s0 + $0x98] sm:$0xff] }
 0x13f   : > { %5056 = vmatpush.bf16.msra.mxu0 %v7813_v36  ;;  %v4705_v30 = vpop.f32.mrf.mxu1  ;;  %v5808_v36 = vadd.f32 -1.0, %v921_v10  ;;  %v5857_v52 = vadd.f32 -1.0, %v970_v32  ;;  %v730_v7 = vmul.f32 0.007873535, %v538_v44  ;;  %v7872_v10 = vld [vmem:[%s9981_s1 + $0x9e0] sm:$0xff] }
 0x140   : > { %5075 = vmatpush.bf16.msra.mxu1 %v7821_v37  ;;  %v9458_v34 = vadd.f32 %v4741_v20, %v4723_v28  ;;  %v5856_v37 = vadd.f32 -1.0, %v969_v11  ;;  %v7847_v28 = vld [vmem:[%s9981_s1 + $0x918] sm:$0xff] }
 0x141   : > { %5094 = vmatpush.bf16.msra.mxu2 %v7829_v25  ;;  %v4686_v21 = vpop.f32.mrf.mxu0  ;;  %v583_v25 = vunpack.c.l.bf16 %v399_v9  ;;  %v7856_v9 = vld [vmem:[%s9981_s1 + $0x960] sm:$0xff]  ;;  %v7855_v20 = vld [vmem:[%s9981_s1 + $0x958] sm:$0xff] }
 0x142   : > { %5113 = vmatpush.bf16.msra.mxu3 %v7837_v38  ;;  %v4687_v27 = vadd.f32 %v4686_v21, %v9324_v45  ;;  %v537_v38 = vunpack.c.l.bf16 %v376_v19  ;;  %v7865_v45 = vld [vmem:[%s9981_s1 + $0x9a8] sm:$0xff]  ;;  %v1305_v0 = vpack.c.bf16 %v5856_v37, %v5808_v36  ;;  %v7871_v21 = vld [vmem:[%s9981_s1 + $0x9d8] sm:$0xff] }
 0x143   : > { %5057 = vmatpush.bf16.msra.mxu0 %v7812_v56  ;;  %v775_v48 = vmul.f32 0.007873535, %v583_v25  ;;  %v7864_v56 = vld [vmem:[%s9981_s1 + $0x9a0] sm:$0xff] }
 0x144   : > { %5076 = vmatpush.bf16.msra.mxu1 %v7820_v59  ;;  %v4706_v39 = vadd.f32 %v4705_v30, %v4687_v27  ;;  %v855_v59 = vpack.c.bf16 %v728_v43, %v727_v41  ;;  %v4743_v62 = vpop.f32.mrf.mxu3  ;;  %v7862_v27 = vld [vmem:[%s9981_s1 + $0x990] sm:$0xff]  ;;  %v491_v30 = vunpack.c.l.bf16 %v353_v18 }
 0x145   : > { %5095 = vmatpush.bf16.msra.mxu2 %v7828_v47  ;;  %v7873_v47 = vld [vmem:[%s9981_s1 + $0x9e8] sm:$0xff]  ;;  %v4724_v55 = vpop.f32.mrf.mxu2  ;;  %v879_v1 = vpack.c.bf16 %v776_v50, %v775_v48  ;;  %v7870_v50 = vld [vmem:[%s9981_s1 + $0x9d0] sm:$0xff] }
 0x146   : > { %5114 = vmatpush.bf16.msra.mxu3 %v7836_v58  ;;  %v729_v58 = vmul.f32 0.007873535, %v537_v38  ;;  %v4725_v61 = vadd.f32 %v4724_v55, %v4706_v39  ;;  %5058 = vmatmul.bf16.vlgmr.msra.gmra.mxu0 %v1303_v53  ;;  %v1016_v16 = vunpack.c.h.bf16 %v855_v59  ;;  %v7861_v53 = vld [vmem:[%s9981_s1 + $0x988] sm:$0xff]  ;;  %v684_v55 = vmul.f32 0.007873535, %v492_v31 }
 0x147   : > { %5126 = vmatpush.bf16.msrb.mxu0 %v7851_v13  ;;  %v778_v13 = vmul.f32 0.007873535, %v586_v49  ;;  %v1064_v19 = vunpack.c.h.bf16 %v879_v1 }
 0x148   : > { %5145 = vmatpush.bf16.msrb.mxu1 %v7859_v4  ;;  %v4774_v4 = vpop.f32.mrf.mxu1  ;;  %v9481_v8 = vadd.f32 %v4743_v62, %v4725_v61  ;;  %v9509_v26 = vadd.f32 -1.0, %v1016_v16 }
 0x149   : > { %5164 = vmatpush.bf16.msrb.mxu2 %v7867_v2  ;;  %v4755_v63 = vpop.f32.mrf.mxu0  ;;  %v777_v2 = vmul.f32 0.007873535, %v585_v54  ;;  %v9520_v41 = vadd.f32 -1.0, %v1064_v19  ;;  %v635_v54 = vmul.f32 0.007873535, %v443_v22  ;;  %v7868_v22 = vld [vmem:[%s9981_s1 + $0x9c0] sm:$0xff] }
 0x14a   : > { %5183 = vmatpush.bf16.msrb.mxu3 %v7875_v5  ;;  %v4756_v3 = vadd.f32 %v4755_v63, %v9371_v24  ;;  %v1306_v5 = vpack.c.bf16 %v5857_v52, %v5809_v51  ;;  %v1015_v24 = vunpack.c.l.bf16 %v855_v59  ;;  %v445_v51 = vunpack.c.l.bf16 %v330_v42  ;;  %v7845_v63 = vld [vmem:[%s9981_s1 + $0x908] sm:$0xff] }
 0x14b   : > { %5127 = vmatpush.bf16.msrb.mxu0 %v7850_v17  ;;  %5077 = vmatmul.bf16.vlgmr.msra.gmra.mxu1 %v1304_v60  ;;  %v856_v17 = vpack.c.bf16 %v730_v7, %v729_v58  ;;  %v880_v29 = vpack.c.bf16 %v778_v13, %v777_v2  ;;  %v683_v60 = vmul.f32 0.007873535, %v491_v30  ;;  %v7853_v2 = vld [vmem:[%s9981_s1 + $0x948] sm:$0xff]  ;;  %v7883_v30 = vld [vmem:[%s9981_s1 + $0xa38] sm:$0xff] }
 0x14c   : > { %5146 = vmatpush.bf16.msrb.mxu1 %v7858_v23  ;;  %v4775_v11 = vadd.f32 %v4774_v4, %v4756_v3  ;;  %5096 = vmatmul.bf16.vlgmr.msra.gmra.mxu2 %v1305_v0  ;;  %v444_v23 = vunpack.c.h.bf16 %v329_v14  ;;  %v9507_v25 = vadd.f32 -1.0, %v1015_v24  ;;  %v4812_v33 = vpop.f32.mrf.mxu3  ;;  %v446_v0 = vunpack.c.h.bf16 %v330_v42  ;;  %v7869_v13 = vld [vmem:[%s9981_s1 + $0x9c8] sm:$0xff]  ;;  %v7891_v42 = vld [vmem:[%s9981_s1 + $0xa78] sm:$0xff] }
 0x14d   : > { %5165 = vmatpush.bf16.msrb.mxu2 %v7866_v15  ;;  %v1063_v15 = vunpack.c.l.bf16 %v879_v1  ;;  %5115 = vmatmul.bf16.vlgmr.msra.gmra.mxu3 %v1306_v5  ;;  %v1017_v38 = vunpack.c.l.bf16 %v856_v17  ;;  %v1065_v39 = vunpack.c.l.bf16 %v880_v29  ;;  %v1018_v43 = vunpack.c.h.bf16 %v856_v17 }
 0x14e   : > { %5184 = vmatpush.bf16.msrb.mxu3 %v7874_v35  ;;  %v4793_v35 = vpop.f32.mrf.mxu2  ;;  %v1066_v44 = vunpack.c.h.bf16 %v880_v29  ;;  %v636_v49 = vmul.f32 0.007873535, %v444_v23  ;;  %v1352_v5 = vpack.c.bf16 %v9520_v41, %v9509_v26 }
 0x14f   : > { %5128 = vmatpush.bf16.msrb.mxu0 %v7849_v40  ;;  %v4794_v32 = vadd.f32 %v4793_v35, %v4775_v11  ;;  %v9517_v37 = vadd.f32 -1.0, %v1063_v15  ;;  %v5952_v59 = vadd.f32 -1.0, %v1065_v39  ;;  %v5905_v61 = vadd.f32 -1.0, %v1018_v43 }
 0x150   : > { %5147 = vmatpush.bf16.msrb.mxu1 %v7857_v46  ;;  %v4776_v40 = vpop.f32.mrf.mxu1  ;;  %v7846_v46 = vld [vmem:[%s9981_s1 + $0x910] sm:$0xff]  ;;  %v5953_v62 = vadd.f32 -1.0, %v1066_v44  ;;  %v809_v3 = vpack.c.bf16 %v636_v49, %v635_v54  ;;  %v638_v11 = vmul.f32 0.007873535, %v446_v0 }
 0x151   : > { %5166 = vmatpush.bf16.msrb.mxu2 %v7865_v45  ;;  %v4757_v36 = vpop.f32.mrf.mxu0  ;;  %v9528_v48 = vadd.f32 %v4812_v33, %v4794_v32  ;;  %v1351_v1 = vpack.c.bf16 %v9517_v37, %v9507_v25  ;;  %v7907_v32 = vld [vmem:[%s9981_s1 + $0xaf8] sm:$0xff]  ;;  %v377_v33 = vld [vmem:[%s9980_s0 + $0x210] sm:$0xff] }
 0x152   : > { %5185 = vmatpush.bf16.msrb.mxu3 %v7873_v47  ;;  %v4758_v45 = vadd.f32 %v4757_v36, %v9401_v57  ;;  %v354_v47 = vld [vmem:[%s9980_s0 + $0x158] sm:$0xff]  ;;  %v7854_v57 = vld [vmem:[%s9981_s1 + $0x950] sm:$0xff]  ;;  %v1354_v19 = vpack.c.bf16 %v5953_v62, %v5905_v61  ;;  %v924_v23 = vunpack.c.h.bf16 %v809_v3 }
 0x153   : > { %5129 = vmatpush.bf16.msrb.mxu0 %v7848_v6  ;;  %v493_v58 = vunpack.c.l.bf16 %v354_v47  ;;  %v494_v7 = vunpack.c.h.bf16 %v354_v47  ;;  %v7860_v6 = vld [vmem:[%s9981_s1 + $0x980] sm:$0xff]  ;;  %v401_v36 = vld [vmem:[%s9980_s0 + $0x2d0] sm:$0xff]  ;;  %v539_v47 = vunpack.c.l.bf16 %v377_v33 }
 0x154   : > { %5148 = vmatpush.bf16.msrb.mxu1 %v7856_v9  ;;  %v4777_v52 = vadd.f32 %v4776_v40, %v4758_v45  ;;  %v9555_v9 = vpack.c.bf16 %v684_v55, %v683_v60  ;;  %v4814_v16 = vpop.f32.mrf.mxu3  ;;  %v9593_v39 = vadd.f32 -1.0, %v924_v23  ;;  %v378_v45 = vld [vmem:[%s9980_s0 + $0x218] sm:$0xff]  ;;  %v7898_v44 = vld [vmem:[%s9981_s1 + $0xab0] sm:$0xff]  ;;  %v587_v55 = vunpack.c.l.bf16 %v401_v36 }
 0x155   : > { %5167 = vmatpush.bf16.msrb.mxu2 %v7864_v56  ;;  %v5904_v56 = vadd.f32 -1.0, %v1017_v38  ;;  %v685_v15 = vmul.f32 0.007873535, %v493_v58  ;;  %v686_v17 = vmul.f32 0.007873535, %v494_v7  ;;  %v7906_v60 = vld [vmem:[%s9981_s1 + $0xaf0] sm:$0xff]  ;;  %v588_v0 = vunpack.c.h.bf16 %v401_v36 }
 0x156   : > { %5186 = vmatpush.bf16.msrb.mxu3 %v7872_v10  ;;  %v4795_v4 = vpop.f32.mrf.mxu2  ;;  %v637_v10 = vmul.f32 0.007873535, %v445_v51  ;;  %5063 = vmatmul.bf16.gmra.mxu0 %v1351_v1  ;;  %v971_v25 = vunpack.c.l.bf16 %v9555_v9  ;;  %v972_v38 = vunpack.c.h.bf16 %v9555_v9  ;;  %v541_v61 = vunpack.c.l.bf16 %v378_v45 }
 0x157   : > { %5130 = vmatpush.bf16.msrb.mxu0 %v7847_v28  ;;  %v4796_v24 = vadd.f32 %v4795_v4, %v4777_v52  ;;  %v1353_v14 = vpack.c.bf16 %v5952_v59, %v5904_v56  ;;  %v7844_v28 = vld [vmem:[%s9981_s1 + $0x900] sm:$0xff]  ;;  %v834_v31 = vpack.c.bf16 %v686_v17, %v685_v15  ;;  %v7897_v4 = vld [vmem:[%s9981_s1 + $0xaa8] sm:$0xff] }
 0x158   : > { %5149 = vmatpush.bf16.msrb.mxu1 %v7855_v20  ;;  %v4779_v18 = vpop.f32.mrf.mxu1  ;;  %v9570_v26 = vpack.c.bf16 %v638_v11, %v637_v10  ;;  %v9598_v41 = vadd.f32 -1.0, %v971_v25  ;;  %v7889_v11 = vld [vmem:[%s9981_s1 + $0xa68] sm:$0xff]  ;;  %v733_v17 = vmul.f32 0.007873535, %v541_v61 }
 0x159   : > { %5168 = vmatpush.bf16.msrb.mxu2 %v7863_v12  ;;  %v4760_v12 = vpop.f32.mrf.mxu0  ;;  %v9561_v20 = vadd.f32 %v4814_v16, %v4796_v24  ;;  %v973_v52 = vunpack.c.l.bf16 %v834_v31  ;;  %v974_v7 = vunpack.c.h.bf16 %v834_v31  ;;  %v7905_v24 = vld [vmem:[%s9981_s1 + $0xae8] sm:$0xff]  ;;  %v779_v16 = vmul.f32 0.007873535, %v587_v55 }
 0x15a   : > { %5187 = vmatpush.bf16.msrb.mxu3 %v7871_v21  ;;  %v4761_v29 = vadd.f32 %v4760_v12, %v9458_v34  ;;  %v7852_v21 = vld [vmem:[%s9981_s1 + $0x940] sm:$0xff]  ;;  %v923_v34 = vunpack.c.l.bf16 %v809_v3  ;;  %v925_v43 = vunpack.c.l.bf16 %v9570_v26  ;;  %v926_v58 = vunpack.c.h.bf16 %v9570_v26 }
 0x15b   : > { %5131 = vmatpush.bf16.msrb.mxu0 %v7846_v46  ;;  %5082 = vmatmul.bf16.gmra.mxu1 %v1352_v5  ;;  %v7882_v46 = vld [vmem:[%s9981_s1 + $0xa30] sm:$0xff]  ;;  %v5859_v3 = vadd.f32 -1.0, %v972_v38  ;;  %v731_v5 = vmul.f32 0.007873535, %v539_v47  ;;  %v5860_v10 = vadd.f32 -1.0, %v973_v52  ;;  %v780_v12 = vmul.f32 0.007873535, %v588_v0  ;;  %v7904_v38 = vld [vmem:[%s9981_s1 + $0xae0] sm:$0xff] }
 0x15c   : > { %5150 = vmatpush.bf16.msrb.mxu1 %v7854_v57  ;;  %v4780_v35 = vadd.f32 %v4779_v18, %v4761_v29  ;;  %5101 = vmatmul.bf16.gmra.mxu2 %v1353_v14  ;;  %v9590_v37 = vadd.f32 -1.0, %v923_v34  ;;  %v540_v57 = vunpack.c.h.bf16 %v377_v33  ;;  %v4817_v49 = vpop.f32.mrf.mxu3  ;;  %v5812_v9 = vadd.f32 -1.0, %v925_v43  ;;  %v7896_v34 = vld [vmem:[%s9981_s1 + $0xaa0] sm:$0xff]  ;;  %v7895_v43 = vld [vmem:[%s9981_s1 + $0xa98] sm:$0xff]  ;;  %v7894_v0 = vld [vmem:[%s9981_s1 + $0xa90] sm:$0xff] }
 0x15d   : > { %5169 = vmatpush.bf16.msrb.mxu2 %v7862_v27  ;;  %v7899_v27 = vld [vmem:[%s9981_s1 + $0xab8] sm:$0xff]  ;;  %5120 = vmatmul.bf16.gmra.mxu3 %v1354_v19  ;;  %v5813_v14 = vadd.f32 -1.0, %v926_v58  ;;  %v5861_v15 = vadd.f32 -1.0, %v974_v7  ;;  %v7880_v33 = vld [vmem:[%s9981_s1 + $0xa20] sm:$0xff]  ;;  %v332_v58 = vld [vmem:[%s9980_s0 + $0xa8] sm:$0xff] }
 0x15e   : > { %5188 = vmatpush.bf16.msrb.mxu3 %v7870_v50  ;;  %v4798_v40 = vpop.f32.mrf.mxu2  ;;  %v402_v50 = vld [vmem:[%s9980_s0 + $0x2d8] sm:$0xff] }
 0x15f   : > { %5132 = vmatpush.bf16.msrb.mxu0 %v7845_v63  ;;  %v4799_v54 = vadd.f32 %v4798_v40, %v4780_v35  ;;  %v542_v63 = vunpack.c.h.bf16 %v378_v45  ;;  %v589_v1 = vunpack.c.l.bf16 %v402_v50  ;;  %v7903_v52 = vld [vmem:[%s9981_s1 + $0xad8] sm:$0xff] }
 0x160   : > { %5151 = vmatpush.bf16.msrb.mxu1 %v7853_v2  ;;  %v4781_v59 = vpop.f32.mrf.mxu1  ;;  %v590_v2 = vunpack.c.h.bf16 %v402_v50  ;;  %v355_v50 = vld [vmem:[%s9980_s0 + $0x160] sm:$0xff] }
 0x161   : > { %5170 = vmatpush.bf16.msrb.mxu2 %v7861_v53  ;;  %v4762_v51 = vpop.f32.mrf.mxu0  ;;  %v7890_v53 = vld [vmem:[%s9981_s1 + $0xa70] sm:$0xff]  ;;  %v9618_v62 = vadd.f32 %v4817_v49, %v4799_v54  ;;  %v734_v29 = vmul.f32 0.007873535, %v542_v63  ;;  %v781_v18 = vmul.f32 0.007873535, %v589_v1 }
 0x162   : > { %5189 = vmatpush.bf16.msrb.mxu3 %v7869_v13  ;;  %v4763_v56 = vadd.f32 %v4762_v51, %v9481_v8  ;;  %v7881_v8 = vld [vmem:[%s9981_s1 + $0xa28] sm:$0xff]  ;;  %v782_v19 = vmul.f32 0.007873535, %v590_v2  ;;  %v7887_v51 = vld [vmem:[%s9981_s1 + $0xa58] sm:$0xff]  ;;  %v495_v2 = vunpack.c.l.bf16 %v355_v50 }
 0x163   : > { %5133 = vmatpush.bf16.msrb.mxu0 %v7844_v28 }
 0x164   : > { %5152 = vmatpush.bf16.msrb.mxu1 %v7852_v21  ;;  %v4782_v13 = vadd.f32 %v4781_v59, %v4763_v56  ;;  %v1307_v21 = vpack.c.bf16 %v9598_v41, %v9590_v37  ;;  %v4819_v25 = vpop.f32.mrf.mxu3  ;;  %v7888_v37 = vld [vmem:[%s9981_s1 + $0xa60] sm:$0xff]  ;;  %v9652_v45 = vpack.c.bf16 %v782_v19, %v781_v18  ;;  %v450_v19 = vunpack.c.h.bf16 %v332_v58 }
 0x165   : > { %5171 = vmatpush.bf16.msrb.mxu2 %v7860_v6  ;;  %v732_v6 = vmul.f32 0.007873535, %v540_v57  ;;  %v7879_v57 = vld [vmem:[%s9981_s1 + $0xa18] sm:$0xff] }
 0x166   : > { %5190 = vmatpush.bf16.msrb.mxu3 %v7868_v22  ;;  %v4800_v28 = vpop.f32.mrf.mxu2  ;;  %v1308_v22 = vpack.c.bf16 %v5859_v3, %v9593_v39  ;;  %v9650_v39 = vpack.c.bf16 %v734_v29, %v733_v17  ;;  %5134 = vmatmul.bf16.vlgmr.msrb.gmra.mxu0 %v1307_v21  ;;  %v1069_v49 = vunpack.c.l.bf16 %v9652_v45  ;;  %v7893_v17 = vld [vmem:[%s9981_s1 + $0xa88] sm:$0xff] }
 0x167   : > { %5202 = vmatpush.bf16.msra.mxu0 %v7883_v30  ;;  %v857_v23 = vpack.c.bf16 %v732_v6, %v731_v5  ;;  %v4801_v35 = vadd.f32 %v4800_v28, %v4782_v13  ;;  %v881_v30 = vpack.c.bf16 %v780_v12, %v779_v16  ;;  %v496_v13 = vunpack.c.h.bf16 %v355_v50  ;;  %v7886_v16 = vld [vmem:[%s9981_s1 + $0xa50] sm:$0xff]  ;;  %v7876_v50 = vld [vmem:[%s9981_s1 + $0xa00] sm:$0xff] }
 0x168   : > { %5221 = vmatpush.bf16.msra.mxu1 %v7891_v42  ;;  %v4850_v42 = vpop.f32.mrf.mxu1  ;;  %v1021_v54 = vunpack.c.l.bf16 %v9650_v39  ;;  %v1022_v5 = vunpack.c.h.bf16 %v9650_v39  ;;  %v1070_v6 = vunpack.c.h.bf16 %v9652_v45  ;;  %v7902_v12 = vld [vmem:[%s9981_s1 + $0xad0] sm:$0xff]  ;;  %v687_v28 = vmul.f32 0.007873535, %v495_v2 }
 0x169   : > { %5240 = vmatpush.bf16.msra.mxu2 %v7899_v27  ;;  %v4831_v26 = vpop.f32.mrf.mxu0  ;;  %v1309_v27 = vpack.c.bf16 %v5860_v10, %v5812_v9  ;;  %v9642_v36 = vadd.f32 %v4819_v25, %v4801_v35  ;;  %v1019_v40 = vunpack.c.l.bf16 %v857_v23  ;;  %v1020_v41 = vunpack.c.h.bf16 %v857_v23  ;;  %v7878_v9 = vld [vmem:[%s9981_s1 + $0xa10] sm:$0xff]  ;;  %v356_v10 = vld [vmem:[%s9980_s0 + $0x168] sm:$0xff] }
 0x16a   : > { %5259 = vmatpush.bf16.msra.mxu3 %v7907_v32  ;;  %v4832_v31 = vadd.f32 %v4831_v26, %v9528_v48  ;;  %v1310_v32 = vpack.c.bf16 %v5861_v15, %v5813_v14  ;;  %v1068_v47 = vunpack.c.h.bf16 %v881_v30  ;;  %v449_v14 = vunpack.c.l.bf16 %v332_v58  ;;  %v7877_v25 = vld [vmem:[%s9981_s1 + $0xa08] sm:$0xff]  ;;  %v7923_v58 = vld [vmem:[%s9981_s1 + $0xb78] sm:$0xff] }
 0x16b   : > { %5203 = vmatpush.bf16.msra.mxu0 %v7882_v46  ;;  %5153 = vmatmul.bf16.vlgmr.msrb.gmra.mxu1 %v1308_v22  ;;  %v331_v46 = vld [vmem:[%s9980_s0 + $0xa0] sm:$0xff]  ;;  %v9676_v55 = vadd.f32 -1.0, %v1020_v41  ;;  %v688_v21 = vmul.f32 0.007873535, %v496_v13  ;;  %v497_v22 = vunpack.c.l.bf16 %v356_v10  ;;  %v5909_v23 = vadd.f32 -1.0, %v1022_v5  ;;  %v7930_v5 = vld [vmem:[%s9981_s1 + $0xbb0] sm:$0xff] }
 0x16c   : > { %5222 = vmatpush.bf16.msra.mxu1 %v7890_v53  ;;  %v4851_v48 = vadd.f32 %v4850_v42, %v4832_v31  ;;  %5172 = vmatmul.bf16.vlgmr.msrb.gmra.mxu2 %v1309_v27  ;;  %v447_v56 = vunpack.c.l.bf16 %v331_v46  ;;  %v448_v59 = vunpack.c.h.bf16 %v331_v46  ;;  %v4888_v61 = vpop.f32.mrf.mxu3  ;;  %v5957_v35 = vadd.f32 -1.0, %v1070_v6  ;;  %v7901_v31 = vld [vmem:[%s9981_s1 + $0xac8] sm:$0xff]  ;;  %v7914_v6 = vld [vmem:[%s9981_s1 + $0xb30] sm:$0xff] }
 0x16d   : > { %5241 = vmatpush.bf16.msra.mxu2 %v7898_v44  ;;  %v1067_v44 = vunpack.c.l.bf16 %v881_v30  ;;  %5191 = vmatmul.bf16.vlgmr.msrb.gmra.mxu3 %v1310_v32  ;;  %v7885_v30 = vld [vmem:[%s9981_s1 + $0xa48] sm:$0xff]  ;;  %v642_v39 = vmul.f32 0.007873535, %v450_v19  ;;  %v9726_v41 = vpack.c.bf16 %v688_v21, %v687_v28 }
 0x16e   : > { %5260 = vmatpush.bf16.msra.mxu3 %v7906_v60  ;;  %v4869_v53 = vpop.f32.mrf.mxu2  ;;  %v9674_v60 = vadd.f32 -1.0, %v1019_v40  ;;  %v639_v29 = vmul.f32 0.007873535, %v447_v56  ;;  %v640_v18 = vmul.f32 0.007873535, %v448_v59 }
 0x16f   : > { %5204 = vmatpush.bf16.msra.mxu0 %v7881_v8  ;;  %v4870_v7 = vadd.f32 %v4869_v53, %v4851_v48  ;;  %v9684_v1 = vadd.f32 -1.0, %v1067_v44  ;;  %v9687_v8 = vadd.f32 -1.0, %v1068_v47  ;;  %v975_v56 = vunpack.c.l.bf16 %v9726_v41 }
 0x170   : > { %5223 = vmatpush.bf16.msra.mxu1 %v7889_v11 }
 0x171   : > { %5242 = vmatpush.bf16.msra.mxu2 %v7897_v4  ;;  %v4833_v63 = vpop.f32.mrf.mxu0  ;;  %v4852_v4 = vpop.f32.mrf.mxu1  ;;  %v9697_v11 = vadd.f32 %v4888_v61, %v4870_v7  ;;  %v1355_v26 = vpack.c.bf16 %v9684_v1, %v9674_v60  ;;  %v1356_v27 = vpack.c.bf16 %v9687_v8, %v9676_v55  ;;  %v7931_v60 = vld [vmem:[%s9981_s1 + $0xbb8] sm:$0xff]  ;;  %v403_v61 = vld [vmem:[%s9980_s0 + $0x2e0] sm:$0xff] }
 0x172   : > { %5261 = vmatpush.bf16.msra.mxu3 %v7905_v24  ;;  %v4834_v3 = vadd.f32 %v4833_v63, %v9561_v20  ;;  %v5908_v24 = vadd.f32 -1.0, %v1021_v54  ;;  %v5956_v20 = vadd.f32 -1.0, %v1069_v49  ;;  %v7884_v49 = vld [vmem:[%s9981_s1 + $0xa40] sm:$0xff]  ;;  %v7915_v55 = vld [vmem:[%s9981_s1 + $0xb38] sm:$0xff]  ;;  %v591_v21 = vunpack.c.l.bf16 %v403_v61 }
 0x173   : > { %5205 = vmatpush.bf16.msra.mxu0 %v7880_v33  ;;  %v7892_v33 = vld [vmem:[%s9981_s1 + $0xa80] sm:$0xff]  ;;  %v7939_v7 = vld [vmem:[%s9981_s1 + $0xbf8] sm:$0xff] }
 0x174   : > { %5224 = vmatpush.bf16.msra.mxu1 %v7888_v37  ;;  %v4853_v15 = vadd.f32 %v4852_v4, %v4834_v3  ;;  %v1357_v32 = vpack.c.bf16 %v5956_v20, %v5908_v24  ;;  %v9724_v37 = vpack.c.bf16 %v640_v18, %v639_v29  ;;  %v4890_v48 = vpop.f32.mrf.mxu3  ;;  %v976_v4 = vunpack.c.h.bf16 %v9726_v41  ;;  %v404_v29 = vld [vmem:[%s9980_s0 + $0x2e8] sm:$0xff] }
 0x175   : > { %5243 = vmatpush.bf16.msra.mxu2 %v7896_v34  ;;  %v498_v34 = vunpack.c.h.bf16 %v356_v10 }
 0x176   : > { %5262 = vmatpush.bf16.msra.mxu3 %v7904_v38  ;;  %v4871_v42 = vpop.f32.mrf.mxu2  ;;  %v641_v38 = vmul.f32 0.007873535, %v449_v14  ;;  %5139 = vmatmul.bf16.gmra.mxu0 %v1355_v26  ;;  %v928_v3 = vunpack.c.h.bf16 %v9724_v37 }
 0x177   : > { %5206 = vmatpush.bf16.msra.mxu0 %v7879_v57  ;;  %v4872_v45 = vadd.f32 %v4871_v42, %v4853_v15  ;;  %v690_v44 = vmul.f32 0.007873535, %v498_v34  ;;  %v1358_v57 = vpack.c.bf16 %v5957_v35, %v5909_v23  ;;  %v7922_v15 = vld [vmem:[%s9981_s1 + $0xb70] sm:$0xff]  ;;  %v594_v42 = vunpack.c.h.bf16 %v404_v29 }
 0x178   : > { %5225 = vmatpush.bf16.msra.mxu1 %v7887_v51  ;;  %v7900_v51 = vld [vmem:[%s9981_s1 + $0xac0] sm:$0xff]  ;;  %v9741_v53 = vpack.c.bf16 %v642_v39, %v641_v38  ;;  %v7921_v39 = vld [vmem:[%s9981_s1 + $0xb68] sm:$0xff] }
 0x179   : > { %5244 = vmatpush.bf16.msra.mxu2 %v7895_v43  ;;  %v4836_v40 = vpop.f32.mrf.mxu0  ;;  %v689_v43 = vmul.f32 0.007873535, %v497_v22  ;;  %v4855_v47 = vpop.f32.mrf.mxu1  ;;  %v9732_v54 = vadd.f32 %v4890_v48, %v4872_v45  ;;  %v592_v22 = vunpack.c.h.bf16 %v403_v61  ;;  %v7937_v45 = vld [vmem:[%s9981_s1 + $0xbe8] sm:$0xff] }
 0x17a   : > { %5263 = vmatpush.bf16.msra.mxu3 %v7903_v52  ;;  %v4837_v46 = vadd.f32 %v4836_v40, %v9618_v62  ;;  %v927_v52 = vunpack.c.l.bf16 %v9724_v37  ;;  %v929_v8 = vunpack.c.l.bf16 %v9741_v53  ;;  %v930_v14 = vunpack.c.h.bf16 %v9741_v53 }
 0x17b   : > { %5207 = vmatpush.bf16.msra.mxu0 %v7878_v9  ;;  %5158 = vmatmul.bf16.gmra.mxu1 %v1356_v27  ;;  %v836_v59 = vpack.c.bf16 %v690_v44, %v689_v43  ;;  %v380_v9 = vld [vmem:[%s9980_s0 + $0x228] sm:$0xff]  ;;  %v783_v43 = vmul.f32 0.007873535, %v591_v21  ;;  %v784_v44 = vmul.f32 0.007873535, %v592_v22 }
 0x17c   : > { %5226 = vmatpush.bf16.msra.mxu1 %v7886_v16  ;;  %v4856_v62 = vadd.f32 %v4855_v47, %v4837_v46  ;;  %5177 = vmatmul.bf16.gmra.mxu2 %v1357_v32  ;;  %v9762_v13 = vadd.f32 -1.0, %v927_v52  ;;  %v4893_v24 = vpop.f32.mrf.mxu3  ;;  %v9776_v16 = vadd.f32 -1.0, %v975_v56  ;;  %v7929_v27 = vld [vmem:[%s9981_s1 + $0xba8] sm:$0xff]  ;;  %v5815_v32 = vadd.f32 -1.0, %v928_v3 }
 0x17d   : > { %5245 = vmatpush.bf16.msra.mxu2 %v7894_v0  ;;  %v379_v0 = vld [vmem:[%s9980_s0 + $0x220] sm:$0xff]  ;;  %5196 = vmatmul.bf16.gmra.mxu3 %v1358_v57  ;;  %v978_v28 = vunpack.c.h.bf16 %v836_v59  ;;  %v5816_v37 = vadd.f32 -1.0, %v929_v8  ;;  %v5817_v48 = vadd.f32 -1.0, %v930_v14  ;;  %v7919_v14 = vld [vmem:[%s9981_s1 + $0xb58] sm:$0xff] }
 0x17e   : > { %5264 = vmatpush.bf16.msra.mxu3 %v7902_v12  ;;  %v543_v63 = vunpack.c.l.bf16 %v379_v0  ;;  %v544_v1 = vunpack.c.h.bf16 %v379_v0  ;;  %v4874_v2 = vpop.f32.mrf.mxu2  ;;  %v977_v12 = vunpack.c.l.bf16 %v836_v59  ;;  %v1311_v41 = vpack.c.bf16 %v9776_v16, %v9762_v13  ;;  %v7928_v57 = vld [vmem:[%s9981_s1 + $0xba0] sm:$0xff] }
 0x17f   : > { %5208 = vmatpush.bf16.msra.mxu0 %v7877_v25  ;;  %v4875_v10 = vadd.f32 %v4874_v2, %v4856_v62  ;;  %v545_v25 = vunpack.c.l.bf16 %v380_v9  ;;  %v5865_v40 = vadd.f32 -1.0, %v978_v28  ;;  %v786_v62 = vmul.f32 0.007873535, %v594_v42  ;;  %v7926_v28 = vld [vmem:[%s9981_s1 + $0xb90] sm:$0xff] }
 0x180   : > { %5227 = vmatpush.bf16.msra.mxu1 %v7885_v30  ;;  %v735_v23 = vmul.f32 0.007873535, %v543_v63  ;;  %v736_v35 = vmul.f32 0.007873535, %v544_v1  ;;  %v546_v30 = vunpack.c.h.bf16 %v380_v9  ;;  %v5864_v38 = vadd.f32 -1.0, %v977_v12  ;;  %v7920_v63 = vld [vmem:[%s9981_s1 + $0xb60] sm:$0xff]  ;;  %v7911_v9 = vld [vmem:[%s9981_s1 + $0xb18] sm:$0xff] }
 0x181   : > { %5246 = vmatpush.bf16.msra.mxu2 %v7893_v17  ;;  %v4838_v20 = vpop.f32.mrf.mxu0  ;;  %v7938_v17 = vld [vmem:[%s9981_s1 + $0xbf0] sm:$0xff]  ;;  %v4857_v19 = vpop.f32.mrf.mxu1  ;;  %v9789_v34 = vadd.f32 %v4893_v24, %v4875_v10  ;;  %v7936_v1 = vld [vmem:[%s9981_s1 + $0xbe0] sm:$0xff]  ;;  %v883_v2 = vpack.c.bf16 %v784_v44, %v783_v43 }
 0x182   : > { %5265 = vmatpush.bf16.msra.mxu3 %v7901_v31  ;;  %v4839_v18 = vadd.f32 %v4838_v20, %v9642_v36  ;;  %v7913_v36 = vld [vmem:[%s9981_s1 + $0xb28] sm:$0xff]  ;;  %v593_v31 = vunpack.c.l.bf16 %v404_v29  ;;  %v859_v46 = vpack.c.bf16 %v736_v35, %v735_v23  ;;  %v1313_v0 = vpack.c.bf16 %v5864_v38, %v5816_v37  ;;  %v357_v10 = vld [vmem:[%s9980_s0 + $0x170] sm:$0xff]  ;;  %v358_v23 = vld [vmem:[%s9980_s0 + $0x178] sm:$0xff] }
 0x183   : > { %5209 = vmatpush.bf16.msra.mxu0 %v7876_v50  ;;  %v737_v50 = vmul.f32 0.007873535, %v545_v25  ;;  %v1071_v24 = vunpack.c.l.bf16 %v883_v2  ;;  %v1072_v16 = vunpack.c.h.bf16 %v883_v2  ;;  %v7924_v2 = vld [vmem:[%s9981_s1 + $0xb80] sm:$0xff] }
 0x184   : > { %5228 = vmatpush.bf16.msra.mxu1 %v7884_v49  ;;  %v4858_v26 = vadd.f32 %v4857_v19, %v4839_v18  ;;  %v738_v49 = vmul.f32 0.007873535, %v546_v30  ;;  %v4895_v53 = vpop.f32.mrf.mxu3  ;;  %v1023_v13 = vunpack.c.l.bf16 %v859_v46  ;;  %v1024_v3 = vunpack.c.h.bf16 %v859_v46  ;;  %v7925_v46 = vld [vmem:[%s9981_s1 + $0xb88] sm:$0xff] }
 0x185   : > { %5247 = vmatpush.bf16.msra.mxu2 %v7892_v33  ;;  %v5863_v33 = vadd.f32 -1.0, %v976_v4  ;;  %v500_v30 = vunpack.c.h.bf16 %v357_v10  ;;  %v5959_v44 = vadd.f32 -1.0, %v1072_v16 }
 0x186   : > { %5266 = vmatpush.bf16.msra.mxu3 %v7900_v51  ;;  %v4876_v47 = vpop.f32.mrf.mxu2  ;;  %v785_v51 = vmul.f32 0.007873535, %v593_v31  ;;  %5210 = vmatmul.bf16.vlgmr.msra.gmra.mxu0 %v1311_v41  ;;  %v860_v4 = vpack.c.bf16 %v738_v49, %v737_v50  ;;  %v9832_v20 = vadd.f32 -1.0, %v1023_v13  ;;  %v9834_v12 = vadd.f32 -1.0, %v1024_v3 }
 0x187   : > { %5278 = vmatpush.bf16.msrb.mxu0 %v7915_v55  ;;  %v4877_v52 = vadd.f32 %v4876_v47, %v4858_v26  ;;  %v1312_v55 = vpack.c.bf16 %v5863_v33, %v5815_v32  ;;  %v7910_v33 = vld [vmem:[%s9981_s1 + $0xb10] sm:$0xff]  ;;  %v502_v41 = vunpack.c.h.bf16 %v358_v23 }
 0x188   : > { %5297 = vmatpush.bf16.msrb.mxu1 %v7923_v58  ;;  %v1314_v58 = vpack.c.bf16 %v5865_v40, %v5817_v48  ;;  %v884_v8 = vpack.c.bf16 %v786_v62, %v785_v51  ;;  %v1025_v18 = vunpack.c.l.bf16 %v860_v4  ;;  %v7918_v48 = vld [vmem:[%s9981_s1 + $0xb50] sm:$0xff]  ;;  %v501_v40 = vunpack.c.l.bf16 %v358_v23 }
 0x189   : > { %5316 = vmatpush.bf16.msrb.mxu2 %v7931_v60  ;;  %v4907_v60 = vpop.f32.mrf.mxu0  ;;  %v4926_v59 = vpop.f32.mrf.mxu1  ;;  %v9812_v61 = vadd.f32 %v4895_v53, %v4877_v52  ;;  %v692_v62 = vmul.f32 0.007873535, %v500_v30 }
 0x18a   : > { %5335 = vmatpush.bf16.msrb.mxu3 %v7939_v7  ;;  %v4908_v56 = vadd.f32 %v4907_v60, %v9697_v11  ;;  %v7912_v7 = vld [vmem:[%s9981_s1 + $0xb20] sm:$0xff]  ;;  %v1073_v19 = vunpack.c.l.bf16 %v884_v8  ;;  %v1074_v32 = vunpack.c.h.bf16 %v884_v8  ;;  %v5912_v50 = vadd.f32 -1.0, %v1025_v18  ;;  %v7909_v60 = vld [vmem:[%s9981_s1 + $0xb08] sm:$0xff] }
 0x18b   : > { %5279 = vmatpush.bf16.msrb.mxu0 %v7914_v6  ;;  %5229 = vmatmul.bf16.vlgmr.msra.gmra.mxu1 %v1312_v55  ;;  %v333_v6 = vld [vmem:[%s9980_s0 + $0xb0] sm:$0xff]  ;;  %v1360_v8 = vpack.c.bf16 %v5959_v44, %v9834_v12  ;;  %v7916_v12 = vld [vmem:[%s9981_s1 + $0xb40] sm:$0xff] }
 0x18c   : > { %5298 = vmatpush.bf16.msrb.mxu1 %v7922_v15  ;;  %v4927_v11 = vadd.f32 %v4926_v59, %v4908_v56  ;;  %5248 = vmatmul.bf16.vlgmr.msra.gmra.mxu2 %v1313_v0  ;;  %v7935_v15 = vld [vmem:[%s9981_s1 + $0xbd8] sm:$0xff]  ;;  %v451_v21 = vunpack.c.l.bf16 %v333_v6  ;;  %v452_v22 = vunpack.c.h.bf16 %v333_v6  ;;  %v4964_v25 = vpop.f32.mrf.mxu3  ;;  %v5960_v49 = vadd.f32 -1.0, %v1073_v19  ;;  %v7917_v56 = vld [vmem:[%s9981_s1 + $0xb48] sm:$0xff] }
 0x18d   : > { %5317 = vmatpush.bf16.msrb.mxu2 %v7930_v5  ;;  %v7927_v5 = vld [vmem:[%s9981_s1 + $0xb98] sm:$0xff]  ;;  %5267 = vmatmul.bf16.vlgmr.msra.gmra.mxu3 %v1314_v58  ;;  %v5961_v53 = vadd.f32 -1.0, %v1074_v32  ;;  %v7933_v59 = vld [vmem:[%s9981_s1 + $0xbc8] sm:$0xff]  ;;  %v693_v58 = vmul.f32 0.007873535, %v501_v40  ;;  %v405_v32 = vld [vmem:[%s9980_s0 + $0x2f0] sm:$0xff] }
 0x18e   : > { %5336 = vmatpush.bf16.msrb.mxu3 %v7938_v17  ;;  %v334_v17 = vld [vmem:[%s9980_s0 + $0xb8] sm:$0xff]  ;;  %v4945_v29 = vpop.f32.mrf.mxu2  ;;  %v643_v47 = vmul.f32 0.007873535, %v451_v21 }
 0x18f   : > { %5280 = vmatpush.bf16.msrb.mxu0 %v7913_v36  ;;  %v4946_v35 = vadd.f32 %v4945_v29, %v4927_v11  ;;  %v499_v36 = vunpack.c.l.bf16 %v357_v10  ;;  %v453_v37 = vunpack.c.l.bf16 %v334_v17  ;;  %v454_v38 = vunpack.c.h.bf16 %v334_v17  ;;  %v406_v40 = vld [vmem:[%s9980_s0 + $0x2f8] sm:$0xff] }
 0x190   : > { %5299 = vmatpush.bf16.msrb.mxu1 %v7921_v39 }
 0x191   : > { %5318 = vmatpush.bf16.msrb.mxu2 %v7929_v27  ;;  %v4909_v26 = vpop.f32.mrf.mxu0  ;;  %v1026_v27 = vunpack.c.h.bf16 %v860_v4  ;;  %v4928_v42 = vpop.f32.mrf.mxu1  ;;  %v9855_v39 = vadd.f32 %v4964_v25, %v4946_v35  ;;  %v691_v51 = vmul.f32 0.007873535, %v499_v36  ;;  %v645_v55 = vmul.f32 0.007873535, %v453_v37  ;;  %v381_v25 = vld [vmem:[%s9980_s0 + $0x230] sm:$0xff] }
 0x192   : > { %5337 = vmatpush.bf16.msrb.mxu3 %v7937_v45  ;;  %v4910_v31 = vadd.f32 %v4909_v26, %v9732_v54  ;;  %v5958_v45 = vadd.f32 -1.0, %v1071_v24  ;;  %v7934_v54 = vld [vmem:[%s9981_s1 + $0xbd0] sm:$0xff]  ;;  %v646_v0 = vmul.f32 0.007873535, %v454_v38  ;;  %v547_v44 = vunpack.c.l.bf16 %v381_v25 }
 0x193   : > { %5281 = vmatpush.bf16.msrb.mxu0 %v7912_v7  ;;  %v5913_v52 = vadd.f32 -1.0, %v1026_v27  ;;  %v694_v7 = vmul.f32 0.007873535, %v502_v41  ;;  %v837_v6 = vpack.c.bf16 %v692_v62, %v691_v51  ;;  %v597_v62 = vunpack.c.l.bf16 %v406_v40 }
 0x194   : > { %5300 = vmatpush.bf16.msrb.mxu1 %v7920_v63  ;;  %v4929_v43 = vadd.f32 %v4928_v42, %v4910_v31  ;;  %v4966_v11 = vpop.f32.mrf.mxu3  ;;  %v814_v16 = vpack.c.bf16 %v646_v0, %v645_v55 }
 0x195   : > { %5319 = vmatpush.bf16.msrb.mxu2 %v7928_v57  ;;  %v644_v57 = vmul.f32 0.007873535, %v452_v22  ;;  %v1362_v24 = vpack.c.bf16 %v5961_v53, %v5913_v52  ;;  %v979_v18 = vunpack.c.l.bf16 %v837_v6 }
 0x196   : > { %5338 = vmatpush.bf16.msrb.mxu3 %v7936_v1  ;;  %v4947_v63 = vpop.f32.mrf.mxu2  ;;  %v1359_v1 = vpack.c.bf16 %v5958_v45, %v9832_v20  ;;  %v7908_v20 = vld [vmem:[%s9981_s1 + $0xb00] sm:$0xff]  ;;  %v933_v21 = vunpack.c.l.bf16 %v814_v16 }
 0x197   : > { %5282 = vmatpush.bf16.msrb.mxu0 %v7911_v9  ;;  %v813_v13 = vpack.c.bf16 %v644_v57, %v643_v47  ;;  %v4948_v3 = vadd.f32 %v4947_v63, %v4929_v43  ;;  %v5866_v30 = vadd.f32 -1.0, %v979_v18  ;;  %v595_v57 = vunpack.c.l.bf16 %v405_v32 }
 0x198   : > { %5301 = vmatpush.bf16.msrb.mxu1 %v7919_v14  ;;  %5215 = vmatmul.bf16.gmra.mxu0 %v1359_v1  ;;  %v5820_v45 = vadd.f32 -1.0, %v933_v21 }
 0x199   : > { %5320 = vmatpush.bf16.msrb.mxu2 %v7927_v5  ;;  %v4912_v4 = vpop.f32.mrf.mxu0  ;;  %v1361_v5 = vpack.c.bf16 %v5960_v49, %v5912_v50  ;;  %v4931_v10 = vpop.f32.mrf.mxu1  ;;  %v9884_v14 = vadd.f32 %v4966_v11, %v4948_v3  ;;  %v931_v29 = vunpack.c.l.bf16 %v813_v13  ;;  %v932_v19 = vunpack.c.h.bf16 %v813_v13 }
 0x19a   : > { %5339 = vmatpush.bf16.msrb.mxu3 %v7935_v15  ;;  %v4913_v9 = vadd.f32 %v4912_v4, %v9789_v34  ;;  %v7932_v34 = vld [vmem:[%s9981_s1 + $0xbc0] sm:$0xff]  ;;  %v838_v15 = vpack.c.bf16 %v694_v7, %v693_v58  ;;  %v596_v50 = vunpack.c.h.bf16 %v405_v32  ;;  %v787_v7 = vmul.f32 0.007873535, %v595_v57 }
 0x19b   : > { %5283 = vmatpush.bf16.msrb.mxu0 %v7910_v33  ;;  %5234 = vmatmul.bf16.gmra.mxu1 %v1360_v8  ;;  %v5818_v35 = vadd.f32 -1.0, %v931_v29  ;;  %v5819_v31 = vadd.f32 -1.0, %v932_v19  ;;  %v382_v33 = vld [vmem:[%s9980_s0 + $0x238] sm:$0xff]  ;;  %v789_v4 = vmul.f32 0.007873535, %v597_v62 }
 0x19c   : > { %5302 = vmatpush.bf16.msrb.mxu1 %v7918_v48  ;;  %v4932_v17 = vadd.f32 %v4931_v10, %v4913_v9  ;;  %5253 = vmatmul.bf16.gmra.mxu2 %v1361_v5  ;;  %v981_v22 = vunpack.c.l.bf16 %v838_v15  ;;  %v934_v48 = vunpack.c.h.bf16 %v814_v16  ;;  %v549_v49 = vunpack.c.l.bf16 %v382_v33 }
 0x19d   : > { %5321 = vmatpush.bf16.msrb.mxu2 %v7926_v28  ;;  %v980_v28 = vunpack.c.h.bf16 %v837_v6  ;;  %5272 = vmatmul.bf16.gmra.mxu3 %v1362_v24  ;;  %v550_v51 = vunpack.c.h.bf16 %v382_v33  ;;  %v788_v63 = vmul.f32 0.007873535, %v596_v50 }
 0x19e   : > { %5340 = vmatpush.bf16.msrb.mxu3 %v7934_v54  ;;  %v4950_v23 = vpop.f32.mrf.mxu2  ;;  %v982_v54 = vunpack.c.h.bf16 %v838_v15  ;;  %v5868_v43 = vadd.f32 -1.0, %v981_v22  ;;  %v5821_v52 = vadd.f32 -1.0, %v934_v48  ;;  %v741_v1 = vmul.f32 0.007873535, %v549_v49 }
 0x19f   : > { %5284 = vmatpush.bf16.msrb.mxu0 %v7909_v60  ;;  %v4951_v26 = vadd.f32 %v4950_v23, %v4932_v17  ;;  %v4969_v27 = vpop.f32.mrf.mxu3  ;;  %v5867_v42 = vadd.f32 -1.0, %v980_v28  ;;  %v1315_v60 = vpack.c.bf16 %v5866_v30, %v5818_v35  ;;  %v742_v11 = vmul.f32 0.007873535, %v550_v51 }
 0x1a0   : > { %5303 = vmatpush.bf16.msrb.mxu1 %v7917_v56  ;;  %v5869_v53 = vadd.f32 -1.0, %v982_v54  ;;  %v1317_v0 = vpack.c.bf16 %v5868_v43, %v5820_v45  ;;  %v739_v56 = vmul.f32 0.007873535, %v547_v44  ;;  %v885_v16 = vpack.c.bf16 %v788_v63, %v787_v7 }
 0x1a1   : > { %5322 = vmatpush.bf16.msrb.mxu2 %v7925_v46  ;;  %v4914_v36 = vpop.f32.mrf.mxu0  ;;  %v4933_v38 = vpop.f32.mrf.mxu1  ;;  %v9905_v41 = vadd.f32 %v4969_v27, %v4951_v26  ;;  %v548_v46 = vunpack.c.h.bf16 %v381_v25  ;;  %v1316_v55 = vpack.c.bf16 %v5867_v42, %v5819_v31 }
 0x1a2   : > { %5341 = vmatpush.bf16.msrb.mxu3 %v7933_v59  ;;  %v4915_v37 = vadd.f32 %v4914_v36, %v9812_v61  ;;  %v598_v61 = vunpack.c.h.bf16 %v406_v40  ;;  %v1318_v9 = vpack.c.bf16 %v5869_v53, %v5821_v52  ;;  %v1075_v29 = vunpack.c.l.bf16 %v885_v16 }
 0x1a3   : > { %5285 = vmatpush.bf16.msrb.mxu0 %v7908_v20  ;;  %v740_v58 = vmul.f32 0.007873535, %v548_v46 }
 0x1a4   : > { %5304 = vmatpush.bf16.msrb.mxu1 %v7916_v12  ;;  %v4934_v47 = vadd.f32 %v4933_v38, %v4915_v37  ;;  %v790_v8 = vmul.f32 0.007873535, %v598_v61  ;;  %v862_v12 = vpack.c.bf16 %v742_v11, %v741_v1  ;;  %v5962_v42 = vadd.f32 -1.0, %v1075_v29 }
 0x1a5   : > { %5323 = vmatpush.bf16.msrb.mxu2 %v7924_v2  ;;  %v861_v20 = vpack.c.bf16 %v740_v58, %v739_v56 }
 0x1a6   : > { %5342 = vmatpush.bf16.msrb.mxu3 %v7932_v34  ;;  %v4952_v59 = vpop.f32.mrf.mxu2  ;;  %v886_v34 = vpack.c.bf16 %v790_v8, %v789_v4  ;;  %v1029_v22 = vunpack.c.l.bf16 %v862_v12  ;;  %v1030_v26 = vunpack.c.h.bf16 %v862_v12 }
 0x1a7   : > { %v4953_v2 = vadd.f32 %v4952_v59, %v4934_v47  ;;  %v4971_v13 = vpop.f32.mrf.mxu3  ;;  %v1027_v17 = vunpack.c.l.bf16 %v861_v20  ;;  %v1028_v18 = vunpack.c.h.bf16 %v861_v20 }
 0x1a8   : > { %5286 = vmatmul.bf16.vlgmr.msrb.gmra.mxu0 %v1315_v60  ;;  %v1077_v23 = vunpack.c.l.bf16 %v886_v34  ;;  %v1078_v27 = vunpack.c.h.bf16 %v886_v34  ;;  %v5916_v37 = vadd.f32 -1.0, %v1029_v22  ;;  %v5917_v45 = vadd.f32 -1.0, %v1030_v26 }
 0x1a9   : > { %v4983_v3 = vpop.f32.mrf.mxu0  ;;  %v5002_v6 = vpop.f32.mrf.mxu1  ;;  %v4972_v10 = vadd.f32 %v4971_v13, %v4953_v2  ;;  %v5914_v31 = vadd.f32 -1.0, %v1027_v17  ;;  %v5915_v32 = vadd.f32 -1.0, %v1028_v18 }
 0x1aa   : > { %v4984_v5 = vadd.f32 %v4983_v3, %v9855_v39  ;;  %v1076_v39 = vunpack.c.h.bf16 %v885_v16  ;;  %v5964_v38 = vadd.f32 -1.0, %v1077_v23  ;;  %v5965_v48 = vadd.f32 -1.0, %v1078_v27 }
 0x1ab   : > { %5305 = vmatmul.bf16.vlgmr.msrb.gmra.mxu1 %v1316_v55  ;;  %v1363_v40 = vpack.c.bf16 %v5962_v42, %v5914_v31 }
 0x1ac   : > { %v5003_v24 = vadd.f32 %v5002_v6, %v4984_v5  ;;  %5324 = vmatmul.bf16.vlgmr.msrb.gmra.mxu2 %v1317_v0  ;;  %v5963_v33 = vadd.f32 -1.0, %v1076_v39  ;;  %v1366_v49 = vpack.c.bf16 %v5965_v48, %v5917_v45 }
 0x1ad   : > { %5343 = vmatmul.bf16.vlgmr.msrb.gmra.mxu3 %v1318_v9 }
 0x1ae   : > { %v5021_v15 = vpop.f32.mrf.mxu2  ;;  %v1364_v47 = vpack.c.bf16 %v5963_v33, %v5915_v32 }
 0x1af   : > { %v5022_v19 = vadd.f32 %v5021_v15, %v5003_v24  ;;  %v5040_v28 = vpop.f32.mrf.mxu3 }
 0x1b1   : > { %v4985_v21 = vpop.f32.mrf.mxu0  ;;  %v5004_v25 = vpop.f32.mrf.mxu1  ;;  %v5041_v36 = vadd.f32 %v5040_v28, %v5022_v19 }
 0x1b2   : > { %v4986_v35 = vadd.f32 %v4985_v21, %v9884_v14  ;;  %v1365_v14 = vpack.c.bf16 %v5964_v38, %v5916_v37 }
 0x1b4   : > { %v5005_v30 = vadd.f32 %v5004_v25, %v4986_v35 }
 0x1b6   : > { %v5023_v54 = vpop.f32.mrf.mxu2 }
 0x1b7   : > { %v5024_v43 = vadd.f32 %v5023_v54, %v5005_v30  ;;  %v5042_v44 = vpop.f32.mrf.mxu3 }
 0x1b8   : > { %5291 = vmatmul.bf16.gmra.mxu0 %v1363_v40 }
 0x1b9   : > { %v4988_v46 = vpop.f32.mrf.mxu0  ;;  %v5007_v50 = vpop.f32.mrf.mxu1  ;;  %v5043_v51 = vadd.f32 %v5042_v44, %v5024_v43 }
 0x1ba   : > { %v4989_v57 = vadd.f32 %v4988_v46, %v9905_v41 }
 0x1bb   : > { %5310 = vmatmul.bf16.gmra.mxu1 %v1364_v47 }
 0x1bc   : > { %v5008_v62 = vadd.f32 %v5007_v50, %v4989_v57  ;;  %5329 = vmatmul.bf16.gmra.mxu2 %v1365_v14 }
 0x1bd   : > { %5348 = vmatmul.bf16.gmra.mxu3 %v1366_v49 }
 0x1bf   : > { %v5026_v61 = vpop.f32.mrf.mxu2 }
 0x1c0   : > { %v5027_v52 = vadd.f32 %v5026_v61, %v5008_v62  ;;  %v5045_v53 = vpop.f32.mrf.mxu3 }
 0x1c1   : > { %v4990_v60 = vpop.f32.mrf.mxu0  ;;  %v5009_v0 = vpop.f32.mrf.mxu1 }
 0x1c2   : > { %v4991_v55 = vadd.f32 %v4990_v60, %v4972_v10  ;;  %v5046_v56 = vadd.f32 %v5045_v53, %v5027_v52 }
 0x1c4   : > { %v5010_v59 = vadd.f32 %v5009_v0, %v4991_v55 }
 0x1c7   : > { %v5028_v58 = vpop.f32.mrf.mxu2 }
 0x1c8   : > { %v5029_v7 = vadd.f32 %v5028_v58, %v5010_v59  ;;  %v5047_v63 = vpop.f32.mrf.mxu3 }
 0x1c9   : > { %v5059_v41 = vpop.f32.mrf.mxu0  ;;  %v5078_v2 = vpop.f32.mrf.mxu1 }
 0x1ca   : > { %v5060_v1 = vadd.f32 %v5059_v41, %v5041_v36  ;;  %v5048_v13 = vadd.f32 %v5047_v63, %v5029_v7 }
 0x1cc   : > { %v5079_v3 = vadd.f32 %v5078_v2, %v5060_v1 }
 0x1cf   : > { %v5097_v11 = vpop.f32.mrf.mxu2 }
 0x1d0   : > { %v5098_v4 = vadd.f32 %v5097_v11, %v5079_v3  ;;  %v5116_v8 = vpop.f32.mrf.mxu3 }
 0x1d1   : > { %v5061_v5 = vpop.f32.mrf.mxu0  ;;  %v5080_v9 = vpop.f32.mrf.mxu1 }
 0x1d2   : > { %v5062_v6 = vadd.f32 %v5061_v5, %v5043_v51  ;;  %v5117_v24 = vadd.f32 %v5116_v8, %v5098_v4 }
 0x1d4   : > { %v5081_v20 = vadd.f32 %v5080_v9, %v5062_v6 }
 0x1d7   : > { %v5099_v10 = vpop.f32.mrf.mxu2 }
 0x1d8   : > { %v5100_v16 = vadd.f32 %v5099_v10, %v5081_v20  ;;  %v5118_v12 = vpop.f32.mrf.mxu3 }
 0x1d9   : > { %v5064_v34 = vpop.f32.mrf.mxu0  ;;  %v5083_v17 = vpop.f32.mrf.mxu1 }
 0x1da   : > { %v5065_v15 = vadd.f32 %v5064_v34, %v5046_v56  ;;  %v5119_v29 = vadd.f32 %v5118_v12, %v5100_v16 }
 0x1dc   : > { %v5084_v18 = vadd.f32 %v5083_v17, %v5065_v15 }
 0x1df   : > { %v5102_v19 = vpop.f32.mrf.mxu2 }
 0x1e0   : > { %v5103_v28 = vadd.f32 %v5102_v19, %v5084_v18  ;;  %v5121_v21 = vpop.f32.mrf.mxu3 }
 0x1e1   : > { %v5066_v39 = vpop.f32.mrf.mxu0  ;;  %v5085_v23 = vpop.f32.mrf.mxu1 }
 0x1e2   : > { %v5067_v22 = vadd.f32 %v5066_v39, %v5048_v13  ;;  %v5122_v35 = vadd.f32 %v5121_v21, %v5103_v28 }
 0x1e4   : > { %v5086_v25 = vadd.f32 %v5085_v23, %v5067_v22 }
 0x1e7   : > { %v5104_v26 = vpop.f32.mrf.mxu2 }
 0x1e8   : > { %v5105_v27 = vadd.f32 %v5104_v26, %v5086_v25  ;;  %v5123_v36 = vpop.f32.mrf.mxu3 }
 0x1e9   : > { %v5135_v30 = vpop.f32.mrf.mxu0  ;;  %v5154_v31 = vpop.f32.mrf.mxu1 }
 0x1ea   : > { %v5124_v42 = vadd.f32 %v5123_v36, %v5105_v27  ;;  %v5136_v53 = vadd.f32 %v5135_v30, %v5117_v24 }
 0x1ec   : > { %v5155_v60 = vadd.f32 %v5154_v31, %v5136_v53 }
 0x1ef   : > { %v5173_v32 = vpop.f32.mrf.mxu2 }
 0x1f0   : > { %v5192_v33 = vpop.f32.mrf.mxu3  ;;  %v5174_v0 = vadd.f32 %v5173_v32, %v5155_v60 }
 0x1f1   : > { %v5137_v37 = vpop.f32.mrf.mxu0  ;;  %v5156_v38 = vpop.f32.mrf.mxu1 }
 0x1f2   : > { %v5138_v7 = vadd.f32 %v5137_v37, %v5119_v29  ;;  %v5193_v63 = vadd.f32 %v5192_v33, %v5174_v0 }
 0x1f4   : > { %v5157_v41 = vadd.f32 %v5156_v38, %v5138_v7 }
 0x1f7   : > { %v5175_v45 = vpop.f32.mrf.mxu2 }
 0x1f8   : > { %v5194_v48 = vpop.f32.mrf.mxu3  ;;  %v5176_v13 = vadd.f32 %v5175_v45, %v5157_v41 }
 0x1f9   : > { %v5140_v54 = vpop.f32.mrf.mxu0  ;;  %v5159_v40 = vpop.f32.mrf.mxu1 }
 0x1fa   : > { %v5141_v8 = vadd.f32 %v5140_v54, %v5122_v35  ;;  %v5195_v6 = vadd.f32 %v5194_v48, %v5176_v13 }
 0x1fc   : > { %v5160_v24 = vadd.f32 %v5159_v40, %v5141_v8 }
 0x1ff   : > { %v5178_v43 = vpop.f32.mrf.mxu2 }
 0x200   : > { %v5197_v44 = vpop.f32.mrf.mxu3  ;;  %v5179_v16 = vadd.f32 %v5178_v43, %v5160_v24 }
 0x201   : > { %v5142_v46 = vpop.f32.mrf.mxu0  ;;  %v5161_v47 = vpop.f32.mrf.mxu1 }
 0x202   : > { %v5143_v29 = vadd.f32 %v5142_v46, %v5124_v42  ;;  %v5198_v28 = vadd.f32 %v5197_v44, %v5179_v16 }
 0x204   : > { %v5162_v39 = vadd.f32 %v5161_v47, %v5143_v29 }
 0x207   : > { %v5180_v14 = vpop.f32.mrf.mxu2 }
 0x208   : > { %v5199_v57 = vpop.f32.mrf.mxu3  ;;  %v5181_v25 = vadd.f32 %v5180_v14, %v5162_v39 }
 0x209   : > { %v5211_v50 = vpop.f32.mrf.mxu0  ;;  %v5230_v49 = vpop.f32.mrf.mxu1 }
 0x20a   : > { %v5212_v1 = vadd.f32 %v5211_v50, %v5193_v63  ;;  %v5200_v38 = vadd.f32 %v5199_v57, %v5181_v25 }
 0x20c   : > { %v5231_v5 = vadd.f32 %v5230_v49, %v5212_v1 }
 0x20f   : > { %v5249_v51 = vpop.f32.mrf.mxu2 }
 0x210   : > { %v5268_v62 = vpop.f32.mrf.mxu3  ;;  %v5250_v9 = vadd.f32 %v5249_v51, %v5231_v5 }
 0x211   : > { %v5213_v61 = vpop.f32.mrf.mxu0  ;;  %v5232_v52 = vpop.f32.mrf.mxu1 }
 0x212   : > { %v5214_v20 = vadd.f32 %v5213_v61, %v5195_v6  ;;  %v5269_v12 = vadd.f32 %v5268_v62, %v5250_v9 }
 0x214   : > { %v5233_v18 = vadd.f32 %v5232_v52, %v5214_v20 }
 0x217   : > { %v5251_v55 = vpop.f32.mrf.mxu2 }
 0x218   : > { %v5270_v56 = vpop.f32.mrf.mxu3  ;;  %v5252_v21 = vadd.f32 %v5251_v55, %v5233_v18 }
 0x219   : > { %v5216_v59 = vpop.f32.mrf.mxu0  ;;  %v5235_v58 = vpop.f32.mrf.mxu1 }
 0x21a   : > { %v5217_v22 = vadd.f32 %v5216_v59, %v5198_v28  ;;  %v5271_v26 = vadd.f32 %v5270_v56, %v5252_v21 }
 0x21c   : > { %v5236_v32 = vadd.f32 %v5235_v58, %v5217_v22 }
 0x21f   : > { %v5254_v2 = vpop.f32.mrf.mxu2 }
 0x220   : > { %v5273_v3 = vpop.f32.mrf.mxu3  ;;  %v5255_v42 = vadd.f32 %v5254_v2, %v5236_v32 }
 0x221   : > { %v5218_v11 = vpop.f32.mrf.mxu0  ;;  %v5237_v4 = vpop.f32.mrf.mxu1 }
 0x222   : > { %v5219_v48 = vadd.f32 %v5218_v11, %v5200_v38  ;;  %v5274_v43 = vadd.f32 %v5273_v3, %v5255_v42 }
 0x224   : > { %v5238_v14 = vadd.f32 %v5237_v4, %v5219_v48 }
 0x227   : > { %v5256_v10 = vpop.f32.mrf.mxu2 }
 0x228   : > { %v5275_v34 = vpop.f32.mrf.mxu3  ;;  %v5257_v62 = vadd.f32 %v5256_v10, %v5238_v14 }
 0x229   : > { %v5287_v15 = vpop.f32.mrf.mxu0  ;;  %v5306_v17 = vpop.f32.mrf.mxu1 }
 0x22a   : > { %v5288_v19 = vadd.f32 %v5287_v15, %v5269_v12  ;;  %v5276_v53 = vadd.f32 %v5275_v34, %v5257_v62 }
 0x22c   : > { %v5307_v23 = vadd.f32 %v5306_v17, %v5288_v19 }
 0x22f   : > { %v5325_v35 = vpop.f32.mrf.mxu2 }
 0x230   : > { %v5326_v27 = vadd.f32 %v5325_v35, %v5307_v23  ;;  %v5344_v36 = vpop.f32.mrf.mxu3 }
 0x231   : > { %v5289_v30 = vpop.f32.mrf.mxu0  ;;  %v5308_v31 = vpop.f32.mrf.mxu1 }
 0x232   : > { %v5345_v33 = vadd.f32 %v5344_v36, %v5326_v27  ;;  %v5290_v37 = vadd.f32 %v5289_v30, %v5271_v26 }
 0x234   : > { %v5354_v45 = vpack.c.bf16 %v5345_v33, %v5345_v33  ;;  %v5309_v54 = vadd.f32 %v5308_v31, %v5290_v37 }
 0x236   : > { %5359 = vst.msk [vmem:[#allocation2] sm:$0xf] %vm5358_vm0, %v5354_v45 }
 0x237   : > { %v5327_v40 = vpop.f32.mrf.mxu2 }
 0x238   : > { %v5328_v44 = vadd.f32 %v5327_v40, %v5309_v54  ;;  %v5346_v46 = vpop.f32.mrf.mxu3 }
 0x239   : > { %v5292_v47 = vpop.f32.mrf.mxu0  ;;  %v5311_v51 = vpop.f32.mrf.mxu1 }
 0x23a   : > { %v5347_v50 = vadd.f32 %v5346_v46, %v5328_v44  ;;  %v5293_v49 = vadd.f32 %v5292_v47, %v5274_v43 }
 0x23c   : > { %v5355_v61 = vpack.c.bf16 %v5347_v50, %v5347_v50  ;;  %v5312_v57 = vadd.f32 %v5311_v51, %v5293_v49 }
 0x23e   : > { %5360 = vst.msk [vmem:[#allocation2 + $0x4] sm:$0xf] %vm5358_vm0, %v5355_v61 }
 0x23f   : > { %v5330_v52 = vpop.f32.mrf.mxu2 }
 0x240   : > { %v5331_v60 = vadd.f32 %v5330_v52, %v5312_v57  ;;  %v5349_v55 = vpop.f32.mrf.mxu3 }
 0x241   : > { %v5294_v0 = vpop.f32.mrf.mxu0  ;;  %v5313_v7 = vpop.f32.mrf.mxu1 }
 0x242   : > { %v5350_v56 = vadd.f32 %v5349_v55, %v5331_v60  ;;  %v5295_v59 = vadd.f32 %v5294_v0, %v5276_v53 }
 0x244   : > { %v5356_v58 = vpack.c.bf16 %v5350_v56, %v5350_v56  ;;  %v5314_v63 = vadd.f32 %v5313_v7, %v5295_v59 }
 0x246   : > { %5361 = vst.msk [vmem:[#allocation2 + $0x8] sm:$0xf] %vm5358_vm0, %v5356_v58 }
 0x247   : > { %v5332_v41 = vpop.f32.mrf.mxu2 }
 0x248   : > { %v5333_v1 = vadd.f32 %v5332_v41, %v5314_v63  ;;  %v5351_v2 = vpop.f32.mrf.mxu3 }
 0x24a   : > { %v5352_v13 = vadd.f32 %v5351_v2, %v5333_v1 }
 0x24c   : > { %v5357_v3 = vpack.c.bf16 %v5352_v13, %v5352_v13 }
 0x24e   : > { %5362 = vst.msk [vmem:[#allocation2 + $0xc] sm:$0xf] %vm5358_vm0, %v5357_v3 }
 0x24f PF: > { %v7512_v11 = vld [vmem:[%s8195_s17] sm:$0xf]  ;;  %v7944_v4 = vld [vmem:[%s8195_s17 + $0xc] sm:$0xf0]  ;;  %v7942_v8 = vld [vmem:[%s8195_s17 + $0x4] sm:$0xf] }
 0x250   : > { %v7513_v5 = vor.u32 %v7944_v4, %v7512_v11  ;;  %v7514_v6 = vld [vmem:[%s8195_s17 + $0x10] sm:$0xf0]  ;;  %v7520_v9 = vld [vmem:[%s8195_s17 + $0x8] sm:$0xf]  ;;  %v7945_v24 = vld [vmem:[%s8195_s17 + $0x14] sm:$0xf0] }
 0x251   : > { %v7517_v20 = vor.u32 %v7942_v8, %v7514_v6  ;;  %v7521_v10 = vor.u32 %v7945_v24, %v7520_v9  ;;  %v7943_v16 = vld [vmem:[%s8195_s17 + $0xc] sm:$0xf]  ;;  %v7522_v12 = vld [vmem:[%s8195_s17 + $0x18] sm:$0xf0]  ;;  %v7940_v34 = vld [vmem:[#allocation2] sm:$0xff]  ;;  %vm5416_vm1 = vcmask 130048  }
 0x252   : > { %5430 = vmatpush.bf16.msra.mxu0 %v7513_v5  ;;  %v7525_v15 = vor.u32 %v7943_v16, %v7522_v12  ;;  %v5371_v29 = vld [vmem:[%s302_s16] sm:$0xf]  ;;  %s7946_s12 = sshll.u32 (%p8172_p6), %s8097_s20, 3 }
 0x253   : > { %5449 = vmatpush.bf16.msra.mxu1 %v7517_v20  ;;  %5468 = vmatpush.bf16.msra.mxu2 %v7521_v10  ;;  %v5372_v18 = vunpack.c.l.bf16 %v5371_v29  ;;  %s5623_s14 = scalar_lea.vmem (%p8172_p6), %s9985_s5, %s7946_s12 }
 0x254   : > { %5487 = vmatpush.bf16.msra.mxu3 %v7525_v15 }
 0x255   : > { %7526 = vmatmul.msk.bf16.vlgmr.msra.gmra.mxu0 %vm5416_vm1, %v7940_v34  ;;  %v7941_v17 = vld [vmem:[#allocation2 + $0x8] sm:$0xff]  ;;  %v5374_v19 = vperm.slane %v5372_v18, 0  ;;  %v5375_v28 = vperm.slane %v5372_v18, 2  ;;  %v5376_v23 = vperm.slane %v5372_v18, 4  ;;  %v5377_v26 = vperm.slane %v5372_v18, 6 }
 0x256   : > { %7528 = vmatmul.msk.bf16.vlgmr.msra.gmra.mxu1 %vm5416_vm1, %v7940_v34  ;;  %7530 = vmatmul.msk.bf16.vlgmr.msra.gmra.mxu2 %vm5416_vm1, %v7940_v34 }
 0x257   : > { %7532 = vmatmul.msk.bf16.vlgmr.msra.gmra.mxu3 %vm5416_vm1, %v7940_v34  ;;  %v9927_v21 = vperm.slane %v5374_v19, 0  ;;  %v9929_v39 = vperm.slane %v5375_v28, 0  ;;  %v9933_v31 = vperm.slane %v5376_v23, 0  ;;  %v9935_v33 = vperm.slane %v5377_v26, 0 }
 0x265   : > { %7527 = vmatmul.msk.bf16.gmra.mxu0 %vm5416_vm1, %v7941_v17 }
 0x266   : > { %7529 = vmatmul.msk.bf16.gmra.mxu1 %vm5416_vm1, %v7941_v17  ;;  %7531 = vmatmul.msk.bf16.gmra.mxu2 %vm5416_vm1, %v7941_v17 }
 0x267   : > { %7533 = vmatmul.msk.bf16.gmra.mxu3 %vm5416_vm1, %v7941_v17 }
 0x2d2   : > { %v5432_v22 = vpop.f32.mrf.mxu0 }
 0x2d3   : > { %v5433_v35 = vadd.f32 %v5432_v22, %v9927_v21  ;;  %v5451_v25 = vpop.f32.mrf.mxu1 }
 0x2d4   : > { %v5452_v27 = vadd.f32 %v5451_v25, %v9929_v39 }
 0x2d5   : > { %v7534_v36 = vclamps-f32 %v5433_v35, 1.0 }
 0x2d6   : > { %v7535_v30 = vclamps-f32 %v5452_v27, 1.0 }
 0x2d7   : > { %v5531_v32 = vadd.f32 1.0, %v7534_v36 }
 0x2d8   : > { %v5532_v37 = vadd.f32 1.0, %v7535_v30 }
 0x2d9   : > { %v5547_v38 = vmul.f32 127.5, %v5531_v32  ;;  %v5470_v42 = vpop.f32.mrf.mxu2 }
 0x2da   : > { %v5548_v45 = vmul.f32 127.5, %v5532_v37  ;;  %v5471_v48 = vadd.f32 %v5470_v42, %v9933_v31  ;;  %v5489_v54 = vpop.f32.mrf.mxu3  ;;  %v5434_v40 = vpop.f32.mrf.mxu0 }
 0x2db   : > { %v5563_v43 = vadd.f32 0.5, %v5547_v38  ;;  %v5490_v44 = vadd.f32 %v5489_v54, %v9935_v33  ;;  %v5435_v46 = vadd.f32 %v5434_v40, %v9927_v21  ;;  %v5453_v47 = vpop.f32.mrf.mxu1 }
 0x2dc   : > { %v5564_v14 = vadd.f32 0.5, %v5548_v45  ;;  %v7536_v50 = vclamps-f32 %v5471_v48, 1.0  ;;  %v5454_v49 = vadd.f32 %v5453_v47, %v9929_v39 }
 0x2dd   : > { %vm7947_vm2 = vcmp.lt.s32.totalorder %v5563_v43, 0  ;;  %v7948_v51 = vceil.f32 %v5563_v43  ;;  %v7949_v62 = vfloor.f32 %v5563_v43  ;;  %v7537_v61 = vclamps-f32 %v5490_v44, 1.0 }
 0x2de   : > { %vm7952_vm3 = vcmp.lt.s32.totalorder %v5564_v14, 0  ;;  %v7953_v57 = vceil.f32 %v5564_v14  ;;  %v7954_v52 = vfloor.f32 %v5564_v14  ;;  %v5533_v53 = vadd.f32 1.0, %v7536_v50 }
 0x2df   : > { %v7950_v60 = vsel %vm7947_vm2, %v7948_v51, %v7949_v62  ;;  %v5534_v55 = vadd.f32 1.0, %v7537_v61  ;;  %v7538_v0 = vclamps-f32 %v5435_v46, 1.0  ;;  %v7539_v56 = vclamps-f32 %v5454_v49, 1.0 }
 0x2e0   : > { %v7951_v59 = vcvt.f32.s32 %v7950_v60  ;;  %v7955_v58 = vsel %vm7952_vm3, %v7953_v57, %v7954_v52  ;;  %v5549_v7 = vmul.f32 127.5, %v5533_v53 }
 0x2e1   : > { %v7956_v63 = vcvt.f32.s32 %v7955_v58  ;;  %v5550_v41 = vmul.f32 127.5, %v5534_v55  ;;  %v5535_v1 = vadd.f32 1.0, %v7538_v0  ;;  %v5536_v2 = vadd.f32 1.0, %v7539_v56  ;;  %v5472_v13 = vpop.f32.mrf.mxu2 }
 0x2e2   : > { %v5565_v3 = vadd.f32 0.5, %v5549_v7  ;;  %v5473_v11 = vadd.f32 %v5472_v13, %v9933_v31  ;;  %v5491_v4 = vpop.f32.mrf.mxu3  ;;  %v5437_v8 = vpop.f32.mrf.mxu0 }
 0x2e3   : > { %v5595_v5 = vpack.c.b16 %v7956_v63, %v7951_v59  ;;  %v5566_v6 = vadd.f32 0.5, %v5550_v41  ;;  %v5551_v9 = vmul.f32 127.5, %v5535_v1  ;;  %v5552_v24 = vmul.f32 127.5, %v5536_v2  ;;  %v5456_v28 = vpop.f32.mrf.mxu1 }
 0x2e4   : > { %vm7957_vm4 = vcmp.lt.s32.totalorder %v5565_v3, 0  ;;  %v7958_v20 = vceil.f32 %v5565_v3  ;;  %v7959_v10 = vfloor.f32 %v5565_v3  ;;  %v7540_v16 = vclamps-f32 %v5473_v11, 1.0 }
 0x2e5   : > { %vm7962_vm5 = vcmp.lt.s32.totalorder %v5566_v6, 0  ;;  %v7963_v12 = vceil.f32 %v5566_v6  ;;  %v7964_v34 = vfloor.f32 %v5566_v6  ;;  %v5567_v15 = vadd.f32 0.5, %v5551_v9 }
 0x2e6   : > { %v7960_v17 = vsel %vm7957_vm4, %v7958_v20, %v7959_v10  ;;  %v5568_v29 = vadd.f32 0.5, %v5552_v24  ;;  %v5537_v18 = vadd.f32 1.0, %v7540_v16  ;;  %v5492_v19 = vadd.f32 %v5491_v4, %v9935_v33 }
 0x2e7   : > { %v7961_v22 = vcvt.f32.s32 %v7960_v17  ;;  %v7965_v23 = vsel %vm7962_vm5, %v7963_v12, %v7964_v34  ;;  %vm7967_vm6 = vcmp.lt.s32.totalorder %v5567_v15, 0  ;;  %v7968_v35 = vceil.f32 %v5567_v15 }
 0x2e8   : > { %v7966_v25 = vcvt.f32.s32 %v7965_v23  ;;  %v7969_v26 = vfloor.f32 %v5567_v15  ;;  %vm7972_vm7 = vcmp.lt.s32.totalorder %v5568_v29, 0  ;;  %v7973_v27 = vceil.f32 %v5568_v29 }
 0x2e9   : > { %v7974_v36 = vfloor.f32 %v5568_v29  ;;  %v5553_v30 = vmul.f32 127.5, %v5537_v18  ;;  %v7541_v32 = vclamps-f32 %v5492_v19, 1.0  ;;  %v5438_v37 = vadd.f32 %v5437_v8, %v9927_v21  ;;  %v5475_v38 = vpop.f32.mrf.mxu2 }
 0x2ea   : > { %v5596_v42 = vpack.c.b16 %v7966_v25, %v7961_v22  ;;  %v7970_v45 = vsel %vm7967_vm6, %v7968_v35, %v7969_v26  ;;  %v5457_v48 = vadd.f32 %v5456_v28, %v9929_v39  ;;  %v5476_v54 = vadd.f32 %v5475_v38, %v9933_v31  ;;  %v5494_v51 = vpop.f32.mrf.mxu3  ;;  %v5439_v62 = vpop.f32.mrf.mxu0 }
 0x2eb   : > { %v7971_v40 = vcvt.f32.s32 %v7970_v45  ;;  %v7975_v43 = vsel %vm7972_vm7, %v7973_v27, %v7974_v36  ;;  %v5569_v44 = vadd.f32 0.5, %v5553_v30  ;;  %v5538_v46 = vadd.f32 1.0, %v7541_v32  ;;  %v5458_v13 = vpop.f32.mrf.mxu1 }
 0x2ec   : > { %v5597_v47 = vpack.c.b8 %v5596_v42, %v5595_v5  ;;  %v7976_v14 = vcvt.f32.s32 %v7975_v43  ;;  %v7542_v50 = vclamps-f32 %v5438_v37, 1.0  ;;  %v7543_v49 = vclamps-f32 %v5457_v48, 1.0 }
 0x2ed   : > { %vm7977_vm8 = vcmp.lt.s32.totalorder %v5569_v44, 0  ;;  %v7978_v61 = vceil.f32 %v5569_v44  ;;  %v7979_v57 = vfloor.f32 %v5569_v44  ;;  %v5554_v52 = vmul.f32 127.5, %v5538_v46 }
 0x2ee   : > { %5607 = vst [vmem:[%s8197_s24] sm:$0xff] %v5597_v47  ;;  %v5598_v53 = vpack.c.b16 %v7976_v14, %v7971_v40  ;;  %v5539_v60 = vadd.f32 1.0, %v7542_v50  ;;  %v5540_v55 = vadd.f32 1.0, %v7543_v49  ;;  %v7544_v0 = vclamps-f32 %v5476_v54, 1.0 }
 0x2ef   : > { %v7980_v56 = vsel %vm7977_vm8, %v7978_v61, %v7979_v57  ;;  %v5570_v59 = vadd.f32 0.5, %v5554_v52  ;;  %v5495_v58 = vadd.f32 %v5494_v51, %v9935_v33  ;;  %v5440_v7 = vadd.f32 %v5439_v62, %v9927_v21 }
 0x2f0   : > { %v7981_v63 = vcvt.f32.s32 %v7980_v56  ;;  %v5555_v41 = vmul.f32 127.5, %v5539_v60  ;;  %v5556_v1 = vmul.f32 127.5, %v5540_v55  ;;  %v5541_v2 = vadd.f32 1.0, %v7544_v0 }
 0x2f1   : > { %vm7982_vm9 = vcmp.lt.s32.totalorder %v5570_v59, 0  ;;  %v7983_v3 = vceil.f32 %v5570_v59  ;;  %v7984_v11 = vfloor.f32 %v5570_v59  ;;  %v7545_v4 = vclamps-f32 %v5495_v58, 1.0  ;;  %v5477_v8 = vpop.f32.mrf.mxu2 }
 0x2f2   : > { %v5571_v5 = vadd.f32 0.5, %v5555_v41  ;;  %v5572_v6 = vadd.f32 0.5, %v5556_v1  ;;  %v5557_v9 = vmul.f32 127.5, %v5541_v2  ;;  %v7546_v24 = vclamps-f32 %v5440_v7, 1.0  ;;  %v5496_v35 = vpop.f32.mrf.mxu3 }
 0x2f3   : > { %v7985_v20 = vsel %vm7982_vm9, %v7983_v3, %v7984_v11  ;;  %v5542_v10 = vadd.f32 1.0, %v7545_v4  ;;  %v5459_v16 = vadd.f32 %v5458_v13, %v9929_v39  ;;  %v5478_v21 = vadd.f32 %v5477_v8, %v9933_v31 }
 0x2f4   : > { %v7986_v12 = vcvt.f32.s32 %v7985_v20  ;;  %vm7987_vm10 = vcmp.lt.s32.totalorder %v5571_v5, 0  ;;  %v7988_v34 = vceil.f32 %v5571_v5  ;;  %v7989_v15 = vfloor.f32 %v5571_v5 }
 0x2f5   : > { %vm7992_vm11 = vcmp.lt.s32.totalorder %v5572_v6, 0  ;;  %v7993_v17 = vceil.f32 %v5572_v6  ;;  %v7994_v29 = vfloor.f32 %v5572_v6  ;;  %v5573_v18 = vadd.f32 0.5, %v5557_v9 }
 0x2f6   : > { %v5599_v19 = vpack.c.b16 %v7986_v12, %v7981_v63  ;;  %v7990_v28 = vsel %vm7987_vm10, %v7988_v34, %v7989_v15  ;;  %v5558_v22 = vmul.f32 127.5, %v5542_v10  ;;  %v5543_v23 = vadd.f32 1.0, %v7546_v24  ;;  %v5658_v10 = vld [vmem:[%s8197_s24] sm:$0xff] (%p8172_p6) }
 0x2f7   : > { %v7991_v25 = vcvt.f32.s32 %v7990_v28  ;;  %v7995_v26 = vsel %vm7992_vm11, %v7993_v17, %v7994_v29  ;;  %vm7997_vm12 = vcmp.lt.s32.totalorder %v5573_v18, 0  ;;  %v7998_v39 = vceil.f32 %v5573_v18  ;;  %5659 = vst [vmem:[%s5623_s14] sm:$0xff] (%p8172_p6), %v5658_v10 }
 0x2f8   : > { %v5600_v27 = vpack.c.b8 %v5599_v19, %v5598_v53  ;;  %v7996_v31 = vcvt.f32.s32 %v7995_v26  ;;  %v7999_v36 = vfloor.f32 %v5573_v18  ;;  %v5574_v30 = vadd.f32 0.5, %v5558_v22 }
 0x2f9   : > { %v5559_v32 = vmul.f32 127.5, %v5543_v23  ;;  %v7547_v37 = vclamps-f32 %v5459_v16, 1.0  ;;  %v7548_v38 = vclamps-f32 %v5478_v21, 1.0  ;;  %v5497_v42 = vadd.f32 %v5496_v35, %v9935_v33 }
 0x2fa   : > { %5608 = vst [vmem:[%s8197_s24 + $0x8] sm:$0xff] %v5600_v27  ;;  %v8000_v45 = vsel %vm7997_vm12, %v7998_v39, %v7999_v36  ;;  %vm8002_vm13 = vcmp.lt.s32.totalorder %v5574_v30, 0  ;;  %v8003_v48 = vceil.f32 %v5574_v30  ;;  %v8004_v54 = vfloor.f32 %v5574_v30 }
 0x2fb   : > { %v5575_v40 = vadd.f32 0.5, %v5559_v32  ;;  %v5544_v43 = vadd.f32 1.0, %v7547_v37  ;;  %v8001_v44 = vcvt.f32.s32 %v8000_v45  ;;  %v5545_v46 = vadd.f32 1.0, %v7548_v38 }
 0x2fc   : > { %v7549_v47 = vclamps-f32 %v5497_v42, 1.0  ;;  %v5601_v14 = vpack.c.b16 %v7996_v31, %v7991_v25  ;;  %v8005_v50 = vsel %vm8002_vm13, %v8003_v48, %v8004_v54 }
 0x2fd   : > { %v8006_v49 = vcvt.f32.s32 %v8005_v50  ;;  %v5560_v51 = vmul.f32 127.5, %v5544_v43  ;;  %v5561_v62 = vmul.f32 127.5, %v5545_v46  ;;  %v8008_v57 = vceil.f32 %v5575_v40 }
 0x2fe   : > { %v5546_v61 = vadd.f32 1.0, %v7549_v47  ;;  %v8009_v33 = vfloor.f32 %v5575_v40  ;;  %vm8007_vm14 = vcmp.lt.s32.totalorder %v5575_v40, 0 }
 0x2ff   : > { %v5602_v52 = vpack.c.b16 %v8006_v49, %v8001_v44  ;;  %v5576_v53 = vadd.f32 0.5, %v5560_v51  ;;  %v5577_v60 = vadd.f32 0.5, %v5561_v62 }
 0x300   : > { %v5562_v55 = vmul.f32 127.5, %v5546_v61  ;;  %v8010_v41 = vsel %vm8007_vm14, %v8008_v57, %v8009_v33 }
 0x301   : > { %v5603_v0 = vpack.c.b8 %v5602_v52, %v5601_v14  ;;  %vm8012_vm15 = vcmp.lt.s32.totalorder %v5576_v53, 0  ;;  %v8013_v56 = vceil.f32 %v5576_v53  ;;  %v8014_v59 = vfloor.f32 %v5576_v53  ;;  %v5660_v16 = vld [vmem:[%s8197_s24 + $0x8] sm:$0xff] (%p8172_p6) }
 0x302   : > { %vm8017_vm0 = vcmp.lt.s32.totalorder %v5577_v60, 0  ;;  %v8018_v58 = vceil.f32 %v5577_v60  ;;  %v8019_v7 = vfloor.f32 %v5577_v60  ;;  %v5578_v63 = vadd.f32 0.5, %v5562_v55  ;;  %5661 = vst [vmem:[%s5623_s14 + $0x60] sm:$0xff] (%p8172_p6), %v5660_v16 }
 0x303   : > { %5609 = vst [vmem:[%s8197_s24 + $0x10] sm:$0xff] %v5603_v0  ;;  %v8015_v1 = vsel %vm8012_vm15, %v8013_v56, %v8014_v59  ;;  %v8011_v11 = vcvt.f32.s32 %v8010_v41 }
 0x304   : > { %v8020_v2 = vsel %vm8017_vm0, %v8018_v58, %v8019_v7  ;;  %vm8022_vm1 = vcmp.lt.s32.totalorder %v5578_v63, 0  ;;  %v8023_v13 = vceil.f32 %v5578_v63  ;;  %v8024_v3 = vfloor.f32 %v5578_v63 }
 0x305   : > { %v8016_v4 = vcvt.f32.s32 %v8015_v1  ;;  %v8021_v8 = vcvt.f32.s32 %v8020_v2 }
 0x306   : > { %v8025_v5 = vsel %vm8022_vm1, %v8023_v13, %v8024_v3 }
 0x307   : > { %v8026_v6 = vcvt.f32.s32 %v8025_v5  ;;  %v5604_v9 = vpack.c.b16 %v8016_v4, %v8011_v11 }
 0x309   : > { %v5605_v24 = vpack.c.b16 %v8026_v6, %v8021_v8  ;;  %5617 = sbr.rel (!%p8172_p6) target bundleno = 790 (0x316), region = 71 }
 0x30a   : > { %v5662_v21 = vld [vmem:[%s8197_s24 + $0x10] sm:$0xff] (%p8172_p6) }
 0x30b   : > { %v5606_v20 = vpack.c.b8 %v5605_v24, %v5604_v9  ;;  %5663 = vst [vmem:[%s5623_s14 + $0xc0] sm:$0xff] (%p8172_p6), %v5662_v21 }
 0x30d   : > { %5610 = vst [vmem:[%s8197_s24 + $0x18] sm:$0xff] %v5606_v20 }
 0x314   : > { %v5664_v12 = vld [vmem:[%s8197_s24 + $0x18] sm:$0xff] }
 0x315   : > { %5665 = vst [vmem:[%s5623_s14 + $0x120] sm:$0xff] %v5664_v12 }
 0x316 PF: > { %s15_s22 = sadd.s32 1, %s8105_s22   ;;  %s9987_s18 = smov %s8093_s19 }
 0x317   : > { %p12_p13 = scmp.ge.s32.totalorder %s15_s22, 14   ;;  %s9988_s19 = smov %s8177_s28 }
 0x318   : > { %s9989_s20 = smov %s8101_s21  ;;  %s9990_s21 = smov %s9992_s23 }
 0x319   :  { %14 = sbr.rel (!%p12_p13) target bundleno = 3 (0x3), region = 146 }

</bundles_post_ra>
